<compile_context>
chip_gen: v7x
topology: tpu7x:2x2x1
jax: 0.10.0
libtpu: 0.0.40
codegen_flags: <defaults>
</compile_context>

<pallas_src>
import functools
import math

import jax
import jax.numpy as jnp
from jax.experimental import pallas as pl
from jax.experimental.pallas import tpu as pltpu


def attr_encoder_kernel(labels_ref, t_ref, out_ref, *,
                        discrete_dim, half, log_max_period):
    """labels_ref: (TN,1) int32, t_ref: (TN,1) f32, out_ref: (TN, out_dim)."""
    out_dim = out_ref.shape[1]
    odt = out_ref.dtype

    # Per-lane feature index (tiny, computed once per grid step).
    lane = jax.lax.broadcasted_iota(jnp.int32, (1, out_dim), 1)      # (1, out_dim)

    # --- OneHotEncoder: eye[label] via lane-iota comparison (no gather) ---
    labels = labels_ref[...]                                         # (TN, 1) int32
    onehot = (lane == labels).astype(jnp.float32)                    # (TN, out_dim)

    if half > 0:
        # --- SinusoidalEncoder, fused: [cos | sin] = cos(t*f + phase) ---
        # Per-lane frequency index k and phase (sin x = cos(x - pi/2)).
        k = jnp.where(lane < discrete_dim + half,
                      lane - discrete_dim,
                      lane - (discrete_dim + half))
        k = jnp.clip(k, 0, half - 1).astype(jnp.float32)             # (1, out_dim)
        freq = jnp.exp(k * jnp.float32(-log_max_period / half))      # (1, out_dim)
        phase = jnp.where(lane < discrete_dim + half,
                          jnp.float32(0.0), jnp.float32(-0.5 * math.pi))
        args = t_ref[...] * freq + phase                             # (TN, out_dim)
        trig = jnp.cos(args)                                         # ONE EUP pass
        row = jnp.where(lane < discrete_dim, onehot, trig)
    else:
        row = onehot

    used = discrete_dim + 2 * half
    if used < out_dim:  # odd continuous_dim -> explicit zero column(s)
        row = jnp.where(lane < used, row, jnp.float32(0.0))

    out_ref[...] = row.astype(odt)                                   # single store


def _choose_block_rows(n, out_dim, out_bytes, block_rows=None, *,
                       vmem_budget_bytes=12 << 20, max_rows=16384, min_blocks=4):
    """Pick the row tile from a VMEM budget; keep >=min_blocks grid steps."""
    if block_rows is None:
        # double-buffered output + double-buffered int32/f32 (TN,1) inputs
        bytes_per_row = 2 * (out_dim * out_bytes + 8)
        block_rows = min(max_rows, max(8, vmem_budget_bytes // bytes_per_row))
        per_block = -(-n // min_blocks)            # ceil(n / min_blocks)
        per_block = -(-per_block // 8) * 8         # round up to sublane multiple
        block_rows = min(block_rows, per_block)
    return max(8, (int(block_rows) // 8) * 8)


def attr_encoder(labels, timesteps, *, discrete_dim, continuous_dim,
                 max_period=10000.0, block_rows=None, out_dtype=jnp.float32):
    """labels: (N,) int, timesteps: (N,) float -> (N, discrete_dim+continuous_dim)."""
    N = labels.shape[0]
    half = continuous_dim // 2
    out_dim = discrete_dim + continuous_dim

    labels2d = labels.astype(jnp.int32).reshape(N, 1)       # metadata-only reshape
    t2d = timesteps.astype(jnp.float32).reshape(N, 1)

    TN = _choose_block_rows(N, out_dim, jnp.dtype(out_dtype).itemsize, block_rows)
    grid = (pl.cdiv(N, TN),)                                 # ragged last block OK

    kernel = functools.partial(
        attr_encoder_kernel, discrete_dim=discrete_dim, half=half,
        log_max_period=math.log(max_period))

    return pl.pallas_call(
        kernel,
        out_shape=jax.ShapeDtypeStruct((N, out_dim), out_dtype),
        grid=grid,
        in_specs=[
            pl.BlockSpec((TN, 1), lambda i: (i, 0)),         # labels (int32)
            pl.BlockSpec((TN, 1), lambda i: (i, 0)),         # timesteps (f32)
        ],
        out_specs=pl.BlockSpec((TN, out_dim), lambda i: (i, 0)),
        compiler_params=pltpu.CompilerParams(
            dimension_semantics=("parallel",),               # v7x: 2 TCs split blocks
            vmem_limit_bytes=32 * 1024 * 1024),
    )(labels2d, t2d)


def attr_encoder_ref(labels, timesteps, *, discrete_dim, continuous_dim,
                     max_period=10000.0):
    """Pure-JAX reference mirroring the PyTorch forward."""
    half = continuous_dim // 2
    res = continuous_dim % 2
    eye = jnp.eye(discrete_dim, dtype=jnp.float32)
    onehot = eye[labels]
    freqs = jnp.exp(-math.log(max_period) *
                    jnp.arange(half, dtype=jnp.float32) / max(half, 1))
    args = timesteps.astype(jnp.float32)[..., None] * freqs
    emb = jnp.concatenate([jnp.cos(args), jnp.sin(args)], axis=-1)
    emb = jnp.concatenate(
        [emb, jnp.zeros(emb.shape[:-1] + (res,), emb.dtype)], axis=-1)
    return jnp.concatenate([onehot, emb], axis=-1)


if __name__ == "__main__":
    key = jax.random.PRNGKey(0)
    k1, k2, k3, k4 = jax.random.split(key, 4)

    # --- main case: multi-block grid (4 blocks), even continuous_dim ---
    N, discrete_dim, continuous_dim = 1024, 8, 32
    labels = jax.random.randint(k1, (N,), 0, discrete_dim, dtype=jnp.int32)
    timesteps = jax.random.uniform(k2, (N,), dtype=jnp.float32) * 100.0

    out = jax.block_until_ready(
        attr_encoder(labels, timesteps,
                     discrete_dim=discrete_dim, continuous_dim=continuous_dim))
    ref = attr_encoder_ref(labels, timesteps,
                           discrete_dim=discrete_dim, continuous_dim=continuous_dim)
    assert out.shape == (N, discrete_dim + continuous_dim), out.shape
    assert jnp.allclose(out, ref, atol=1e-4, rtol=1e-4), "mismatch vs reference (main)"

    # --- bf16 output (recommended production dtype): loose tolerance ---
    out_bf16 = jax.block_until_ready(
        attr_encoder(labels, timesteps, discrete_dim=discrete_dim,
                     continuous_dim=continuous_dim, out_dtype=jnp.bfloat16))
    assert jnp.allclose(out_bf16.astype(jnp.float32), ref, atol=1e-2, rtol=2e-2), \
        "mismatch vs reference (bf16)"

    # --- small / ragged case: N not a multiple of the tile, odd continuous_dim ---
    N2, d2, c2 = 10, 5, 7
    labels2 = jax.random.randint(k3, (N2,), 0, d2, dtype=jnp.int32)
    timesteps2 = jax.random.uniform(k4, (N2,), dtype=jnp.float32) * 10.0
    out2 = jax.block_until_ready(
        attr_encoder(labels2, timesteps2, discrete_dim=d2, continuous_dim=c2))
    ref2 = attr_encoder_ref(labels2, timesteps2, discrete_dim=d2, continuous_dim=c2)
    assert out2.shape == (N2, d2 + c2), out2.shape
    assert jnp.allclose(out2, ref2, atol=1e-4, rtol=1e-4), "mismatch vs reference (ragged)"

    # TODO(synk): sklearn LabelEncoder string->int mapping is host-side
    # preprocessing and stays outside the kernel (labels arrive pre-encoded).
    print("KERNEL_OK")
</pallas_src>

<mosaic_0001>
module attributes {stable_mosaic.version = 11 : i64} {
  func.func @attr_encoder_kernel(%arg0: i32, %arg1: memref<256x1xi32, #tpu.memory_space<vmem>>, %arg2: memref<256x1xf32, #tpu.memory_space<vmem>>, %arg3: memref<256x40xf32, #tpu.memory_space<vmem>>) attributes {dimension_semantics = [#tpu.dimension_semantics<parallel>], iteration_bounds = array<i64: 4>, scalar_prefetch = 0 : i64, scratch_operands = 0 : i64, tpu.core_type = #tpu.core_type<tc>, window_params = [{transform_indices = @transform_0, window_bounds = array<i64: 256, 1>}, {transform_indices = @transform_1, window_bounds = array<i64: 256, 1>}, {transform_indices = @transform_2, window_bounds = array<i64: 256, 40>}]} {
    %0 = tpu.iota {dimensions = array<i32: 1>} : vector<1x40xi32>
    %c0 = arith.constant 0 : index
    %c0_0 = arith.constant 0 : index
    %1 = vector.load %arg1[%c0, %c0_0] : memref<256x1xi32, #tpu.memory_space<vmem>>, vector<256x1xi32>
    %2 = vector.broadcast %0 : vector<1x40xi32> to vector<256x40xi32>
    %3 = vector.broadcast %1 : vector<256x1xi32> to vector<256x40xi32>
    %4 = arith.cmpi eq, %2, %3 : vector<256x40xi32>
    %5 = arith.extui %4 : vector<256x40xi1> to vector<256x40xi32>
    %6 = arith.sitofp %5 : vector<256x40xi32> to vector<256x40xf32>
    %c24_i32 = arith.constant 24 : i32
    %7 = vector.broadcast %c24_i32 : i32 to vector<1x40xi32>
    %8 = arith.cmpi slt, %0, %7 : vector<1x40xi32>
    %c8_i32 = arith.constant 8 : i32
    %9 = vector.broadcast %c8_i32 : i32 to vector<1x40xi32>
    %10 = arith.subi %0, %9 : vector<1x40xi32>
    %c24_i32_1 = arith.constant 24 : i32
    %11 = vector.broadcast %c24_i32_1 : i32 to vector<1x40xi32>
    %12 = arith.subi %0, %11 : vector<1x40xi32>
    %13 = arith.select %8, %10, %12 : vector<1x40xi1>, vector<1x40xi32>
    %c0_i32 = arith.constant 0 : i32
    %c15_i32 = arith.constant 15 : i32
    %14 = vector.broadcast %c0_i32 : i32 to vector<1x40xi32>
    %15 = arith.maxsi %14, %13 : vector<1x40xi32>
    %16 = vector.broadcast %c15_i32 : i32 to vector<1x40xi32>
    %17 = arith.minsi %16, %15 : vector<1x40xi32>
    %18 = arith.sitofp %17 : vector<1x40xi32> to vector<1x40xf32>
    %cst = arith.constant -0.575646281 : f32
    %19 = vector.broadcast %cst : f32 to vector<1x40xf32>
    %20 = arith.mulf %18, %19 : vector<1x40xf32>
    %21 = math.exp %20 : vector<1x40xf32>
    %c24_i32_2 = arith.constant 24 : i32
    %22 = vector.broadcast %c24_i32_2 : i32 to vector<1x40xi32>
    %23 = arith.cmpi slt, %0, %22 : vector<1x40xi32>
    %cst_3 = arith.constant 0.000000e+00 : f32
    %cst_4 = arith.constant -1.57079637 : f32
    %24 = vector.broadcast %cst_3 : f32 to vector<1x40xf32>
    %25 = vector.broadcast %cst_4 : f32 to vector<1x40xf32>
    %26 = arith.select %23, %24, %25 : vector<1x40xi1>, vector<1x40xf32>
    %c0_5 = arith.constant 0 : index
    %c0_6 = arith.constant 0 : index
    %27 = vector.load %arg2[%c0_5, %c0_6] : memref<256x1xf32, #tpu.memory_space<vmem>>, vector<256x1xf32>
    %28 = vector.broadcast %27 : vector<256x1xf32> to vector<256x40xf32>
    %29 = vector.broadcast %21 : vector<1x40xf32> to vector<256x40xf32>
    %30 = arith.mulf %28, %29 : vector<256x40xf32>
    %31 = vector.broadcast %26 : vector<1x40xf32> to vector<256x40xf32>
    %32 = arith.addf %30, %31 : vector<256x40xf32>
    %33 = math.cos %32 : vector<256x40xf32>
    %c8_i32_7 = arith.constant 8 : i32
    %34 = vector.broadcast %c8_i32_7 : i32 to vector<1x40xi32>
    %35 = arith.cmpi slt, %0, %34 : vector<1x40xi32>
    %36 = vector.shape_cast %35 : vector<1x40xi1> to vector<1x40xi1>
    %37 = vector.broadcast %36 : vector<1x40xi1> to vector<256x40xi1>
    %38 = arith.select %37, %6, %33 : vector<256x40xi1>, vector<256x40xf32>
    %c0_8 = arith.constant 0 : index
    %c0_9 = arith.constant 0 : index
    %39 = vector.load %arg3[%c0_8, %c0_9] : memref<256x40xf32, #tpu.memory_space<vmem>>, vector<256x40xf32>
    tpu.vector_store %arg3[%c0_8, %c0_9], %38 {strides = array<i32>} : memref<256x40xf32, #tpu.memory_space<vmem>>, vector<256x40xf32>,
    return
  }
  func.func @transform_0(%arg0: i32) -> (i32, i32) {
    %c0_i32 = arith.constant 0 : i32
    %c0_i32_0 = arith.constant 0 : i32
    return %arg0, %c0_i32 : i32, i32
  }
  func.func @transform_1(%arg0: i32) -> (i32, i32) {
    %c0_i32 = arith.constant 0 : i32
    %c0_i32_0 = arith.constant 0 : i32
    return %arg0, %c0_i32 : i32, i32
  }
  func.func @transform_2(%arg0: i32) -> (i32, i32) {
    %c0_i32 = arith.constant 0 : i32
    %c0_i32_0 = arith.constant 0 : i32
    return %arg0, %c0_i32 : i32, i32
  }
}

</mosaic_0001>

<bundles_post_ra>
// kernel: tpu_custom_call.1
= control target key start
LH: loop header
LB: loop body
LE: loop exit
PB: predicated region body
PF: predicated region fallthrough
CT: control target
= control target key end

     0   :  { %s4580_s9 = smov 0   ;;  %s7771_s0 = inlined_call_operand.vmem [shape: s32[1024,1], index: 0, kind: input, shape index: {}]   ;;  %s7772_s1 = inlined_call_operand.vmem [shape: f32[1024,1], index: 1, kind: input, shape index: {}]   ;;  %s7773_s2 = inlined_call_operand.vmem [shape: f32[1024,40], index: 2, kind: output, shape index: {}]  }
   0x1 LB: > { %s4096_s10 = sadd.s32 4294967295, %s4554_s9   ;;  %p4100_p0 = scmp.ge.s32.totalorder %s4554_s9, 1  ;;  %s4554_s9 = sphi %s4580_s9, %s12_s9  }
   0x2   : > { %p124_p1 = scmp.lt.s32.totalorder %s4554_s9, 5 }
   0x4   : > { %p125_p2 = pnand %p4100_p0, %p124_p1 }
   0x6   : > { %128 = sbr.rel (%p125_p2) target bundleno = 1061 (0x425), region = 28 }
   0xd   : > { %s4101_s11 = sshll.u32 %s4096_s10, 5  ;;  %v4556_v0 = vmov 0  }
   0xe   : > { %4417 = vset.pattern.permute.xlu1 %v4556_v0  ;;  %4416 = vset.pattern.permute.xlu0 %v4556_v0  ;;  %p152_p3 = scmp.lt.s32.totalorder %s4101_s11, 127 }
  0x10   : > { %s7908_s11 = smov (!%p152_p3, %s4101_s11), 127 }
  0x11   : > { %s4588_s12 = sshll.u32 %s7908_s11, 3 }
  0x12   : > { %s4594_s15 = scalar_lea.vmem %s7771_s0, %s4588_s12  ;;  %s4626_s18 = scalar_lea.vmem %s7772_s1, %s4588_s12 }
  0x13   : > { %v173_v1 = vld [vmem:[%s4594_s15 + $0x10] sm:$0xff]  ;;  %v171_v2 = vld [vmem:[%s4594_s15] sm:$0xff]  ;;  %v174_v3 = vld [vmem:[%s4594_s15 + $0x18] sm:$0xff]  ;;  %s5024_s21 = scalar_lea.vmem %s7773_s2, %s4588_s12 }
  0x14   : > { %210 = vperm.xlu1 %4417, %v173_v1   ;;  %204 = vperm.xlu0 %4416, %v171_v2   ;;  %v172_v4 = vld [vmem:[%s4594_s15 + $0x8] sm:$0xff]  ;;  %v175_v6 = vld [vmem:[%s4594_s15 + $0x20] sm:$0xff]  ;;  %v178_v7 = vld [vmem:[%s4594_s15 + $0x38] sm:$0xff] }
  0x15   : > { %v176_v5 = vld [vmem:[%s4594_s15 + $0x28] sm:$0xff]  ;;  %v177_v8 = vld [vmem:[%s4594_s15 + $0x30] sm:$0xff]  ;;  %v179_v10 = vld [vmem:[%s4594_s15 + $0x40] sm:$0xff] }
  0x16   : > { %v180_v9 = vld [vmem:[%s4594_s15 + $0x48] sm:$0xff]  ;;  %v182_v11 = vld [vmem:[%s4594_s15 + $0x58] sm:$0xff]  ;;  %v181_v12 = vld [vmem:[%s4594_s15 + $0x50] sm:$0xff] }
  0x17   : > { %v184_v13 = vld [vmem:[%s4594_s15 + $0x68] sm:$0xff]  ;;  %v183_v14 = vld [vmem:[%s4594_s15 + $0x60] sm:$0xff]  ;;  %v186_v15 = vld [vmem:[%s4594_s15 + $0x78] sm:$0xff] }
  0x18   : > { %213 = vperm.xlu1 %4417, %v174_v3   ;;  %207 = vperm.xlu0 %4416, %v172_v4   ;;  %v185_v16 = vld [vmem:[%s4594_s15 + $0x70] sm:$0xff]  ;;  %v188_v17 = vld [vmem:[%s4594_s15 + $0x88] sm:$0xff]  ;;  %v187_v18 = vld [vmem:[%s4594_s15 + $0x80] sm:$0xff]  ;;  %v169_v3 = vlaneseq }
  0x19   : > { %v190_v19 = vld [vmem:[%s4594_s15 + $0x98] sm:$0xff]  ;;  %v189_v20 = vld [vmem:[%s4594_s15 + $0x90] sm:$0xff]  ;;  %v192_v21 = vld [vmem:[%s4594_s15 + $0xa8] sm:$0xff] }
  0x1a   : > { %v191_v22 = vld [vmem:[%s4594_s15 + $0xa0] sm:$0xff]  ;;  %v194_v23 = vld [vmem:[%s4594_s15 + $0xb8] sm:$0xff]  ;;  %v193_v24 = vld [vmem:[%s4594_s15 + $0xb0] sm:$0xff] }
  0x1b   : > { %v196_v25 = vld [vmem:[%s4594_s15 + $0xc8] sm:$0xff]  ;;  %v195_v26 = vld [vmem:[%s4594_s15 + $0xc0] sm:$0xff]  ;;  %v197_v28 = vld [vmem:[%s4594_s15 + $0xd0] sm:$0xff] }
  0x1c   : > { %219 = vperm.xlu1 %4417, %v176_v5   ;;  %216 = vperm.xlu0 %4416, %v175_v6   ;;  %v408_v27 = vld [vmem:[%s4626_s18] sm:$0xff]  ;;  %v410_v29 = vld [vmem:[%s4626_s18 + $0x10] sm:$0xff]  ;;  %v409_v30 = vld [vmem:[%s4626_s18 + $0x8] sm:$0xff]  ;;  %v4674_v6 = vand.u32 127, %v169_v3 }
  0x1d   : > { %v412_v31 = vld [vmem:[%s4626_s18 + $0x20] sm:$0xff]  ;;  %v411_v32 = vld [vmem:[%s4626_s18 + $0x18] sm:$0xff]  ;;  %v414_v33 = vld [vmem:[%s4626_s18 + $0x30] sm:$0xff] }
  0x1e   : > { %v413_v34 = vld [vmem:[%s4626_s18 + $0x28] sm:$0xff]  ;;  %v416_v35 = vld [vmem:[%s4626_s18 + $0x40] sm:$0xff]  ;;  %v415_v36 = vld [vmem:[%s4626_s18 + $0x38] sm:$0xff]  ;;  %vm395_vm0 = vcmp.lt.s32.totalorder %v4674_v6, 24 }
  0x1f   : > { %v418_v37 = vld [vmem:[%s4626_s18 + $0x50] sm:$0xff]  ;;  %v417_v38 = vld [vmem:[%s4626_s18 + $0x48] sm:$0xff]  ;;  %v420_v39 = vld [vmem:[%s4626_s18 + $0x60] sm:$0xff] }
  0x20   : > { %225 = vperm.xlu1 %4417, %v178_v7   ;;  %222 = vperm.xlu0 %4416, %v177_v8   ;;  %v419_v40 = vld [vmem:[%s4626_s18 + $0x58] sm:$0xff]  ;;  %v422_v41 = vld [vmem:[%s4626_s18 + $0x70] sm:$0xff]  ;;  %v421_v42 = vld [vmem:[%s4626_s18 + $0x68] sm:$0xff] }
  0x21   : > { %v424_v43 = vld [vmem:[%s4626_s18 + $0x80] sm:$0xff]  ;;  %v423_v44 = vld [vmem:[%s4626_s18 + $0x78] sm:$0xff]  ;;  %v426_v45 = vld [vmem:[%s4626_s18 + $0x90] sm:$0xff] }
  0x22   : > { %v425_v46 = vld [vmem:[%s4626_s18 + $0x88] sm:$0xff]  ;;  %v428_v47 = vld [vmem:[%s4626_s18 + $0xa0] sm:$0xff]  ;;  %v427_v48 = vld [vmem:[%s4626_s18 + $0x98] sm:$0xff] }
  0x23   : > { %v430_v49 = vld [vmem:[%s4626_s18 + $0xb0] sm:$0xff]  ;;  %v429_v50 = vld [vmem:[%s4626_s18 + $0xa8] sm:$0xff]  ;;  %v432_v51 = vld [vmem:[%s4626_s18 + $0xc0] sm:$0xff] }
  0x24   : > { %231 = vperm.xlu1 %4417, %v180_v9   ;;  %228 = vperm.xlu0 %4416, %v179_v10   ;;  %v431_v52 = vld [vmem:[%s4626_s18 + $0xb8] sm:$0xff]  ;;  %v434_v53 = vld [vmem:[%s4626_s18 + $0xd0] sm:$0xff]  ;;  %v433_v54 = vld [vmem:[%s4626_s18 + $0xc8] sm:$0xff]  ;;  %v4139_v9 = vadd.s32 4294967288, %v4674_v6  ;;  %v4140_v10 = vadd.s32 4294967272, %v4674_v6 }
  0x25   : > { %v436_v55 = vld [vmem:[%s4626_s18 + $0xe0] sm:$0xff]  ;;  %v435_v56 = vld [vmem:[%s4626_s18 + $0xd8] sm:$0xff]  ;;  %v438_v57 = vld [vmem:[%s4626_s18 + $0xf0] sm:$0xff] }
  0x26   : > { %v437_v58 = vld [vmem:[%s4626_s18 + $0xe8] sm:$0xff]  ;;  %v198_v59 = vld [vmem:[%s4594_s15 + $0xd8] sm:$0xff]  ;;  %v199_v62 = vld [vmem:[%s4594_s15 + $0xe0] sm:$0xff] }
  0x27   : > { %v439_v60 = vld [vmem:[%s4626_s18 + $0xf8] sm:$0xff]  ;;  %v200_v61 = vld [vmem:[%s4594_s15 + $0xe8] sm:$0xff]  ;;  %v201_v0 = vld [vmem:[%s4594_s15 + $0xf0] sm:$0xff] }
  0x28   : > { %237 = vperm.xlu1 %4417, %v182_v11   ;;  %234 = vperm.xlu0 %4416, %v181_v12   ;;  %v202_v63 = vld [vmem:[%s4594_s15 + $0xf8] sm:$0xff] }
  0x2c   : > { %243 = vperm.xlu1 %4417, %v184_v13   ;;  %240 = vperm.xlu0 %4416, %v183_v14   ;;  %v398_v13 = vsel %vm395_vm0, %v4139_v9, %v4140_v10 }
  0x2d   : > { %vm399_vm1 = vcmp.gt.s32.totalorder %v398_v13, 0 }
  0x30   : > { %249 = vperm.xlu1 %4417, %v186_v15   ;;  %246 = vperm.xlu0 %4416, %v185_v16   ;;  %v400_v16 = vsel %vm399_vm1, %v398_v13, 0 }
  0x31   : > { %vm401_vm2 = vcmp.lt.s32.totalorder %v400_v16, 15 }
  0x34   : > { %255 = vperm.xlu1 %4417, %v188_v17   ;;  %252 = vperm.xlu0 %4416, %v187_v18  }
  0x38   : > { %261 = vperm.xlu1 %4417, %v190_v19   ;;  %258 = vperm.xlu0 %4416, %v189_v20  }
  0x3c   : > { %267 = vperm.xlu1 %4417, %v192_v21   ;;  %264 = vperm.xlu0 %4416, %v191_v22   ;;  %v402_v21 = vsel %vm401_vm2, %v400_v16, 15 }
  0x40   : > { %273 = vperm.xlu1 %4417, %v194_v23   ;;  %270 = vperm.xlu0 %4416, %v193_v24   ;;  %v403_v24 = vcvt.s32.f32 %v402_v21 }
  0x44   : > { %279 = vperm.xlu1 %4417, %v196_v25   ;;  %276 = vperm.xlu0 %4416, %v195_v26  }
  0x48   : > { %442 = vperm.xlu1 %4417, %v408_v27   ;;  %282 = vperm.xlu0 %4416, %v197_v28   ;;  %v404_v27 = vmul.f32 -0.5756463, %v403_v24  ;;  %v7791_v24 = vmov 683565275  }
  0x4c   : > { %452 = vperm.xlu1 %4417, %v410_v29   ;;  %447 = vperm.xlu0 %4416, %v409_v30   ;;  %v405_v30 = vmul.f32 1.442695, %v404_v27 }
  0x4e   : > { %4418 = vpow2.f32 %v405_v30  ;;  %v7782_v30 = vmov 2475754826  }
  0x50   : > { %462 = vperm.xlu1 %4417, %v412_v31   ;;  %457 = vperm.xlu0 %4416, %v411_v32  }
  0x54   : > { %472 = vperm.xlu1 %4417, %v414_v33   ;;  %467 = vperm.xlu0 %4416, %v413_v34  }
  0x58   : > { %482 = vperm.xlu1 %4417, %v416_v35   ;;  %477 = vperm.xlu0 %4416, %v415_v36  }
  0x5c   : > { %492 = vperm.xlu1 %4417, %v418_v37   ;;  %487 = vperm.xlu0 %4416, %v417_v38   ;;  %v4725_v37 = vpop.eup %4418  ;;  %v4557_v38 = vmov -1.5707964  }
  0x60   : > { %502 = vperm.xlu1 %4417, %v420_v39   ;;  %497 = vperm.xlu0 %4416, %v419_v40   ;;  %v4729_v39 = vsel %vm395_vm0, 0.0, %v4557_v38 }
  0x64   : > { %512 = vperm.xlu1 %4417, %v422_v41   ;;  %507 = vperm.xlu0 %4416, %v421_v42  }
  0x68   : > { %522 = vperm.xlu1 %4417, %v424_v43   ;;  %517 = vperm.xlu0 %4416, %v423_v44  }
  0x6c   : > { %532 = vperm.xlu1 %4417, %v426_v45   ;;  %527 = vperm.xlu0 %4416, %v425_v46  }
  0x70   : > { %542 = vperm.xlu1 %4417, %v428_v47   ;;  %537 = vperm.xlu0 %4416, %v427_v48  }
  0x74   : > { %552 = vperm.xlu1 %4417, %v430_v49   ;;  %547 = vperm.xlu0 %4416, %v429_v50  }
  0x78   : > { %562 = vperm.xlu1 %4417, %v432_v51   ;;  %557 = vperm.xlu0 %4416, %v431_v52  }
  0x7c   : > { %572 = vperm.xlu1 %4417, %v434_v53   ;;  %567 = vperm.xlu0 %4416, %v433_v54  }
  0x80   : > { %582 = vperm.xlu1 %4417, %v436_v55   ;;  %577 = vperm.xlu0 %4416, %v435_v56  }
  0x84   : > { %592 = vperm.xlu1 %4417, %v438_v57   ;;  %587 = vperm.xlu0 %4416, %v437_v58  }
  0x88   : > { %285 = vperm.xlu1 %4417, %v198_v59   ;;  %597 = vperm.xlu0 %4416, %v439_v60  }
  0x8c   : > { %291 = vperm.xlu1 %4417, %v200_v61   ;;  %288 = vperm.xlu0 %4416, %v199_v62  }
  0x90   : > { %297 = vperm.xlu1 %4417, %v202_v63   ;;  %294 = vperm.xlu0 %4416, %v201_v0  }
  0x93   : > { %v4666_v1 = vpop.permute.xlu1 %210  ;;  %v4668_v2 = vpop.permute.xlu0 %204 }
  0x97   : > { %v4670_v4 = vpop.permute.xlu1 %213  ;;  %v4672_v5 = vpop.permute.xlu0 %207 }
  0x9b   : > { %v4676_v7 = vpop.permute.xlu1 %219  ;;  %v4678_v8 = vpop.permute.xlu0 %216 }
  0x9f   : > { %v4683_v11 = vpop.permute.xlu1 %225  ;;  %v4685_v12 = vpop.permute.xlu0 %222 }
  0xa3   : > { %v4689_v14 = vpop.permute.xlu1 %231  ;;  %v4691_v15 = vpop.permute.xlu0 %228 }
  0xa7   : > { %v4693_v17 = vpop.permute.xlu1 %237  ;;  %v4695_v18 = vpop.permute.xlu0 %234 }
  0xab   : > { %v4697_v19 = vpop.permute.xlu1 %243  ;;  %v4699_v20 = vpop.permute.xlu0 %240 }
  0xac   : > { %7805 = vst [vmem:[#allocation2_spill] sm:$0xff] %v4697_v19 }
  0xaf   : > { %v4701_v22 = vpop.permute.xlu1 %249  ;;  %v4703_v23 = vpop.permute.xlu0 %246 }
  0xb0   : > { %7806 = vst [vmem:[#allocation3_spill] sm:$0xff] %v4701_v22 }
  0xb3   : > { %v4705_v25 = vpop.permute.xlu1 %255  ;;  %v4707_v26 = vpop.permute.xlu0 %252 }
  0xb4   : > { %7807 = vst [vmem:[#allocation4_spill] sm:$0xff] %v4705_v25  ;;  %7808 = vst [vmem:[#allocation5_spill] sm:$0xff] %v4707_v26 }
  0xb7   : > { %v4709_v28 = vpop.permute.xlu1 %261  ;;  %v4711_v29 = vpop.permute.xlu0 %258 }
  0xb8   : > { %7809 = vst [vmem:[#allocation6_spill] sm:$0xff] %v4709_v28  ;;  %7810 = vst [vmem:[#allocation7_spill] sm:$0xff] %v4711_v29 }
  0xbb   : > { %v4713_v31 = vpop.permute.xlu1 %267  ;;  %v4715_v32 = vpop.permute.xlu0 %264 }
  0xbc   : > { %7811 = vst [vmem:[#allocation8_spill] sm:$0xff] %v4713_v31  ;;  %7812 = vst [vmem:[#allocation9_spill] sm:$0xff] %v4715_v32 }
  0xbf   : > { %v4717_v33 = vpop.permute.xlu1 %273  ;;  %v4719_v34 = vpop.permute.xlu0 %270 }
  0xc0   : > { %7813 = vst [vmem:[#allocation10_spill] sm:$0xff] %v4717_v33  ;;  %7814 = vst [vmem:[#allocation11_spill] sm:$0xff] %v4719_v34 }
  0xc3   : > { %v4721_v35 = vpop.permute.xlu1 %279  ;;  %v4723_v36 = vpop.permute.xlu0 %276 }
  0xc4   : > { %7815 = vst [vmem:[#allocation12_spill] sm:$0xff] %v4721_v35  ;;  %7816 = vst [vmem:[#allocation13_spill] sm:$0xff] %v4723_v36 }
  0xc7   : > { %v443_v40 = vpop.permute.xlu1 %442  ;;  %v4731_v41 = vpop.permute.xlu0 %282 }
  0xc8   : > { %7817 = vst [vmem:[#allocation14_spill] sm:$0xff] %v4731_v41  ;;  %v600_v42 = vmul.f32 %v4725_v37, %v443_v40 }
  0xca   : > { %v4735_v43 = vadd.f32 %v600_v42, %v4729_v39  ;;  %v7778_v42 = vmov 2131351028  }
  0xcb   : > { %v453_v44 = vpop.permute.xlu1 %452  ;;  %v448_v45 = vpop.permute.xlu0 %447 }
  0xcc   : > { %v7775_v46 = vand.u32 2147483647, %v4735_v43  ;;  %v667_v47 = vand.u32 2139095040, %v4735_v43  ;;  %v602_v48 = vmul.f32 %v4725_v37, %v453_v44  ;;  %v601_v49 = vmul.f32 %v4725_v37, %v448_v45 }
  0xcd   : > { %v7776_v45 = vmov 2102212464   ;;  %vm666_vm0 = vcmp.lt.s32.totalorder %v4735_v43, 0 }
  0xce   : > { %v668_v50 = vshrl.u32 %v667_v47, 23  ;;  %v671_v51 = vand.u32 8388607, %v7775_v46  ;;  %v4744_v52 = vadd.f32 %v602_v48, %v4729_v39  ;;  %v4747_v53 = vadd.f32 %v601_v49, %v4729_v39 }
  0xcf   : > { %v7780_v48 = vmov 920167782  }
  0xd0   : > { %v4141_v54 = vadd.s32 4294967169, %v668_v50  ;;  %v7774_v55 = vand.u32 2147483647, %v4744_v52  ;;  %v873_v56 = vand.u32 2139095040, %v4744_v52  ;;  %v672_v58 = vor.u32 8388608, %v671_v51 }
  0xd1   : > { %v770_v61 = vand.u32 2139095040, %v4747_v53 }
  0xd2   : > { %v674_v57 = vadd.s32 1, %v4141_v54  ;;  %v874_v59 = vshrl.u32 %v873_v56, 23  ;;  %v877_v60 = vand.u32 8388607, %v7774_v55  ;;  %v4754_v10 = vshll.u32 %v672_v58, 8 }
  0xd3   : > { %v771_v0 = vshrl.u32 %v770_v61, 23  ;;  %v7784_v58 = vmov 1326507024  }
  0xd4   : > { %vm675_vm3 = vcmp.gt.s32.totalorder %v674_v57, 0  ;;  %v4149_v63 = vadd.s32 4294967169, %v874_v59  ;;  %v878_v13 = vor.u32 8388608, %v877_v60 }
  0xd5   : > { %v676_v62 = vsel %vm675_vm3, %v674_v57, 0  ;;  %v4145_v40 = vadd.s32 4294967169, %v771_v0 }
  0xd6   : > { %v677_v3 = vshrl.u32 %v676_v62, 5  ;;  %v678_v9 = vand.u32 31, %v676_v62  ;;  %v880_v16 = vadd.s32 1, %v4149_v63 }
  0xd8   : > { %v679_v21 = vsub.s32 32, %v678_v9  ;;  %v681_v27 = vshll.u32 %v7791_v24, %v678_v9  ;;  %v684_v38 = vshll.u32 %v7782_v30, %v678_v9  ;;  %v687_v44 = vshll.u32 %v7778_v42, %v678_v9 }
  0xd9   : > { %v690_v47 = vshll.u32 %v7776_v45, %v678_v9  ;;  %v693_v49 = vshll.u32 %v7780_v48, %v678_v9  ;;  %vm696_vm4 = vcmp.lt.s32.totalorder %v677_v3, 1  ;;  %vm697_vm5 = vcmp.lt.s32.totalorder %v677_v3, 2 }
  0xda   : > { %v682_v50 = vshrl.u32 %v7782_v30, %v679_v21  ;;  %v685_v51 = vshrl.u32 %v7778_v42, %v679_v21  ;;  %v688_v54 = vshrl.u32 %v7776_v45, %v679_v21  ;;  %v680_v56 = vshrl.u32 %v7791_v24, %v679_v21 }
  0xdb   : > { %v691_v57 = vshrl.u32 %v7780_v48, %v679_v21  ;;  %v694_v59 = vshrl.u32 %v7784_v58, %v679_v21  ;;  %vm698_vm6 = vcmp.lt.s32.totalorder %v677_v3, 3  ;;  %vm881_vm7 = vcmp.gt.s32.totalorder %v880_v16, 0 }
  0xdc   : > { %v683_v60 = vor.u32 %v682_v50, %v681_v27  ;;  %v686_v61 = vor.u32 %v685_v51, %v684_v38  ;;  %v689_v62 = vor.u32 %v688_v54, %v687_v44  ;;  %vm699_vm8 = vcmp.lt.s32.totalorder %v677_v3, 4 }
  0xdd   : > { %v692_v63 = vor.u32 %v691_v57, %v690_v47  ;;  %v695_v0 = vor.u32 %v694_v59, %v693_v49  ;;  %v882_v9 = vsel %vm881_vm7, %v880_v16, 0  ;;  %v4776_v50 = vshll.u32 %v878_v13, 8 }
  0xde   : > { %v700_v55 = vsel %vm696_vm4, %v680_v56, %v683_v60  ;;  %v701_v46 = vsel %vm699_vm8, %v689_v62, 2102212464  ;;  %v704_v45 = vsel %vm696_vm4, %v683_v60, %v686_v61  ;;  %v708_v42 = vsel %vm696_vm4, %v686_v61, %v689_v62 }
  0xdf   : > { %v702_v48 = vsel %vm698_vm6, %v686_v61, %v701_v46  ;;  %v705_v30 = vsel %vm699_vm8, %v692_v63, 920167782  ;;  %v709_v21 = vsel %vm699_vm8, %v695_v0, 1326507024  ;;  %v883_v58 = vshrl.u32 %v882_v9, 5 }
  0xe0   : > { %v703_v27 = vsel %vm697_vm5, %v700_v55, %v702_v48  ;;  %v706_v38 = vsel %vm698_vm6, %v689_v62, %v705_v30  ;;  %v710_v44 = vsel %vm698_vm6, %v692_v63, %v709_v21  ;;  %v884_v47 = vand.u32 31, %v882_v9 }
  0xe1   : > { %v707_v16 = vsel %vm697_vm5, %v704_v45, %v706_v38  ;;  %v711_v49 = vsel %vm697_vm5, %v708_v42, %v710_v44  ;;  %v719_v30 = vmul.u32 %v4754_v10, %v703_v27  ;;  %vm902_vm9 = vcmp.lt.s32.totalorder %v883_v58, 1 }
  0xe2   : > { %v4780_v46 = vmul.u32.u64.low %v4754_v10, %v711_v49  ;;  %v4781_v54 = vmul.u32.u64.high %v4754_v10, %v711_v49, %v4780_v46  ;;  %v4784_v56 = vmul.u32.u64.low %v4754_v10, %v707_v16  ;;  %v4785_v55 = vmul.u32.u64.high %v4754_v10, %v707_v16, %v4784_v56 }
  0xe3   : > { %v885_v48 = vsub.s32 32, %v884_v47  ;;  %v777_v45 = vadd.s32 1, %v4145_v40  ;;  %v887_v3 = vshll.u32 %v7791_v24, %v884_v47  ;;  %v7818_v13 = vmov 2475754826  }
  0xe4   : > { %v890_v42 = vshll.u32 %v7818_v13, %v884_v47  ;;  %v7819_v57 = vmov 2131351028   ;;  %v7820_v60 = vmov 2102212464   ;;  %v7821_v9 = vmov 920167782  }
  0xe5   : > { %v893_v59 = vshll.u32 %v7819_v57, %v884_v47  ;;  %v896_v61 = vshll.u32 %v7820_v60, %v884_v47  ;;  %v888_v62 = vshrl.u32 %v7818_v13, %v885_v48  ;;  %v891_v63 = vshrl.u32 %v7819_v57, %v885_v48 }
  0xe6   : > { %v894_v0 = vshrl.u32 %v7820_v60, %v885_v48  ;;  %v899_v21 = vshll.u32 %v7821_v9, %v884_v47  ;;  %vm721_vm10 = vc.u32 %v4781_v54, %v4784_v56  ;;  %v722_v10 = vadd.s32 1, %v4785_v55 }
  0xe7   : > { %v897_v40 = vshrl.u32 %v7821_v9, %v885_v48  ;;  %vm903_vm11 = vcmp.lt.s32.totalorder %v883_v58, 2  ;;  %v889_v27 = vor.u32 %v888_v62, %v887_v3  ;;  %v892_v38 = vor.u32 %v891_v63, %v890_v42 }
  0xe8   : > { %v895_v44 = vor.u32 %v894_v0, %v893_v59  ;;  %v7822_v16 = vmov 1326507024   ;;  %v723_v46 = vsel %vm721_vm10, %v722_v10, %v4785_v55  ;;  %v886_v51 = vshrl.u32 %v7791_v24, %v885_v48 }
  0xe9   : > { %v900_v49 = vshrl.u32 %v7822_v16, %v885_v48  ;;  %v898_v41 = vor.u32 %v897_v40, %v896_v61  ;;  %vm905_vm12 = vcmp.lt.s32.totalorder %v883_v58, 4  ;;  %v724_v47 = vadd.s32 %v723_v46, %v719_v30 }
  0xea   : > { %v907_v33 = vsel %vm905_vm12, %v895_v44, 2102212464  ;;  %vm778_vm13 = vcmp.gt.s32.totalorder %v777_v45, 0  ;;  %vm904_vm14 = vcmp.lt.s32.totalorder %v883_v58, 3  ;;  %v910_v36 = vsel %vm902_vm9, %v889_v27, %v892_v38 }
  0xeb   : > { %v901_v35 = vor.u32 %v900_v49, %v899_v21  ;;  %v911_v34 = vsel %vm905_vm12, %v898_v41, 920167782  ;;  %v914_v3 = vsel %vm902_vm9, %v892_v38, %v895_v44  ;;  %v725_v42 = vadd.s32 536870912, %v724_v47 }
  0xec   : > { %v906_v59 = vsel %vm902_vm9, %v886_v51, %v889_v27  ;;  %v912_v62 = vsel %vm904_vm14, %v895_v44, %v911_v34  ;;  %v908_v55 = vsel %vm904_vm14, %v892_v38, %v907_v33  ;;  %v779_v0 = vsel %vm778_vm13, %v777_v45, 0  ;;  %v463_v45 = vpop.permute.xlu1 %462  ;;  %v458_v27 = vpop.permute.xlu0 %457 }
  0xed   : > { %v915_v63 = vsel %vm905_vm12, %v901_v35, 1326507024  ;;  %v913_v48 = vsel %vm903_vm11, %v910_v36, %v912_v62  ;;  %v4808_v30 = vshrl.u32 %v725_v42, 30  ;;  %v781_v34 = vand.u32 31, %v779_v0 }
  0xee   : > { %v916_v61 = vsel %vm904_vm14, %v898_v41, %v915_v63  ;;  %v4812_v10 = vmul.u32.u64.low %v4776_v50, %v913_v48  ;;  %v4813_v40 = vmul.u32.u64.high %v4776_v50, %v913_v48, %v4812_v10  ;;  %v909_v35 = vsel %vm903_vm11, %v906_v59, %v908_v55 }
  0xef   : > { %v917_v21 = vsel %vm903_vm11, %v914_v3, %v916_v61  ;;  %v727_v33 = vshll.u32 %v4808_v30, 30  ;;  %v7823_v36 = vand.u32 2147483647, %v4747_v53  ;;  %v782_v51 = vsub.s32 32, %v781_v34 }
  0xf0   : > { %v4817_v49 = vmul.u32.u64.low %v4776_v50, %v917_v21  ;;  %v4818_v46 = vmul.u32.u64.high %v4776_v50, %v917_v21, %v4817_v49  ;;  %v928_v44 = vadd.s32 1, %v4813_v40  ;;  %v925_v3 = vmul.u32 %v4776_v50, %v909_v35 }
  0xf1   : > { %v4824_v41 = vand.u32 8388607, %v7823_v36  ;;  %v4826_v38 = vsub.s32 %v724_v47, %v727_v33  ;;  %v604_v59 = vmul.f32 %v4725_v37, %v463_v45  ;;  %v4836_v62 = vmul.f32 %v4725_v37, %v458_v27 }
  0xf2   : > { %vm927_vm15 = vc.u32 %v4818_v46, %v4812_v10  ;;  %v793_v55 = vshll.u32 %v7820_v60, %v781_v34  ;;  %v794_v48 = vshrl.u32 %v7821_v9, %v782_v51  ;;  %v785_v61 = vshrl.u32 %v7818_v13, %v782_v51 }
  0xf3   : > { %v730_v42 = vsub.s32 0, %v4826_v38  ;;  %v929_v58 = vsel %vm927_vm15, %v928_v44, %v4813_v40  ;;  %v775_v47 = vor.u32 8388608, %v4824_v41  ;;  %v788_v21 = vshrl.u32 %v7819_v57, %v782_v51 }
  0xf4   : > { %v930_v63 = vadd.s32 %v929_v58, %v925_v3  ;;  %v791_v40 = vshrl.u32 %v7820_v60, %v782_v51  ;;  %v4845_v33 = vshrl.u32 %v779_v0, 5  ;;  %v784_v35 = vshll.u32 %v7791_v24, %v781_v34 }
  0xf5   : > { %v4142_v50 = vmin.u32 %v730_v42, %v4826_v38  ;;  %v787_v36 = vshll.u32 %v7818_v13, %v781_v34  ;;  %v790_v45 = vshll.u32 %v7819_v57, %v781_v34  ;;  %v795_v27 = vor.u32 %v794_v48, %v793_v55 }
  0xf6   : > { %v931_v49 = vadd.s32 536870912, %v930_v63  ;;  %v797_v44 = vshrl.u32 %v7822_v16, %v782_v51  ;;  %v720_v3 = vadd.s32 %v4784_v56, %v4781_v54  ;;  %v796_v0 = vshll.u32 %v7821_v9, %v781_v34 }
  0xf7   : > { %v732_v41 = vclz %v4142_v50  ;;  %v4858_v58 = vadd.f32 %v604_v59, %v4729_v39  ;;  %v786_v31 = vor.u32 %v785_v61, %v784_v35  ;;  %v789_v28 = vor.u32 %v788_v21, %v787_v36 }
  0xf8   : > { %v4854_v42 = vshrl.u32 %v931_v49, 30  ;;  %v792_v32 = vor.u32 %v791_v40, %v790_v45  ;;  %v750_v50 = vsub.s32 4, %v4808_v30  ;;  %v798_v48 = vor.u32 %v797_v44, %v796_v0 }
  0xf9   : > { %v4143_v24 = vadd.s32 4294967294, %v732_v41  ;;  %vm802_vm1 = vcmp.lt.s32.totalorder %v4845_v33, 4  ;;  %v7824_v54 = vand.u32 2147483647, %v4735_v43  ;;  %v7827_v34 = vmov 683565275  }
  0xfa   : > { %v933_v55 = vshll.u32 %v4854_v42, 30  ;;  %v783_v59 = vshrl.u32 %v7827_v34, %v782_v51  ;;  %vm799_vm4 = vcmp.lt.s32.totalorder %v4845_v33, 1  ;;  %v808_v61 = vsel %vm802_vm1, %v795_v27, 920167782 }
  0xfb   : > { %vm4865_vm2 = vcmp.le.f32.partialorder %v7824_v54, 0.7853982  ;;  %vm4144_vm3 = vcmp.lt.s32.totalorder %v4143_v24, 0  ;;  %vm800_vm5 = vcmp.lt.s32.totalorder %v4845_v33, 2  ;;  %vm801_vm6 = vcmp.lt.s32.totalorder %v4845_v33, 3 }
  0xfc   : > { %v735_v21 = vsel %vm4144_vm3, 0, %v4143_v24  ;;  %v4873_v40 = vsub.s32 %v930_v63, %v933_v55  ;;  %v804_v36 = vsel %vm802_vm1, %v792_v32, 2102212464  ;;  %v807_v51 = vsel %vm799_vm4, %v786_v31, %v789_v28 }
  0xfd   : > { %v736_v49 = vsub.s32 32, %v735_v21  ;;  %v740_v35 = vsub.s32 4294967266, %v735_v21  ;;  %v809_v45 = vsel %vm801_vm6, %v792_v32, %v808_v61  ;;  %v811_v24 = vsel %vm799_vm4, %v789_v28, %v792_v32 }
  0xfe   : > { %v936_v41 = vsub.s32 0, %v4873_v40  ;;  %v812_v63 = vsel %vm802_vm1, %v798_v48, 1326507024  ;;  %v737_v44 = vshll.u32 %v4826_v38, %v735_v21  ;;  %v751_v29 = vsel %vm666_vm0, %v750_v50, %v4808_v30 }
  0xff   : > { %v738_v0 = vshrl.u32 %v720_v3, %v736_v49  ;;  %v741_v55 = vadd.s32 127, %v740_v35  ;;  %v813_v54 = vsel %vm801_vm6, %v795_v27, %v812_v63  ;;  %vm872_vm7 = vcmp.lt.s32.totalorder %v4744_v52, 0 }
 0x100   : > { %v4150_v61 = vmin.u32 %v936_v41, %v4873_v40  ;;  %v810_v32 = vsel %vm800_vm5, %v807_v51, %v809_v45  ;;  %v815_v25 = vshll.u32 %v775_v47, 8  ;;  %v803_v38 = vsel %vm799_vm4, %v783_v59, %v786_v31 }
 0x101   : > { %v739_v48 = vor.u32 %v738_v0, %v737_v44  ;;  %v742_v22 = vshll.u32 %v741_v55, 23  ;;  %v814_v27 = vsel %vm800_vm5, %v811_v24, %v813_v54  ;;  %v805_v30 = vsel %vm801_vm6, %v789_v28, %v804_v36 }
 0x102   : > { %v938_v3 = vclz %v4150_v61  ;;  %v4904_v50 = vmul.u32.u64.low %v815_v25, %v814_v27  ;;  %v4905_v21 = vmul.u32.u64.high %v815_v25, %v814_v27, %v4904_v50  ;;  %v4913_v47 = vadd.f32 %v4836_v62, %v4729_v39 }
 0x103   : > { %v743_v49 = vor.u32 4788187, %v742_v22  ;;  %v4907_v35 = vmul.u32.u64.low %v815_v25, %v810_v32  ;;  %v4908_v41 = vmul.u32.u64.high %v815_v25, %v810_v32, %v4907_v35  ;;  %v753_v31 = vsel %vm4865_vm2, 0, %v751_v29 }
 0x104   : > { %v4151_v59 = vadd.s32 4294967294, %v938_v3  ;;  %v7800_v51 = vand.u32 2147483647, %v4858_v58  ;;  %v1079_v28 = vand.u32 2139095040, %v4858_v58  ;;  %v746_v45 = vcvt.s32.f32 %v739_v48 }
 0x105   : > { %v744_v36 = vand.u32 2147483647, %v743_v49  ;;  %v956_v22 = vsub.s32 4, %v4854_v42  ;;  %v806_v24 = vsel %vm800_vm5, %v803_v38, %v805_v30  ;;  %vm301_vm8 = vcmp.eq.s32.totalorder %v4674_v6, %v4666_v1 }
 0x106   : > { %vm299_vm9 = vcmp.eq.s32.totalorder %v4674_v6, %v4668_v2  ;;  %v926_v29 = vadd.s32 %v4812_v10, %v4818_v46  ;;  %vm4152_vm10 = vcmp.lt.s32.totalorder %v4151_v59, 0  ;;  %vm824_vm11 = vc.u32 %v4905_v21, %v4907_v35 }
 0x107   : > { %v1080_v62 = vshrl.u32 %v1079_v28, 23  ;;  %v747_v63 = vmul.f32 %v746_v45, %v744_v36  ;;  %v941_v44 = vsel %vm4152_vm10, 0, %v4151_v59  ;;  %v825_v0 = vadd.s32 1, %v4908_v41 }
 0x108   : > { %v7799_v33 = vand.u32 2147483647, %v4913_v47  ;;  %v942_v55 = vsub.s32 32, %v941_v44  ;;  %v946_v54 = vsub.s32 4294967266, %v941_v44  ;;  %v822_v61 = vmul.u32 %v815_v25, %v806_v24 }
 0x109   : > { %v4157_v32 = vadd.s32 4294967169, %v1080_v62  ;;  %v748_v48 = vxor.u32 2147483648, %v747_v63  ;;  %v943_v38 = vshll.u32 %v4873_v40, %v941_v44  ;;  %v957_v10 = vsel %vm872_vm7, %v956_v22, %v4854_v42 }
 0x10a   : > { %v826_v46 = vsel %vm824_vm11, %v825_v0, %v4908_v41  ;;  %v944_v27 = vshrl.u32 %v926_v29, %v942_v55  ;;  %v947_v3 = vadd.s32 127, %v946_v54  ;;  %v1083_v25 = vand.u32 8388607, %v7800_v51 }
 0x10b   : > { %v827_v30 = vadd.s32 %v826_v46, %v822_v61  ;;  %v1086_v50 = vadd.s32 1, %v4157_v32  ;;  %v749_v49 = vsel %vm666_vm0, %v748_v48, %v747_v63  ;;  %v976_v59 = vand.u32 2139095040, %v4913_v47 }
 0x10c   : > { %v980_v40 = vand.u32 8388607, %v7799_v33  ;;  %v752_v42 = vsel %vm4865_vm2, %v4735_v43, %v749_v49  ;;  %v945_v41 = vor.u32 %v944_v27, %v943_v38  ;;  %v948_v28 = vshll.u32 %v947_v3, 23  ;;  %v473_v27 = vpop.permute.xlu1 %472 }
 0x10d   : > { %v828_v36 = vadd.s32 536870912, %v827_v30  ;;  %4420 = vcosq.f32 %v752_v42  ;;  %v7828_v45 = vand.u32 2147483647, %v4744_v52  ;;  %vm1087_vm13 = vcmp.gt.s32.totalorder %v1086_v50, 0 }
 0x10e   : > { %v977_v24 = vshrl.u32 %v976_v59, 23  ;;  %4422 = vsinq.f32 %v752_v42  ;;  %v4953_v29 = vand.u32 3, %v753_v31  ;;  %v949_v62 = vor.u32 4788187, %v948_v28 }
 0x10f   : > { %vm4949_vm12 = vcmp.le.f32.partialorder %v7828_v45, 0.7853982  ;;  %v4955_v63 = vshrl.u32 %v828_v36, 30  ;;  %v1084_v44 = vor.u32 8388608, %v1083_v25  ;;  %v1088_v0 = vsel %vm1087_vm13, %v1086_v50, 0 }
 0x110   : > { %v959_v56 = vsel %vm4949_vm12, 0, %v957_v10  ;;  %v950_v55 = vand.u32 2147483647, %v949_v62  ;;  %v952_v54 = vcvt.s32.f32 %v945_v41  ;;  %v981_v32 = vor.u32 8388608, %v980_v40 }
 0x111   : > { %v830_v61 = vshll.u32 %v4955_v63, 30  ;;  %v7801_v48 = vmov 0.0   ;;  %v1090_v10 = vand.u32 31, %v1088_v0  ;;  %v4153_v46 = vadd.s32 4294967169, %v977_v24 }
 0x112   : > { %v4964_v31 = vsel %vm301_vm8, 1.0, %v7801_v48  ;;  %v4970_v38 = vsel %vm299_vm9, 1.0, %v7801_v48  ;;  %vm759_vm14 = vcmp.eq.s32.totalorder %v4953_v29, 0  ;;  %vm762_vm15 = vcmp.eq.s32.totalorder %v4953_v29, 2 }
 0x113   : > { %v953_v3 = vmul.f32 %v952_v54, %v950_v55  ;;  %v4974_v50 = vsub.s32 %v827_v30, %v830_v61  ;;  %v4976_v49 = vshrl.u32 %v1088_v0, 5  ;;  %vm3960_vm0 = vcmp.lt.s32.totalorder %v4674_v6, 8 }
 0x114   : > { %vm758_vm1 = vcmp.lt.s32.totalorder %v4953_v29, 2  ;;  %v4980_v1 = vand.u32 3, %v959_v56  ;;  %v4984_v2 = vadd.s32 %v4907_v35, %v4905_v21  ;;  %v1091_v25 = vsub.s32 32, %v1090_v10 }
 0x115   : > { %v4986_v59 = vshll.u32 %v1084_v44, 8  ;;  %vm3995_vm2 = vcmask 326656   ;;  %vm756_vm3 = vweird.f32 %v4735_v43  ;;  %v954_v30 = vxor.u32 2147483648, %v953_v3 }
 0x116   : > { %v833_v40 = vsub.s32 0, %v4974_v50  ;;  %v4990_v42 = vshll.u32 %v981_v32, 8  ;;  %v4993_v41 = vmul.f32 %v4725_v37, %v473_v27  ;;  %v1093_v36 = vshll.u32 %v7827_v34, %v1090_v10 }
 0x117   : > { %v1094_v21 = vshrl.u32 %v7818_v13, %v1091_v25  ;;  %v4998_v35 = vadd.s32 1, %v4153_v46  ;;  %v955_v45 = vsel %vm872_vm7, %v954_v30, %v953_v3  ;;  %v1096_v62 = vshll.u32 %v7818_v13, %v1090_v10  ;;  %v4421_v44 = vpop.eup %4420 }
 0x118   : > { %v4146_v24 = vmin.u32 %v833_v40, %v4974_v50  ;;  %v1100_v56 = vshrl.u32 %v7820_v60, %v1091_v25  ;;  %vm1108_vm4 = vcmp.lt.s32.totalorder %v4976_v49, 1  ;;  %v958_v0 = vsel %vm4949_vm12, %v4744_v52, %v955_v45  ;;  %v4423_v32 = vpop.eup %4422 }
 0x119   : > { %v1092_v55 = vshrl.u32 %v7827_v34, %v1091_v25  ;;  %v1097_v54 = vshrl.u32 %v7819_v57, %v1091_v25  ;;  %v1099_v61 = vshll.u32 %v7819_v57, %v1090_v10  ;;  %v763_v46 = vxor.u32 2147483648, %v4421_v44 }
 0x11a   : > { %4424 = vcosq.f32 %v958_v0  ;;  %v835_v27 = vclz %v4146_v24  ;;  %v1095_v3 = vor.u32 %v1094_v21, %v1093_v36  ;;  %v760_v30 = vxor.u32 2147483648, %v4423_v32 }
 0x11b   : > { %4426 = vsinq.f32 %v958_v0  ;;  %v1102_v40 = vshll.u32 %v7820_v60, %v1090_v10  ;;  %v1103_v33 = vshrl.u32 %v7821_v9, %v1091_v25  ;;  %v764_v22 = vsel %vm762_vm15, %v763_v46, %v4423_v32 }
 0x11c   : > { %v4147_v45 = vadd.s32 4294967294, %v835_v27  ;;  %v1101_v51 = vor.u32 %v1100_v56, %v1099_v61  ;;  %v1106_v48 = vshrl.u32 %v7822_v16, %v1091_v25  ;;  %v761_v28 = vsel %vm759_vm14, %v4421_v44, %v760_v30 }
 0x11d   : > { %v1098_v26 = vor.u32 %v1097_v54, %v1096_v62  ;;  %v1104_v19 = vor.u32 %v1103_v33, %v1102_v40  ;;  %v1105_v36 = vshll.u32 %v7821_v9, %v1090_v10  ;;  %v765_v21 = vsel %vm758_vm1, %v761_v28, %v764_v22 }
 0x11e   : > { %vm968_vm5 = vcmp.eq.s32.totalorder %v4980_v1, 2  ;;  %vm4148_vm6 = vcmp.lt.s32.totalorder %v4147_v45, 0  ;;  %vm1109_vm7 = vcmp.lt.s32.totalorder %v4976_v49, 2  ;;  %vm1110_vm8 = vcmp.lt.s32.totalorder %v4976_v49, 3 }
 0x11f   : > { %v766_v33 = vsel %vm756_vm3, nan, %v765_v21  ;;  %vm965_vm9 = vcmp.eq.s32.totalorder %v4980_v1, 0  ;;  %vm769_vm10 = vcmp.lt.s32.totalorder %v4747_v53, 0  ;;  %v838_v10 = vsel %vm4148_vm6, 0, %v4147_v45 }
 0x120   : > { %v1107_v25 = vor.u32 %v1106_v48, %v1105_v36  ;;  %vm1111_vm11 = vcmp.lt.s32.totalorder %v4976_v49, 4  ;;  %v3963_v29 = vsel %vm3960_vm0, %v4970_v38, %v766_v33  ;;  %vm964_vm12 = vcmp.lt.s32.totalorder %v4980_v1, 2 }
 0x121   : > { %v839_v28 = vsub.s32 32, %v838_v10  ;;  %v843_v24 = vsub.s32 4294967266, %v838_v10  ;;  %v1113_v43 = vsel %vm1111_vm11, %v1101_v51, 2102212464  ;;  %3996 = vst.msk [vmem:[%s5024_s21] sm:$0xff] %vm3995_vm2, %v3963_v29  ;;  %vm962_vm13 = vweird.f32 %v4744_v52 }
 0x122   : > { %v840_v62 = vshll.u32 %v4974_v50, %v838_v10  ;;  %v1112_v48 = vsel %vm1108_vm4, %v1092_v55, %v1095_v3  ;;  %v1116_v56 = vsel %vm1108_vm4, %v1095_v3, %v1098_v26  ;;  %v1117_v38 = vsel %vm1111_vm11, %v1104_v19, 920167782 }
 0x123   : > { %v841_v44 = vshrl.u32 %v4984_v2, %v839_v28  ;;  %v844_v0 = vadd.s32 127, %v843_v24  ;;  %v1118_v54 = vsel %vm1110_vm8, %v1101_v51, %v1117_v38  ;;  %v1120_v61 = vsel %vm1108_vm4, %v1098_v26, %v1101_v51 }
 0x124   : > { %v1114_v50 = vsel %vm1110_vm8, %v1098_v26, %v1113_v43  ;;  %v1119_v55 = vsel %vm1109_vm7, %v1116_v56, %v1118_v54  ;;  %v1121_v32 = vsel %vm1111_vm11, %v1107_v25, 1326507024  ;;  %vm984_vm14 = vcmp.gt.s32.totalorder %v4998_v35, 0  ;;  %v4425_v46 = vpop.eup %4424 }
 0x125   : > { %v842_v2 = vor.u32 %v841_v44, %v840_v62  ;;  %v845_v27 = vshll.u32 %v844_v0, 23  ;;  %v1122_v3 = vsel %vm1110_vm8, %v1104_v19, %v1121_v32  ;;  %v985_v30 = vsel %vm984_vm14, %v4998_v35, 0  ;;  %v4427_v51 = vpop.eup %4426 }
 0x126   : > { %v969_v40 = vxor.u32 2147483648, %v4425_v46  ;;  %v7831_v26 = vand.u32 2147483647, %v4747_v53  ;;  %v1123_v45 = vsel %vm1109_vm7, %v1120_v61, %v1122_v3  ;;  %v966_v33 = vxor.u32 2147483648, %v4427_v51 }
 0x127   : > { %v5076_v36 = vmul.u32.u64.low %v4986_v59, %v1119_v55  ;;  %v5077_v21 = vmul.u32.u64.high %v4986_v59, %v1119_v55, %v5076_v36  ;;  %v846_v19 = vor.u32 4788187, %v845_v27  ;;  %v1115_v35 = vsel %vm1109_vm7, %v1112_v48, %v1114_v50 }
 0x128   : > { %vm5069_vm15 = vcmp.le.f32.partialorder %v7831_v26, 0.7853982  ;;  %v5084_v10 = vadd.f32 %v4993_v41, %v4729_v39  ;;  %v970_v25 = vsel %vm968_vm5, %v969_v40, %v4427_v51  ;;  %v987_v24 = vand.u32 31, %v985_v30 }
 0x129   : > { %v5089_v29 = vmul.u32.u64.low %v4986_v59, %v1123_v45  ;;  %v5090_v28 = vmul.u32.u64.high %v4986_v59, %v1123_v45, %v5089_v29  ;;  %v967_v43 = vsel %vm965_vm9, %v4425_v46, %v966_v33  ;;  %v847_v62 = vand.u32 2147483647, %v846_v19 }
 0x12a   : > { %v849_v56 = vcvt.s32.f32 %v842_v2  ;;  %v7834_v49 = vsub.s32 4, %v4955_v63  ;;  %v971_v48 = vsel %vm964_vm12, %v967_v43, %v970_v25  ;;  %v1131_v38 = vmul.u32 %v4986_v59, %v1115_v35 }
 0x12b   : > { %v1134_v44 = vadd.s32 1, %v5077_v21  ;;  %v988_v0 = vsub.s32 32, %v987_v24  ;;  %v972_v54 = vsel %vm962_vm13, nan, %v971_v48  ;;  %v986_v50 = vshrl.u32 %v985_v30, 5 }
 0x12c   : > { %v854_v41 = vsel %vm769_vm10, %v7834_v49, %v4955_v63  ;;  %v850_v61 = vmul.f32 %v849_v56, %v847_v62  ;;  %v990_v55 = vshll.u32 %v7827_v34, %v987_v24  ;;  %v3965_v32 = vsel %vm3960_vm0, %v4964_v31, %v972_v54 }
 0x12d   : > { %vm1133_vm1 = vc.u32 %v5090_v28, %v5076_v36  ;;  %v993_v63 = vshll.u32 %v7818_v13, %v987_v24  ;;  %v996_v1 = vshll.u32 %v7819_v57, %v987_v24  ;;  %3998 = vst.msk [vmem:[%s5024_s21 + $0x10] sm:$0xff] %vm3995_vm2, %v3965_v32  ;;  %v991_v46 = vshrl.u32 %v7818_v13, %v988_v0 }
 0x12e   : > { %v851_v59 = vxor.u32 2147483648, %v850_v61  ;;  %v1135_v52 = vsel %vm1133_vm1, %v1134_v44, %v5077_v21  ;;  %v994_v2 = vshrl.u32 %v7819_v57, %v988_v0  ;;  %vm300_vm3 = vcmp.eq.s32.totalorder %v4674_v6, %v4672_v5 }
 0x12f   : > { %v1136_v31 = vadd.s32 %v1135_v52, %v1131_v38  ;;  %v997_v27 = vshrl.u32 %v7820_v60, %v988_v0  ;;  %v999_v3 = vshll.u32 %v7820_v60, %v987_v24  ;;  %v1000_v30 = vshrl.u32 %v7821_v9, %v988_v0 }
 0x130   : > { %v852_v51 = vsel %vm769_vm10, %v851_v59, %v850_v61  ;;  %v856_v40 = vsel %vm5069_vm15, 0, %v854_v41  ;;  %v992_v26 = vor.u32 %v991_v46, %v990_v55  ;;  %v995_v45 = vor.u32 %v994_v2, %v993_v63  ;;  %v468_v46 = vpop.permute.xlu0 %467 }
 0x131   : > { %v855_v21 = vsel %vm5069_vm15, %v4747_v53, %v852_v51  ;;  %v1137_v33 = vadd.s32 536870912, %v1136_v31  ;;  %v998_v19 = vor.u32 %v997_v27, %v996_v1  ;;  %v1001_v35 = vor.u32 %v1000_v30, %v999_v3 }
 0x132   : > { %4428 = vcosq.f32 %v855_v21  ;;  %v1002_v25 = vshll.u32 %v7821_v9, %v987_v24  ;;  %v1003_v29 = vshrl.u32 %v7822_v16, %v988_v0  ;;  %vm1005_vm4 = vcmp.lt.s32.totalorder %v986_v50, 1 }
 0x133   : > { %4430 = vsinq.f32 %v855_v21  ;;  %v1138_v43 = vshrl.u32 %v1137_v33, 30  ;;  %vm1007_vm5 = vcmp.lt.s32.totalorder %v986_v50, 3  ;;  %vm1008_vm6 = vcmp.lt.s32.totalorder %v986_v50, 4 }
 0x134   : > { %v1004_v62 = vor.u32 %v1003_v29, %v1002_v25  ;;  %v1010_v56 = vsel %vm1008_vm6, %v998_v19, 2102212464  ;;  %v1013_v49 = vsel %vm1005_vm4, %v992_v26, %v995_v45  ;;  %v1014_v41 = vsel %vm1008_vm6, %v1001_v35, 920167782 }
 0x135   : > { %v1139_v22 = vshll.u32 %v1138_v43, 30  ;;  %v989_v48 = vshrl.u32 %v7827_v34, %v988_v0  ;;  %vm1006_vm7 = vcmp.lt.s32.totalorder %v986_v50, 2  ;;  %v1015_v38 = vsel %vm1007_vm5, %v998_v19, %v1014_v41 }
 0x136   : > { %v860_v44 = vand.u32 3, %v856_v40  ;;  %v1016_v24 = vsel %vm1006_vm7, %v1013_v49, %v1015_v38  ;;  %v1017_v54 = vsel %vm1005_vm4, %v995_v45, %v998_v19  ;;  %v1018_v61 = vsel %vm1008_vm6, %v1004_v62, 1326507024 }
 0x137   : > { %v5137_v55 = vsub.s32 %v1136_v31, %v1139_v22  ;;  %v1009_v32 = vsel %vm1005_vm4, %v989_v48, %v992_v26  ;;  %v1011_v63 = vsel %vm1007_vm5, %v995_v45, %v1010_v56  ;;  %v1019_v1 = vsel %vm1007_vm5, %v1001_v35, %v1018_v61 }
 0x138   : > { %v1020_v59 = vsel %vm1006_vm7, %v1017_v54, %v1019_v1  ;;  %v5144_v0 = vmul.u32.u64.low %v4990_v42, %v1016_v24  ;;  %v5145_v52 = vmul.u32.u64.high %v4990_v42, %v1016_v24, %v5144_v0  ;;  %v7835_v31 = vmov 0.0  }
 0x139   : > { %v1142_v2 = vsub.s32 0, %v5137_v55  ;;  %v5149_v27 = vmul.u32.u64.low %v4990_v42, %v1020_v59  ;;  %v5150_v3 = vmul.u32.u64.high %v4990_v42, %v1020_v59, %v5149_v27  ;;  %v4108_v30 = vsel %vm300_vm3, 1.0, %v7835_v31 }
 0x13a   : > { %vm859_vm8 = vweird.f32 %v4747_v53  ;;  %v1012_v51 = vsel %vm1006_vm7, %v1009_v32, %v1011_v63  ;;  %v1285_v40 = vand.u32 2139095040, %v5084_v10  ;;  %vm861_vm9 = vcmp.lt.s32.totalorder %v860_v44, 2 }
 0x13b   : > { %vm1078_vm10 = vcmp.lt.s32.totalorder %v4858_v58, 0  ;;  %v4158_v26 = vmin.u32 %v1142_v2, %v5137_v55  ;;  %v605_v45 = vmul.f32 %v4725_v37, %v468_v46  ;;  %v1162_v33 = vsub.s32 4, %v1138_v43 }
 0x13c   : > { %v4429_v21 = vpop.eup %4428  ;;  %v1031_v19 = vadd.s32 1, %v5145_v52  ;;  %v1282_v5 = vand.u32 2147483647, %v5084_v10  ;;  %v1286_v35 = vshrl.u32 %v1285_v40, 23  ;;  %v1028_v62 = vmul.u32 %v4990_v42, %v1012_v51 }
 0x13d   : > { %v4431_v25 = vpop.eup %4430  ;;  %v866_v29 = vxor.u32 2147483648, %v4429_v21  ;;  %v1144_v50 = vclz %v4158_v26  ;;  %vm1030_vm11 = vc.u32 %v5150_v3, %v5144_v0  ;;  %vm865_vm12 = vcmp.eq.s32.totalorder %v860_v44, 2 }
 0x13e   : > { %v863_v56 = vxor.u32 2147483648, %v4431_v25  ;;  %v1032_v49 = vsel %vm1030_vm11, %v1031_v19, %v5145_v52  ;;  %v4165_v41 = vadd.s32 4294967169, %v1286_v35  ;;  %vm862_vm13 = vcmp.eq.s32.totalorder %v860_v44, 0 }
 0x13f   : > { %v867_v22 = vsel %vm865_vm12, %v866_v29, %v4431_v25  ;;  %v4159_v48 = vadd.s32 4294967294, %v1144_v50  ;;  %v1033_v38 = vadd.s32 %v1032_v49, %v1028_v62  ;;  %v1163_v54 = vsel %vm1078_vm10, %v1162_v33, %v1138_v43 }
 0x140   : > { %v864_v24 = vsel %vm862_vm13, %v4429_v21, %v863_v56  ;;  %v1289_v61 = vand.u32 8388607, %v1282_v5  ;;  %v1292_v42 = vadd.s32 1, %v4165_v41  ;;  %v7836_v63 = vand.u32 2147483647, %v4858_v58 }
 0x141   : > { %v868_v32 = vsel %vm861_vm9, %v864_v24, %v867_v22  ;;  %vm4160_vm15 = vcmp.lt.s32.totalorder %v4159_v48, 0  ;;  %v1034_v59 = vadd.s32 536870912, %v1033_v38  ;;  %v1132_v43 = vadd.s32 %v5076_v36, %v5090_v28 }
 0x142   : > { %vm5174_vm14 = vcmp.le.f32.partialorder %v7836_v63, 0.7853982  ;;  %v869_v52 = vsel %vm859_vm8, nan, %v868_v32  ;;  %v1147_v46 = vsel %vm4160_vm15, 0, %v4159_v48  ;;  %vm1293_vm1 = vcmp.gt.s32.totalorder %v1292_v42, 0 }
 0x143   : > { %v3964_v44 = vsel %vm3960_vm0, %v4108_v30, %v869_v52  ;;  %v1148_v2 = vsub.s32 32, %v1147_v46  ;;  %v1152_v27 = vsub.s32 4294967266, %v1147_v46  ;;  %v1165_v51 = vsel %vm5174_vm14, 0, %v1163_v54  ;;  %v483_v30 = vpop.permute.xlu1 %482 }
 0x144   : > { %3997 = vst.msk [vmem:[%s5024_s21 + $0x8] sm:$0xff] %vm3995_vm2, %v3964_v44  ;;  %v5188_v40 = vshrl.u32 %v1034_v59, 30  ;;  %v1290_v26 = vor.u32 8388608, %v1289_v61  ;;  %v1294_v53 = vsel %vm1293_vm1, %v1292_v42, 0  ;;  %v5191_v21 = vadd.f32 %v605_v45, %v4729_v39 }
 0x145   : > { %v1149_v36 = vshll.u32 %v5137_v55, %v1147_v46  ;;  %v1150_v28 = vshrl.u32 %v1132_v43, %v1148_v2  ;;  %v1153_v33 = vadd.s32 127, %v1152_v27  ;;  %v1296_v19 = vand.u32 31, %v1294_v53 }
 0x146   : > { %v5194_v35 = vand.u32 3, %v1165_v51  ;;  %v1036_v25 = vshll.u32 %v5188_v40, 30  ;;  %v1029_v62 = vadd.s32 %v5144_v0, %v5150_v3  ;;  %v5200_v41 = vshll.u32 %v1290_v26, 8 }
 0x147   : > { %v1151_v29 = vor.u32 %v1150_v28, %v1149_v36  ;;  %v1154_v50 = vshll.u32 %v1153_v33, 23  ;;  %v1297_v56 = vsub.s32 32, %v1296_v19  ;;  %v1182_v45 = vand.u32 2139095040, %v5191_v21 }
 0x148   : > { %v5198_v49 = vsub.s32 %v1033_v38, %v1036_v25  ;;  %v5204_v55 = vmul.f32 %v4725_v37, %v483_v30  ;;  %v1295_v48 = vshrl.u32 %v1294_v53, 5  ;;  %v1299_v24 = vshll.u32 %v7827_v34, %v1296_v19 }
 0x149   : > { %v1155_v22 = vor.u32 4788187, %v1154_v50  ;;  %v1302_v54 = vshll.u32 %v7818_v13, %v1296_v19  ;;  %v1300_v0 = vshrl.u32 %v7818_v13, %v1297_v56  ;;  %v1303_v3 = vshrl.u32 %v7819_v57, %v1297_v56 }
 0x14a   : > { %v1039_v61 = vsub.s32 0, %v5198_v49  ;;  %v1305_v38 = vshll.u32 %v7819_v57, %v1296_v19  ;;  %v1158_v32 = vcvt.s32.f32 %v1151_v29  ;;  %v1306_v63 = vshrl.u32 %v7820_v60, %v1297_v56 }
 0x14b   : > { %v1156_v42 = vand.u32 2147483647, %v1155_v22  ;;  %v1309_v59 = vshrl.u32 %v7821_v9, %v1297_v56  ;;  %v1059_v43 = vsub.s32 4, %v5188_v40  ;;  %v1308_v46 = vshll.u32 %v7820_v60, %v1296_v19 }
 0x14c   : > { %v4154_v52 = vmin.u32 %v1039_v61, %v5198_v49  ;;  %v1179_v44 = vand.u32 2147483647, %v5191_v21  ;;  %v1301_v27 = vor.u32 %v1300_v0, %v1299_v24  ;;  %v1304_v51 = vor.u32 %v1303_v3, %v1302_v54 }
 0x14d   : > { %v1159_v2 = vmul.f32 %v1158_v32, %v1156_v42  ;;  %v1307_v26 = vor.u32 %v1306_v63, %v1305_v38  ;;  %vm303_vm3 = vcmp.eq.s32.totalorder %v4674_v6, %v4678_v8  ;;  %vm975_vm4 = vcmp.lt.s32.totalorder %v4913_v47, 0 }
 0x14e   : > { %v1041_v53 = vclz %v4154_v52  ;;  %v1310_v36 = vor.u32 %v1309_v59, %v1308_v46  ;;  %v1311_v28 = vshll.u32 %v7821_v9, %v1296_v19  ;;  %v1312_v33 = vshrl.u32 %v7822_v16, %v1297_v56 }
 0x14f   : > { %v1160_v30 = vxor.u32 2147483648, %v1159_v2  ;;  %v1298_v25 = vshrl.u32 %v7827_v34, %v1297_v56  ;;  %vm1314_vm5 = vcmp.lt.s32.totalorder %v1295_v48, 1  ;;  %v1183_v29 = vshrl.u32 %v1182_v45, 23 }
 0x150   : > { %v4155_v50 = vadd.s32 4294967294, %v1041_v53  ;;  %v1313_v22 = vor.u32 %v1312_v33, %v1311_v28  ;;  %vm1316_vm6 = vcmp.lt.s32.totalorder %v1295_v48, 3  ;;  %vm1317_vm7 = vcmp.lt.s32.totalorder %v1295_v48, 4 }
 0x151   : > { %v1161_v24 = vsel %vm1078_vm10, %v1160_v30, %v1159_v2  ;;  %v1319_v54 = vsel %vm1317_vm7, %v1307_v26, 2102212464  ;;  %v1322_v61 = vsel %vm1314_vm5, %v1301_v27, %v1304_v51  ;;  %v1323_v19 = vsel %vm1317_vm7, %v1310_v36, 920167782 }
 0x152   : > { %v1164_v0 = vsel %vm5174_vm14, %v4858_v58, %v1161_v24  ;;  %vm4156_vm8 = vcmp.lt.s32.totalorder %v4155_v50, 0  ;;  %vm1315_vm9 = vcmp.lt.s32.totalorder %v1295_v48, 2  ;;  %v1324_v56 = vsel %vm1316_vm6, %v1307_v26, %v1323_v19 }
 0x153   : > { %4432 = vcosq.f32 %v1164_v0  ;;  %v1044_v45 = vsel %vm4156_vm8, 0, %v4155_v50  ;;  %v1318_v3 = vsel %vm1314_vm5, %v1298_v25, %v1301_v27  ;;  %v1325_v38 = vsel %vm1315_vm9, %v1322_v61, %v1324_v56 }
 0x154   : > { %4434 = vsinq.f32 %v1164_v0  ;;  %v1045_v42 = vsub.s32 32, %v1044_v45  ;;  %v1049_v32 = vsub.s32 4294967266, %v1044_v45  ;;  %v1320_v63 = vsel %vm1316_vm6, %v1304_v51, %v1319_v54 }
 0x155   : > { %v1326_v59 = vsel %vm1314_vm5, %v1304_v51, %v1307_v26  ;;  %v1327_v1 = vsel %vm1317_vm7, %v1313_v22, 1326507024  ;;  %v5239_v52 = vmul.u32.u64.low %v5200_v41, %v1325_v38  ;;  %v5240_v46 = vmul.u32.u64.high %v5200_v41, %v1325_v38, %v5239_v52 }
 0x156   : > { %v1046_v2 = vshll.u32 %v5198_v49, %v1044_v45  ;;  %v1047_v53 = vshrl.u32 %v1029_v62, %v1045_v42  ;;  %v1050_v27 = vadd.s32 127, %v1049_v32  ;;  %v1328_v28 = vsel %vm1316_vm6, %v1310_v36, %v1327_v1 }
 0x157   : > { %v1060_v33 = vsel %vm975_vm4, %v1059_v43, %v5188_v40  ;;  %v1321_v30 = vsel %vm1315_vm9, %v1318_v3, %v1320_v63  ;;  %v1329_v51 = vsel %vm1315_vm9, %v1326_v59, %v1328_v28  ;;  %v4161_v26 = vadd.s32 4294967169, %v1183_v29 }
 0x158   : > { %v1048_v25 = vor.u32 %v1047_v53, %v1046_v2  ;;  %v1051_v50 = vshll.u32 %v1050_v27, 23  ;;  %v5251_v22 = vmul.u32.u64.low %v5200_v41, %v1329_v51  ;;  %v5252_v24 = vmul.u32.u64.high %v5200_v41, %v1329_v51, %v5251_v22 }
 0x159   : > { %v4111_v62 = vsel %vm303_vm3, 1.0, %v7835_v31  ;;  %v7839_v49 = vand.u32 2147483647, %v4913_v47  ;;  %v1340_v48 = vadd.s32 1, %v5240_v46  ;;  %v1189_v43 = vadd.s32 1, %v4161_v26 }
 0x15a   : > { %vm1168_vm11 = vweird.f32 %v4858_v58  ;;  %vm1170_vm12 = vcmp.lt.s32.totalorder %v5194_v35, 2  ;;  %v1052_v36 = vor.u32 4788187, %v1051_v50  ;;  %v1186_v29 = vand.u32 8388607, %v1179_v44 }
 0x15b   : > { %vm5260_vm10 = vcmp.le.f32.partialorder %v7839_v49, 0.7853982  ;;  %v1337_v54 = vmul.u32 %v5200_v41, %v1321_v30  ;;  %vm1190_vm13 = vcmp.gt.s32.totalorder %v1189_v43, 0  ;;  %v5274_v61 = vadd.f32 %v5204_v55, %v4729_v39 }
 0x15c   : > { %v1062_v8 = vsel %vm5260_vm10, 0, %v1060_v33  ;;  %vm302_vm14 = vcmp.eq.s32.totalorder %v4674_v6, %v4670_v4  ;;  %v1053_v19 = vand.u32 2147483647, %v1052_v36  ;;  %v1055_v0 = vcvt.s32.f32 %v1048_v25 }
 0x15d   : > { %vm1339_vm15 = vc.u32 %v5252_v24, %v5239_v52  ;;  %v1191_v56 = vsel %vm1190_vm13, %v1189_v43, 0  ;;  %v4433_v45 = vpop.eup %4432  ;;  %vm1171_vm1 = vcmp.eq.s32.totalorder %v5194_v35, 0  ;;  %vm1174_vm3 = vcmp.eq.s32.totalorder %v5194_v35, 2 }
 0x15e   : > { %v1341_v41 = vsel %vm1339_vm15, %v1340_v48, %v5240_v46  ;;  %v1193_v3 = vand.u32 31, %v1191_v56  ;;  %v4435_v38 = vpop.eup %4434  ;;  %v1175_v55 = vxor.u32 2147483648, %v4433_v45  ;;  %v1056_v42 = vmul.f32 %v1055_v0, %v1053_v19  ;;  %v478_v0 = vpop.permute.xlu0 %477 }
 0x15f   : > { %v5283_v32 = vand.u32 3, %v1062_v8  ;;  %v1342_v63 = vadd.s32 %v1341_v41, %v1337_v54  ;;  %v1172_v59 = vxor.u32 2147483648, %v4435_v38  ;;  %v1187_v1 = vor.u32 8388608, %v1186_v29 }
 0x160   : > { %v1194_v2 = vsub.s32 32, %v1193_v3  ;;  %v1491_v53 = vand.u32 2139095040, %v5274_v61  ;;  %v1176_v27 = vsel %vm1174_vm3, %v1175_v55, %v4435_v38  ;;  %v1057_v28 = vxor.u32 2147483648, %v1056_v42 }
 0x161   : > { %v1343_v33 = vadd.s32 536870912, %v1342_v63  ;;  %v5286_v30 = vshrl.u32 %v1191_v56, 5  ;;  %v1173_v46 = vsel %vm1171_vm1, %v4433_v45, %v1172_v59  ;;  %v1196_v51 = vshll.u32 %v7827_v34, %v1193_v3 }
 0x162   : > { %v1197_v26 = vshrl.u32 %v7818_v13, %v1194_v2  ;;  %v1200_v25 = vshrl.u32 %v7819_v57, %v1194_v2  ;;  %v1177_v50 = vsel %vm1170_vm12, %v1173_v46, %v1176_v27  ;;  %v1058_v22 = vsel %vm975_vm4, %v1057_v28, %v1056_v42 }
 0x163   : > { %v5297_v49 = vshrl.u32 %v1343_v33, 30  ;;  %v1203_v48 = vshrl.u32 %v7820_v60, %v1194_v2  ;;  %v1178_v43 = vsel %vm1168_vm11, nan, %v1177_v50  ;;  %v1061_v36 = vsel %vm5260_vm10, %v4913_v47, %v1058_v22 }
 0x164   : > { %v1199_v29 = vshll.u32 %v7818_v13, %v1193_v3  ;;  %v1202_v8 = vshll.u32 %v7819_v57, %v1193_v3  ;;  %v3967_v35 = vsel %vm3960_vm0, %v4111_v62, %v1178_v43  ;;  %4436 = vcosq.f32 %v1061_v36 }
 0x165   : > { %v1345_v54 = vshll.u32 %v5297_v49, 30  ;;  %v1198_v19 = vor.u32 %v1197_v26, %v1196_v51  ;;  %4000 = vst.msk [vmem:[%s5024_s21 + $0x20] sm:$0xff] %vm3995_vm2, %v3967_v35  ;;  %4438 = vsinq.f32 %v1061_v36  ;;  %v1205_v56 = vshll.u32 %v7820_v60, %v1193_v3 }
 0x166   : > { %v1201_v58 = vor.u32 %v1200_v25, %v1199_v29  ;;  %v1206_v40 = vshrl.u32 %v7821_v9, %v1194_v2  ;;  %v1204_v41 = vor.u32 %v1203_v48, %v1202_v8  ;;  %v1208_v38 = vshll.u32 %v7821_v9, %v1193_v3 }
 0x167   : > { %v5314_v45 = vsub.s32 %v1342_v63, %v1345_v54  ;;  %v1209_v62 = vshrl.u32 %v7822_v16, %v1194_v2  ;;  %v5322_v55 = vsel %vm302_vm14, 1.0, %v7835_v31  ;;  %v5325_v59 = vmul.f32 %v4725_v37, %v478_v0 }
 0x168   : > { %v1207_v42 = vor.u32 %v1206_v40, %v1205_v56  ;;  %v5328_v63 = vshll.u32 %v1187_v1, 8  ;;  %v1492_v33 = vshrl.u32 %v1491_v53, 23  ;;  %v1195_v3 = vshrl.u32 %v7827_v34, %v1194_v2 }
 0x169   : > { %v1348_v27 = vsub.s32 0, %v5314_v45  ;;  %v1210_v28 = vor.u32 %v1209_v62, %v1208_v38  ;;  %vm1211_vm4 = vcmp.lt.s32.totalorder %v5286_v30, 1  ;;  %vm1212_vm5 = vcmp.lt.s32.totalorder %v5286_v30, 2 }
 0x16a   : > { %vm1213_vm6 = vcmp.lt.s32.totalorder %v5286_v30, 3  ;;  %vm1067_vm7 = vcmp.lt.s32.totalorder %v5283_v32, 2  ;;  %vm1214_vm8 = vcmp.lt.s32.totalorder %v5286_v30, 4  ;;  %v1219_v46 = vsel %vm1211_vm4, %v1198_v19, %v1201_v58 }
 0x16b   : > { %v4166_v4 = vmin.u32 %v1348_v27, %v5314_v45  ;;  %v1223_v51 = vsel %vm1211_vm4, %v1201_v58, %v1204_v41  ;;  %vm1065_vm9 = vweird.f32 %v4913_v47  ;;  %v1215_v1 = vsel %vm1211_vm4, %v1195_v3, %v1198_v19 }
 0x16c   : > { %v1216_v53 = vsel %vm1214_vm8, %v1204_v41, 2102212464  ;;  %v1220_v26 = vsel %vm1214_vm8, %v1207_v42, 920167782  ;;  %v1224_v2 = vsel %vm1214_vm8, %v1210_v28, 1326507024  ;;  %vm304_vm10 = vcmp.eq.s32.totalorder %v4674_v6, %v4676_v7 }
 0x16d   : > { %vm305_vm11 = vcmp.eq.s32.totalorder %v4674_v6, %v4685_v12  ;;  %v1350_v25 = vclz %v4166_v4  ;;  %v1217_v50 = vsel %vm1213_vm6, %v1201_v58, %v1216_v53  ;;  %v1221_v22 = vsel %vm1213_vm6, %v1204_v41, %v1220_v26 }
 0x16e   : > { %v1225_v48 = vsel %vm1213_vm6, %v1207_v42, %v1224_v2  ;;  %vm1068_vm12 = vcmp.eq.s32.totalorder %v5283_v32, 0  ;;  %vm1284_vm13 = vcmp.lt.s32.totalorder %v5084_v10, 0  ;;  %v1222_v43 = vsel %vm1212_vm5, %v1219_v46, %v1221_v22  ;;  %v4437_v8 = vpop.eup %4436 }
 0x16f   : > { %v1226_v36 = vsel %vm1212_vm5, %v1223_v51, %v1225_v48  ;;  %v4173_v29 = vadd.s32 4294967169, %v1492_v33  ;;  %vm1071_vm14 = vcmp.eq.s32.totalorder %v5283_v32, 2  ;;  %v4167_v35 = vadd.s32 4294967294, %v1350_v25  ;;  %v4439_v0 = vpop.eup %4438 }
 0x170   : > { %v5356_v54 = vmul.u32.u64.low %v5328_v63, %v1226_v36  ;;  %v5357_v19 = vmul.u32.u64.high %v5328_v63, %v1226_v36, %v5356_v54  ;;  %v1072_v58 = vxor.u32 2147483648, %v4437_v8  ;;  %v1218_v56 = vsel %vm1212_vm5, %v1215_v1, %v1217_v50 }
 0x171   : > { %v5362_v40 = vmul.u32.u64.low %v5328_v63, %v1222_v43  ;;  %v5363_v41 = vmul.u32.u64.high %v5328_v63, %v1222_v43, %v5362_v40  ;;  %v1069_v38 = vxor.u32 2147483648, %v4439_v0  ;;  %vm4168_vm15 = vcmp.lt.s32.totalorder %v4167_v35, 0 }
 0x172   : > { %v1488_v62 = vand.u32 2147483647, %v5274_v61  ;;  %v1498_v42 = vadd.s32 1, %v4173_v29  ;;  %v1073_v27 = vsel %vm1071_vm14, %v1072_v58, %v4439_v0  ;;  %v1338_v28 = vadd.s32 %v5239_v52, %v5252_v24 }
 0x173   : > { %v1353_v33 = vsel %vm4168_vm15, 0, %v4167_v35  ;;  %v1368_v3 = vsub.s32 4, %v5297_v49  ;;  %v1070_v30 = vsel %vm1068_vm12, %v4437_v8, %v1069_v38  ;;  %v1234_v51 = vmul.u32 %v5328_v63, %v1218_v56 }
 0x174   : > { %v1354_v4 = vsub.s32 32, %v1353_v33  ;;  %v1358_v46 = vsub.s32 4294967266, %v1353_v33  ;;  %v1074_v1 = vsel %vm1067_vm7, %v1070_v30, %v1073_v27  ;;  %v1355_v53 = vshll.u32 %v5314_v45, %v1353_v33 }
 0x175   : > { %vm1236_vm1 = vc.u32 %v5357_v19, %v5362_v40  ;;  %v1237_v52 = vadd.s32 1, %v5363_v41  ;;  %v1075_v24 = vsel %vm1065_vm9, nan, %v1074_v1  ;;  %vm1499_vm3 = vcmp.gt.s32.totalorder %v1498_v42, 0 }
 0x176   : > { %v1356_v26 = vshrl.u32 %v1338_v28, %v1354_v4  ;;  %v1359_v2 = vadd.s32 127, %v1358_v46  ;;  %v3966_v63 = vsel %vm3960_vm0, %v5322_v55, %v1075_v24  ;;  %v1495_v45 = vand.u32 8388607, %v1488_v62 }
 0x177   : > { %v1238_v32 = vsel %vm1236_vm1, %v1237_v52, %v5363_v41  ;;  %v1500_v25 = vsel %vm1499_vm3, %v1498_v42, 0  ;;  %3999 = vst.msk [vmem:[%s5024_s21 + $0x18] sm:$0xff] %vm3995_vm2, %v3966_v63  ;;  %v1369_v47 = vsel %vm1284_vm13, %v1368_v3, %v5297_v49  ;;  %v5396_v55 = vsel %vm304_vm10, 1.0, %v7835_v31 }
 0x178   : > { %v1357_v50 = vor.u32 %v1356_v26, %v1355_v53  ;;  %v1360_v22 = vshll.u32 %v1359_v2, 23  ;;  %v1239_v48 = vadd.s32 %v1238_v32, %v1234_v51  ;;  %v5402_v43 = vsel %vm305_vm11, 1.0, %v7835_v31 }
 0x179   : > { %v1502_v36 = vand.u32 31, %v1500_v25  ;;  %vm5406_vm4 = vcmp.le.f32.partialorder %v1282_v5, 0.7853982  ;;  %v5412_v7 = vadd.f32 %v5325_v59, %v4729_v39  ;;  %v1496_v54 = vor.u32 8388608, %v1495_v45 }
 0x17a   : > { %v1361_v49 = vor.u32 4788187, %v1360_v22  ;;  %v1240_v8 = vadd.s32 536870912, %v1239_v48  ;;  %v1371_v35 = vsel %vm5406_vm4, 0, %v1369_v47  ;;  %v5416_v12 = vshrl.u32 %v1500_v25, 5 }
 0x17b   : > { %v1503_v0 = vsub.s32 32, %v1502_v36  ;;  %v1364_v56 = vcvt.s32.f32 %v1357_v50  ;;  %v1505_v5 = vshll.u32 %v7827_v34, %v1502_v36  ;;  %v1508_v42 = vshll.u32 %v7818_v13, %v1502_v36 }
 0x17c   : > { %v1362_v58 = vand.u32 2147483647, %v1361_v49  ;;  %v5418_v41 = vshrl.u32 %v1240_v8, 30  ;;  %v1511_v3 = vshll.u32 %v7819_v57, %v1502_v36  ;;  %v5428_v4 = vand.u32 3, %v1371_v35 }
 0x17d   : > { %v1506_v38 = vshrl.u32 %v7818_v13, %v1503_v0  ;;  %v1509_v59 = vshrl.u32 %v7819_v57, %v1503_v0  ;;  %v1512_v27 = vshrl.u32 %v7820_v60, %v1503_v0  ;;  %v1515_v30 = vshrl.u32 %v7821_v9, %v1503_v0 }
 0x17e   : > { %v1365_v28 = vmul.f32 %v1364_v56, %v1362_v58  ;;  %v1242_v33 = vshll.u32 %v5418_v41, 30  ;;  %v1514_v51 = vshll.u32 %v7820_v60, %v1502_v36  ;;  %v1518_v1 = vshrl.u32 %v7822_v16, %v1503_v0 }
 0x17f   : > { %v1507_v46 = vor.u32 %v1506_v38, %v1505_v5  ;;  %v1510_v24 = vor.u32 %v1509_v59, %v1508_v42  ;;  %v1513_v26 = vor.u32 %v1512_v27, %v1511_v3  ;;  %v1517_v63 = vshll.u32 %v7821_v9, %v1502_v36  ;;  %v493_v38 = vpop.permute.xlu1 %492 }
 0x180   : > { %v1366_v53 = vxor.u32 2147483648, %v1365_v28  ;;  %v5432_v52 = vsub.s32 %v1239_v48, %v1242_v33  ;;  %v1516_v2 = vor.u32 %v1515_v30, %v1514_v51  ;;  %v5435_v32 = vshll.u32 %v1496_v54, 8 }
 0x181   : > { %v1388_v45 = vand.u32 2139095040, %v5412_v7  ;;  %v1504_v22 = vshrl.u32 %v7827_v34, %v1503_v0  ;;  %vm1520_vm5 = vcmp.lt.s32.totalorder %v5416_v12, 1  ;;  %vm1181_vm6 = vcmp.lt.s32.totalorder %v5191_v21, 0 }
 0x182   : > { %v1367_v25 = vsel %vm1284_vm13, %v1366_v53, %v1365_v28  ;;  %v1245_v50 = vsub.s32 0, %v5432_v52  ;;  %v1265_v48 = vsub.s32 4, %v5418_v41  ;;  %v1519_v36 = vor.u32 %v1518_v1, %v1517_v63 }
 0x183   : > { %v1370_v47 = vsel %vm5406_vm4, %v5084_v10, %v1367_v25  ;;  %vm1523_vm7 = vcmp.lt.s32.totalorder %v5416_v12, 4  ;;  %v1528_v35 = vsel %vm1520_vm5, %v1507_v46, %v1510_v24  ;;  %vm1521_vm8 = vcmp.lt.s32.totalorder %v5416_v12, 2 }
 0x184   : > { %4440 = vcosq.f32 %v1370_v47  ;;  %v4162_v49 = vmin.u32 %v1245_v50, %v5432_v52  ;;  %v1525_v8 = vsel %vm1523_vm7, %v1513_v26, 2102212464  ;;  %vm1522_vm9 = vcmp.lt.s32.totalorder %v5416_v12, 3 }
 0x185   : > { %4442 = vsinq.f32 %v1370_v47  ;;  %v1529_v29 = vsel %vm1523_vm7, %v1516_v2, 920167782  ;;  %vm5460_vm10 = vcmp.le.f32.partialorder %v1179_v44, 0.7853982  ;;  %v1524_v58 = vsel %vm1520_vm5, %v1504_v22, %v1507_v46 }
 0x186   : > { %v1247_v0 = vclz %v4162_v49  ;;  %v1530_v56 = vsel %vm1522_vm9, %v1513_v26, %v1529_v29  ;;  %v1532_v5 = vsel %vm1520_vm5, %v1510_v24, %v1513_v26  ;;  %v1526_v42 = vsel %vm1522_vm9, %v1510_v24, %v1525_v8 }
 0x187   : > { %v1531_v59 = vsel %vm1521_vm8, %v1528_v35, %v1530_v56  ;;  %v1533_v27 = vsel %vm1523_vm7, %v1519_v36, 1326507024  ;;  %v1389_v44 = vshrl.u32 %v1388_v45, 23  ;;  %v1385_v51 = vand.u32 2147483647, %v5412_v7 }
 0x188   : > { %v4163_v28 = vadd.s32 4294967294, %v1247_v0  ;;  %v1534_v33 = vsel %vm1522_vm9, %v1516_v2, %v1533_v27  ;;  %v5473_v3 = vmul.u32.u64.low %v5435_v32, %v1531_v59  ;;  %v5474_v30 = vmul.u32.u64.high %v5435_v32, %v1531_v59, %v5473_v3 }
 0x189   : > { %v1535_v46 = vsel %vm1521_vm8, %v1532_v5, %v1534_v33  ;;  %v4169_v1 = vadd.s32 4294967169, %v1389_v44  ;;  %v610_v53 = vmul.f32 %v4725_v37, %v493_v38  ;;  %v1527_v24 = vsel %vm1521_vm8, %v1524_v58, %v1526_v42 }
 0x18a   : > { %vm4164_vm11 = vcmp.lt.s32.totalorder %v4163_v28, 0  ;;  %v5484_v26 = vmul.u32.u64.low %v5435_v32, %v1535_v46  ;;  %v5485_v2 = vmul.u32.u64.high %v5435_v32, %v1535_v46, %v5484_v26  ;;  %vm1376_vm12 = vcmp.lt.s32.totalorder %v5428_v4, 2 }
 0x18b   : > { %v1235_v63 = vadd.s32 %v5362_v40, %v5357_v19  ;;  %v1250_v45 = vsel %vm4164_vm11, 0, %v4163_v28  ;;  %v1395_v25 = vadd.s32 1, %v4169_v1  ;;  %v1266_v47 = vsel %vm1181_vm6, %v1265_v48, %v5418_v41 }
 0x18c   : > { %v1251_v50 = vsub.s32 32, %v1250_v45  ;;  %v1255_v22 = vsub.s32 4294967266, %v1250_v45  ;;  %v1546_v12 = vadd.s32 1, %v5474_v30  ;;  %vm1380_vm13 = vcmp.eq.s32.totalorder %v5428_v4, 2 }
 0x18d   : > { %v1543_v36 = vmul.u32 %v5435_v32, %v1527_v24  ;;  %v1392_v49 = vand.u32 8388607, %v1385_v51  ;;  %vm1396_vm14 = vcmp.gt.s32.totalorder %v1395_v25, 0  ;;  %v1252_v19 = vshll.u32 %v5432_v52, %v1250_v45 }
 0x18e   : > { %v4441_v8 = vpop.eup %4440  ;;  %v1253_v40 = vshrl.u32 %v1235_v63, %v1251_v50  ;;  %v1256_v35 = vadd.s32 127, %v1255_v22  ;;  %vm1545_vm15 = vc.u32 %v5485_v2, %v5473_v3  ;;  %v1268_v48 = vsel %vm5460_vm10, 0, %v1266_v47 }
 0x18f   : > { %v4443_v29 = vpop.eup %4442  ;;  %v1381_v41 = vxor.u32 2147483648, %v4441_v8  ;;  %v1547_v0 = vsel %vm1545_vm15, %v1546_v12, %v5474_v30  ;;  %v1397_v32 = vsel %vm1396_vm14, %v1395_v25, 0  ;;  %vm1377_vm1 = vcmp.eq.s32.totalorder %v5428_v4, 0 }
 0x190   : > { %v1378_v58 = vxor.u32 2147483648, %v4443_v29  ;;  %v1254_v56 = vor.u32 %v1253_v40, %v1252_v19  ;;  %v1257_v5 = vshll.u32 %v1256_v35, 23  ;;  %v1548_v38 = vadd.s32 %v1547_v0, %v1543_v36 }
 0x191   : > { %v1382_v52 = vsel %vm1380_vm13, %v1381_v41, %v4443_v29  ;;  %v1393_v42 = vor.u32 8388608, %v1392_v49  ;;  %v1399_v59 = vand.u32 31, %v1397_v32  ;;  %v5508_v33 = vadd.f32 %v610_v53, %v4729_v39 }
 0x192   : > { %v1379_v27 = vsel %vm1377_vm1, %v4441_v8, %v1378_v58  ;;  %v1258_v44 = vor.u32 4788187, %v1257_v5  ;;  %v1549_v28 = vadd.s32 536870912, %v1548_v38  ;;  %vm1374_vm3 = vweird.f32 %v5084_v10 }
 0x193   : > { %v1383_v30 = vsel %vm1376_vm12, %v1379_v27, %v1382_v52  ;;  %v5513_v46 = vand.u32 3, %v1268_v48  ;;  %v1400_v1 = vsub.s32 32, %v1399_v59  ;;  %v1261_v63 = vcvt.s32.f32 %v1254_v56 }
 0x194   : > { %v1384_v24 = vsel %vm1374_vm3, nan, %v1383_v30  ;;  %v1259_v26 = vand.u32 2147483647, %v1258_v44  ;;  %v5515_v45 = vshrl.u32 %v1549_v28, 30  ;;  %v5522_v10 = vshll.u32 %v1393_v42, 8 }
 0x195   : > { %v3969_v25 = vsel %vm3960_vm0, %v5402_v43, %v1384_v24  ;;  %v1403_v53 = vshrl.u32 %v7818_v13, %v1400_v1  ;;  %v1406_v50 = vshrl.u32 %v7819_v57, %v1400_v1  ;;  %v1409_v47 = vshrl.u32 %v7820_v60, %v1400_v1 }
 0x196   : > { %4002 = vst.msk [vmem:[%s5024_s21 + $0x30] sm:$0xff] %vm3995_vm2, %v3969_v25  ;;  %v1262_v4 = vmul.f32 %v1261_v63, %v1259_v26  ;;  %v1551_v22 = vshll.u32 %v5515_v45, 30  ;;  %v1697_v12 = vand.u32 2139095040, %v5508_v33  ;;  %v1398_v36 = vshrl.u32 %v1397_v32, 5 }
 0x197   : > { %v1402_v49 = vshll.u32 %v7827_v34, %v1399_v59  ;;  %v1405_v43 = vshll.u32 %v7818_v13, %v1399_v59  ;;  %v1412_v8 = vshrl.u32 %v7821_v9, %v1400_v1  ;;  %v1408_v35 = vshll.u32 %v7819_v57, %v1399_v59 }
 0x198   : > { %v1263_v19 = vxor.u32 2147483648, %v1262_v4  ;;  %v5532_v40 = vsub.s32 %v1548_v38, %v1551_v22  ;;  %v1411_v29 = vshll.u32 %v7820_v60, %v1399_v59  ;;  %v1414_v0 = vshll.u32 %v7821_v9, %v1399_v59 }
 0x199   : > { %v1404_v41 = vor.u32 %v1403_v53, %v1402_v49  ;;  %v1407_v48 = vor.u32 %v1406_v50, %v1405_v43  ;;  %v1415_v58 = vshrl.u32 %v7822_v16, %v1400_v1  ;;  %v1410_v5 = vor.u32 %v1409_v47, %v1408_v35 }
 0x19a   : > { %v1264_v32 = vsel %vm1181_vm6, %v1263_v19, %v1262_v4  ;;  %v1554_v56 = vsub.s32 0, %v5532_v40  ;;  %v1413_v52 = vor.u32 %v1412_v8, %v1411_v29  ;;  %v1401_v42 = vshrl.u32 %v7827_v34, %v1400_v1  ;;  %v488_v29 = vpop.permute.xlu0 %487 }
 0x19b   : > { %v1267_v38 = vsel %vm5460_vm10, %v5191_v21, %v1264_v32  ;;  %v1416_v27 = vor.u32 %v1415_v58, %v1414_v0  ;;  %v1698_v44 = vshrl.u32 %v1697_v12, 23  ;;  %vm1417_vm4 = vcmp.lt.s32.totalorder %v1398_v36, 1 }
 0x19c   : > { %4444 = vcosq.f32 %v1267_v38  ;;  %v4174_v59 = vmin.u32 %v1554_v56, %v5532_v40  ;;  %vm1418_vm5 = vcmp.lt.s32.totalorder %v1398_v36, 2  ;;  %vm1419_vm7 = vcmp.lt.s32.totalorder %v1398_v36, 3 }
 0x19d   : > { %4446 = vsinq.f32 %v1267_v38  ;;  %vm1420_vm6 = vcmp.lt.s32.totalorder %v1398_v36, 4  ;;  %v1421_v28 = vsel %vm1417_vm4, %v1401_v42, %v1404_v41  ;;  %v1425_v26 = vsel %vm1417_vm4, %v1404_v41, %v1407_v48 }
 0x19e   : > { %v1556_v30 = vclz %v4174_v59  ;;  %v1422_v24 = vsel %vm1420_vm6, %v1410_v5, 2102212464  ;;  %v1426_v63 = vsel %vm1420_vm6, %v1413_v52, 920167782  ;;  %v1429_v53 = vsel %vm1417_vm4, %v1407_v48, %v1410_v5 }
 0x19f   : > { %v1423_v25 = vsel %vm1419_vm7, %v1407_v48, %v1422_v24  ;;  %v1427_v54 = vsel %vm1419_vm7, %v1410_v5, %v1426_v63  ;;  %v1430_v50 = vsel %vm1420_vm6, %v1416_v27, 1326507024  ;;  %vm1490_vm8 = vcmp.lt.s32.totalorder %v5274_v61, 0 }
 0x1a0   : > { %v4175_v1 = vadd.s32 4294967294, %v1556_v30  ;;  %v1428_v4 = vsel %vm1418_vm5, %v1425_v26, %v1427_v54  ;;  %v1431_v22 = vsel %vm1419_vm7, %v1413_v52, %v1430_v50  ;;  %v1424_v47 = vsel %vm1418_vm5, %v1421_v28, %v1423_v25 }
 0x1a1   : > { %v1432_v12 = vsel %vm1418_vm5, %v1429_v53, %v1431_v22  ;;  %v5551_v49 = vmul.u32.u64.low %v5522_v10, %v1428_v4  ;;  %v5552_v43 = vmul.u32.u64.high %v5522_v10, %v1428_v4, %v5551_v49  ;;  %vm307_vm9 = vcmp.eq.s32.totalorder %v4674_v6, %v4691_v15 }
 0x1a2   : > { %vm4176_vm10 = vcmp.lt.s32.totalorder %v4175_v1, 0  ;;  %v5558_v8 = vmul.u32.u64.low %v5522_v10, %v1432_v12  ;;  %v5559_v19 = vmul.u32.u64.high %v5522_v10, %v1432_v12, %v5558_v8  ;;  %v4181_v35 = vadd.s32 4294967169, %v1698_v44 }
 0x1a3   : > { %vm1271_vm11 = vweird.f32 %v5191_v21  ;;  %vm1277_vm12 = vcmp.eq.s32.totalorder %v5513_v46, 2  ;;  %vm5565_vm13 = vcmp.le.f32.partialorder %v1488_v62, 0.7853982  ;;  %v1559_v41 = vsel %vm4176_vm10, 0, %v4175_v1 }
 0x1a4   : > { %v1574_v48 = vsub.s32 4, %v5515_v45  ;;  %v1544_v0 = vadd.s32 %v5473_v3, %v5485_v2  ;;  %v1560_v58 = vsub.s32 32, %v1559_v41  ;;  %v1564_v32 = vsub.s32 4294967266, %v1559_v41 }
 0x1a5   : > { %v1704_v56 = vadd.s32 1, %v4181_v35  ;;  %v1440_v5 = vmul.u32 %v5522_v10, %v1424_v47  ;;  %v1443_v52 = vadd.s32 1, %v5552_v43  ;;  %v1694_v38 = vand.u32 2147483647, %v5508_v33 }
 0x1a6   : > { %v609_v62 = vmul.f32 %v4725_v37, %v488_v29  ;;  %v4445_v42 = vpop.eup %4444  ;;  %v1561_v27 = vshll.u32 %v5532_v40, %v1559_v41  ;;  %v1562_v44 = vshrl.u32 %v1544_v0, %v1560_v58  ;;  %v1565_v59 = vadd.s32 127, %v1564_v32 }
 0x1a7   : > { %vm1442_vm14 = vc.u32 %v5559_v19, %v5551_v49  ;;  %v4447_v3 = vpop.eup %4446  ;;  %v1278_v2 = vxor.u32 2147483648, %v4445_v42  ;;  %v1575_v10 = vsel %vm1490_vm8, %v1574_v48, %v5515_v45  ;;  %vm1705_vm15 = vcmp.gt.s32.totalorder %v1704_v56, 0 }
 0x1a8   : > { %v1444_v28 = vsel %vm1442_vm14, %v1443_v52, %v5552_v43  ;;  %v1275_v30 = vxor.u32 2147483648, %v4447_v3  ;;  %v1563_v24 = vor.u32 %v1562_v44, %v1561_v27  ;;  %v1566_v26 = vshll.u32 %v1565_v59, 23 }
 0x1a9   : > { %v1445_v63 = vadd.s32 %v1444_v28, %v1440_v5  ;;  %vm1273_vm1 = vcmp.lt.s32.totalorder %v5513_v46, 2  ;;  %vm1274_vm3 = vcmp.eq.s32.totalorder %v5513_v46, 0  ;;  %v1279_v40 = vsel %vm1277_vm12, %v1278_v2, %v4447_v3 }
 0x1aa   : > { %v1706_v25 = vsel %vm1705_vm15, %v1704_v56, 0  ;;  %v1276_v54 = vsel %vm1274_vm3, %v4445_v42, %v1275_v30  ;;  %v1567_v53 = vor.u32 4788187, %v1566_v26  ;;  %v1701_v45 = vand.u32 8388607, %v1694_v38 }
 0x1ab   : > { %v1446_v50 = vadd.s32 536870912, %v1445_v63  ;;  %v1280_v1 = vsel %vm1273_vm1, %v1276_v54, %v1279_v40  ;;  %v1577_v4 = vsel %vm5565_vm13, 0, %v1575_v10  ;;  %v1708_v22 = vand.u32 31, %v1706_v25 }
 0x1ac   : > { %v5592_v47 = vadd.f32 %v609_v62, %v4729_v39  ;;  %v1281_v46 = vsel %vm1271_vm11, nan, %v1280_v1  ;;  %v1568_v12 = vand.u32 2147483647, %v1567_v53  ;;  %v1570_v43 = vcvt.s32.f32 %v1563_v24 }
 0x1ad   : > { %v5596_v8 = vshrl.u32 %v1446_v50, 30  ;;  %v5602_v35 = vsel %vm307_vm9, 1.0, %v7835_v31  ;;  %v3968_v29 = vsel %vm3960_vm0, %v5396_v55, %v1281_v46  ;;  %v1709_v41 = vsub.s32 32, %v1708_v22 }
 0x1ae   : > { %4001 = vst.msk [vmem:[%s5024_s21 + $0x28] sm:$0xff] %vm3995_vm2, %v3968_v29  ;;  %v1571_v48 = vmul.f32 %v1570_v43, %v1568_v12  ;;  %v5609_v21 = vand.u32 3, %v1577_v4  ;;  %v1702_v58 = vor.u32 8388608, %v1701_v45  ;;  %v1711_v32 = vshll.u32 %v7827_v34, %v1708_v22 }
 0x1af   : > { %v1448_v0 = vshll.u32 %v5596_v8, 30  ;;  %v1712_v56 = vshrl.u32 %v7818_v13, %v1709_v41  ;;  %v1715_v15 = vshrl.u32 %v7819_v57, %v1709_v41  ;;  %v1718_v5 = vshrl.u32 %v7820_v60, %v1709_v41 }
 0x1b0   : > { %v1572_v52 = vxor.u32 2147483648, %v1571_v48  ;;  %v1714_v55 = vshll.u32 %v7818_v13, %v1708_v22  ;;  %v1594_v42 = vand.u32 2139095040, %v5592_v47  ;;  %v1707_v27 = vshrl.u32 %v1706_v25, 5 }
 0x1b1   : > { %v5616_v62 = vsub.s32 %v1445_v63, %v1448_v0  ;;  %v1713_v44 = vor.u32 %v1712_v56, %v1711_v32  ;;  %v1717_v59 = vshll.u32 %v7819_v57, %v1708_v22  ;;  %v1720_v3 = vshll.u32 %v7820_v60, %v1708_v22 }
 0x1b2   : > { %v1573_v2 = vsel %vm1490_vm8, %v1572_v52, %v1571_v48  ;;  %v1716_v28 = vor.u32 %v1715_v15, %v1714_v55  ;;  %v1721_v30 = vshrl.u32 %v7821_v9, %v1709_v41  ;;  %v1723_v63 = vshll.u32 %v7821_v9, %v1708_v22 }
 0x1b3   : > { %v1451_v10 = vsub.s32 0, %v5616_v62  ;;  %v1576_v24 = vsel %vm5565_vm13, %v5274_v61, %v1573_v2  ;;  %v1719_v26 = vor.u32 %v1718_v5, %v1717_v59  ;;  %v1724_v40 = vshrl.u32 %v7822_v16, %v1709_v41 }
 0x1b4   : > { %4448 = vcosq.f32 %v1576_v24  ;;  %v5632_v54 = vshll.u32 %v1702_v58, 8  ;;  %v1595_v53 = vshrl.u32 %v1594_v42, 23  ;;  %v1710_v50 = vshrl.u32 %v7827_v34, %v1709_v41 }
 0x1b5   : > { %v4170_v25 = vmin.u32 %v1451_v10, %v5616_v62  ;;  %4450 = vsinq.f32 %v1576_v24  ;;  %v1722_v45 = vor.u32 %v1721_v30, %v1720_v3  ;;  %v1725_v1 = vor.u32 %v1724_v40, %v1723_v63 }
 0x1b6   : > { %vm1726_vm4 = vcmp.lt.s32.totalorder %v1707_v27, 1  ;;  %vm1727_vm5 = vcmp.lt.s32.totalorder %v1707_v27, 2  ;;  %vm1729_vm7 = vcmp.lt.s32.totalorder %v1707_v27, 4  ;;  %vm1387_vm6 = vcmp.lt.s32.totalorder %v5412_v7, 0 }
 0x1b7   : > { %v1453_v4 = vclz %v4170_v25  ;;  %vm1728_vm8 = vcmp.lt.s32.totalorder %v1707_v27, 3  ;;  %v1731_v36 = vsel %vm1729_vm7, %v1719_v26, 2102212464  ;;  %v1734_v22 = vsel %vm1726_vm4, %v1713_v44, %v1716_v28 }
 0x1b8   : > { %v1735_v46 = vsel %vm1729_vm7, %v1722_v45, 920167782  ;;  %v1730_v43 = vsel %vm1726_vm4, %v1710_v50, %v1713_v44  ;;  %v1738_v48 = vsel %vm1726_vm4, %v1716_v28, %v1719_v26  ;;  %v1732_v0 = vsel %vm1728_vm8, %v1716_v28, %v1731_v36 }
 0x1b9   : > { %v4171_v12 = vadd.s32 4294967294, %v1453_v4  ;;  %v1736_v29 = vsel %vm1728_vm8, %v1719_v26, %v1735_v46  ;;  %v1739_v41 = vsel %vm1729_vm7, %v1725_v1, 1326507024  ;;  %v4177_v32 = vadd.s32 4294967169, %v1595_v53 }
 0x1ba   : > { %v1737_v58 = vsel %vm1727_vm5, %v1734_v22, %v1736_v29  ;;  %v1740_v56 = vsel %vm1728_vm8, %v1722_v45, %v1739_v41  ;;  %vm1580_vm10 = vweird.f32 %v5274_v61  ;;  %vm1583_vm11 = vcmp.eq.s32.totalorder %v5609_v21, 0 }
 0x1bb   : > { %vm4172_vm9 = vcmp.lt.s32.totalorder %v4171_v12, 0  ;;  %v5638_v15 = vmul.u32.u64.low %v5632_v54, %v1737_v58  ;;  %v5639_v5 = vmul.u32.u64.high %v5632_v54, %v1737_v58, %v5638_v15  ;;  %vm5646_vm12 = vcmp.le.f32.partialorder %v1385_v51, 0.7853982 }
 0x1bc   : > { %v1441_v55 = vadd.s32 %v5551_v49, %v5559_v19  ;;  %v1456_v42 = vsel %vm4172_vm9, 0, %v4171_v12  ;;  %v1741_v44 = vsel %vm1727_vm5, %v1738_v48, %v1740_v56  ;;  %v1471_v2 = vsub.s32 4, %v5596_v8 }
 0x1bd   : > { %v1457_v59 = vsub.s32 32, %v1456_v42  ;;  %v1461_v3 = vsub.s32 4294967266, %v1456_v42  ;;  %v1601_v10 = vadd.s32 1, %v4177_v32  ;;  %v1458_v28 = vshll.u32 %v5616_v62, %v1456_v42 }
 0x1be   : > { %v1733_v30 = vsel %vm1727_vm5, %v1730_v43, %v1732_v0  ;;  %v5657_v51 = vmul.u32.u64.low %v5632_v54, %v1741_v44  ;;  %v5658_v24 = vmul.u32.u64.high %v5632_v54, %v1741_v44, %v5657_v51  ;;  %v4449_v26 = vpop.eup %4448  ;;  %v1752_v49 = vadd.s32 1, %v5639_v5 }
 0x1bf   : > { %v1459_v63 = vshrl.u32 %v1441_v55, %v1457_v59  ;;  %v1462_v40 = vadd.s32 127, %v1461_v3  ;;  %vm1602_vm13 = vcmp.gt.s32.totalorder %v1601_v10, 0  ;;  %v4451_v19 = vpop.eup %4450  ;;  %vm1586_vm14 = vcmp.eq.s32.totalorder %v5609_v21, 2 }
 0x1c0   : > { %v1587_v25 = vxor.u32 2147483648, %v4449_v26  ;;  %v1591_v53 = vand.u32 2147483647, %v5592_v47  ;;  %v1603_v50 = vsel %vm1602_vm13, %v1601_v10, 0  ;;  %v1584_v62 = vxor.u32 2147483648, %v4451_v19 }
 0x1c1   : > { %v1460_v27 = vor.u32 %v1459_v63, %v1458_v28  ;;  %v1463_v45 = vshll.u32 %v1462_v40, 23  ;;  %v1472_v1 = vsel %vm1387_vm6, %v1471_v2, %v5596_v8  ;;  %v1749_v36 = vmul.u32 %v5632_v54, %v1733_v30 }
 0x1c2   : > { %v1588_v4 = vsel %vm1586_vm14, %v1587_v25, %v4451_v19  ;;  %vm1751_vm15 = vc.u32 %v5658_v24, %v5638_v15  ;;  %v1605_v22 = vand.u32 31, %v1603_v50  ;;  %vm1582_vm1 = vcmp.lt.s32.totalorder %v5609_v21, 2  ;;  %v503_v19 = vpop.permute.xlu1 %502 }
 0x1c3   : > { %v1585_v46 = vsel %vm1583_vm11, %v4449_v26, %v1584_v62  ;;  %v1464_v12 = vor.u32 4788187, %v1463_v45  ;;  %v1753_v43 = vsel %vm1751_vm15, %v1752_v49, %v5639_v5  ;;  %v1598_v8 = vand.u32 8388607, %v1591_v53 }
 0x1c4   : > { %v1589_v29 = vsel %vm1582_vm1, %v1585_v46, %v1588_v4  ;;  %v1754_v48 = vadd.s32 %v1753_v43, %v1749_v36  ;;  %v1606_v0 = vsub.s32 32, %v1605_v22  ;;  %v1467_v41 = vcvt.s32.f32 %v1460_v27 }
 0x1c5   : > { %v1590_v54 = vsel %vm1580_vm10, nan, %v1589_v29  ;;  %v1465_v58 = vand.u32 2147483647, %v1464_v12  ;;  %v1474_v32 = vsel %vm5646_vm12, 0, %v1472_v1  ;;  %v1604_v5 = vshrl.u32 %v1603_v50, 5 }
 0x1c6   : > { %v3971_v21 = vsel %vm3960_vm0, %v5602_v35, %v1590_v54  ;;  %v1755_v56 = vadd.s32 536870912, %v1754_v48  ;;  %v1609_v55 = vshrl.u32 %v7818_v13, %v1606_v0  ;;  %v1612_v44 = vshrl.u32 %v7819_v57, %v1606_v0 }
 0x1c7   : > { %4004 = vst.msk [vmem:[%s5024_s21 + $0x40] sm:$0xff] %vm3995_vm2, %v3971_v21  ;;  %v1468_v42 = vmul.f32 %v1467_v41, %v1465_v58  ;;  %v1614_v61 = vshll.u32 %v7819_v57, %v1605_v22  ;;  %v1615_v59 = vshrl.u32 %v7820_v60, %v1606_v0  ;;  %v1608_v2 = vshll.u32 %v7827_v34, %v1605_v22 }
 0x1c8   : > { %v5688_v3 = vshrl.u32 %v1755_v56, 30  ;;  %v1611_v10 = vshll.u32 %v7818_v13, %v1605_v22  ;;  %v1618_v35 = vshrl.u32 %v7821_v9, %v1606_v0  ;;  %v1617_v51 = vshll.u32 %v7820_v60, %v1605_v22 }
 0x1c9   : > { %v1469_v28 = vxor.u32 2147483648, %v1468_v42  ;;  %v1616_v30 = vor.u32 %v1615_v59, %v1614_v61  ;;  %v1621_v26 = vshrl.u32 %v7822_v16, %v1606_v0  ;;  %vm306_vm3 = vcmp.eq.s32.totalorder %v4674_v6, %v4683_v11 }
 0x1ca   : > { %v1757_v63 = vshll.u32 %v5688_v3, 30  ;;  %v1599_v40 = vor.u32 8388608, %v1598_v8  ;;  %v1610_v49 = vor.u32 %v1609_v55, %v1608_v2  ;;  %v1613_v50 = vor.u32 %v1612_v44, %v1611_v10 }
 0x1cb   : > { %v1470_v25 = vsel %vm1387_vm6, %v1469_v28, %v1468_v42  ;;  %v1619_v62 = vor.u32 %v1618_v35, %v1617_v51  ;;  %v1620_v27 = vshll.u32 %v7821_v9, %v1605_v22  ;;  %v5704_v1 = vand.u32 3, %v1474_v32 }
 0x1cc   : > { %v1473_v45 = vsel %vm5646_vm12, %v5412_v7, %v1470_v25  ;;  %v5706_v4 = vsub.s32 %v1754_v48, %v1757_v63  ;;  %vm1626_vm4 = vcmp.lt.s32.totalorder %v1604_v5, 4  ;;  %v612_v12 = vmul.f32 %v4725_v37, %v503_v19 }
 0x1cd   : > { %4452 = vcosq.f32 %v1473_v45  ;;  %v1622_v36 = vor.u32 %v1621_v26, %v1620_v27  ;;  %v1628_v46 = vsel %vm1626_vm4, %v1616_v30, 2102212464  ;;  %v1607_v22 = vshrl.u32 %v7827_v34, %v1606_v0  ;;  %v498_v0 = vpop.permute.xlu0 %497 }
 0x1ce   : > { %4454 = vsinq.f32 %v1473_v45  ;;  %v1760_v43 = vsub.s32 0, %v5706_v4  ;;  %vm1623_vm5 = vcmp.lt.s32.totalorder %v1604_v5, 1  ;;  %vm1625_vm7 = vcmp.lt.s32.totalorder %v1604_v5, 3 }
 0x1cf   : > { %v1631_v52 = vsel %vm1623_vm5, %v1610_v49, %v1613_v50  ;;  %v1632_v29 = vsel %vm1626_vm4, %v1619_v62, 920167782  ;;  %v1639_v8 = vshll.u32 %v1599_v40, 8  ;;  %v1627_v54 = vsel %vm1623_vm5, %v1607_v22, %v1610_v49 }
 0x1d0   : > { %v4182_v48 = vmin.u32 %v1760_v43, %v5706_v4  ;;  %v1629_v58 = vsel %vm1625_vm7, %v1613_v50, %v1628_v46  ;;  %v1635_v41 = vsel %vm1623_vm5, %v1613_v50, %v1616_v30  ;;  %vm1624_vm6 = vcmp.lt.s32.totalorder %v1604_v5, 2 }
 0x1d1   : > { %v1633_v32 = vsel %vm1625_vm7, %v1616_v30, %v1632_v29  ;;  %v1636_v21 = vsel %vm1626_vm4, %v1622_v36, 1326507024  ;;  %v5718_v56 = vadd.f32 %v612_v12, %v4729_v39  ;;  %v4114_v55 = vsel %vm306_vm3, 1.0, %v7835_v31 }
 0x1d2   : > { %v1762_v42 = vclz %v4182_v48  ;;  %v1634_v44 = vsel %vm1624_vm6, %v1631_v52, %v1633_v32  ;;  %v1637_v61 = vsel %vm1625_vm7, %v1619_v62, %v1636_v21  ;;  %vm1696_vm8 = vcmp.lt.s32.totalorder %v5508_v33, 0 }
 0x1d3   : > { %v1630_v59 = vsel %vm1624_vm6, %v1627_v54, %v1629_v58  ;;  %v1638_v2 = vsel %vm1624_vm6, %v1635_v41, %v1637_v61  ;;  %v5726_v10 = vmul.u32.u64.low %v1639_v8, %v1634_v44  ;;  %v5727_v35 = vmul.u32.u64.high %v1639_v8, %v1634_v44, %v5726_v10 }
 0x1d4   : > { %vm1477_vm9 = vweird.f32 %v5412_v7  ;;  %v4183_v28 = vadd.s32 4294967294, %v1762_v42  ;;  %v5731_v30 = vmul.u32.u64.low %v1639_v8, %v1638_v2  ;;  %v5732_v51 = vmul.u32.u64.high %v1639_v8, %v1638_v2, %v5731_v30 }
 0x1d5   : > { %v611_v11 = vmul.f32 %v4725_v37, %v498_v0  ;;  %vm1479_vm10 = vcmp.lt.s32.totalorder %v5704_v1, 2  ;;  %vm1480_vm11 = vcmp.eq.s32.totalorder %v5704_v1, 0  ;;  %vm1483_vm12 = vcmp.eq.s32.totalorder %v5704_v1, 2 }
 0x1d6   : > { %v1903_v5 = vand.u32 2139095040, %v5718_v56  ;;  %v1750_v26 = vadd.s32 %v5638_v15, %v5658_v24  ;;  %vm4184_vm13 = vcmp.lt.s32.totalorder %v4183_v28, 0  ;;  %v1780_v63 = vsub.s32 4, %v5688_v3 }
 0x1d7   : > { %v1646_v40 = vmul.u32 %v1639_v8, %v1630_v59  ;;  %v4453_v49 = vpop.eup %4452  ;;  %vm309_vm14 = vcmp.eq.s32.totalorder %v4674_v6, %v4695_v18  ;;  %v1765_v19 = vsel %vm4184_vm13, 0, %v4183_v28  ;;  %v1649_v25 = vadd.s32 1, %v5727_v35 }
 0x1d8   : > { %v1900_v50 = vand.u32 2147483647, %v5718_v56  ;;  %v1904_v62 = vshrl.u32 %v1903_v5, 23  ;;  %v4455_v27 = vpop.eup %4454  ;;  %v1484_v45 = vxor.u32 2147483648, %v4453_v49  ;;  %v1766_v36 = vsub.s32 32, %v1765_v19 }
 0x1d9   : > { %v1770_v46 = vsub.s32 4294967266, %v1765_v19  ;;  %v5747_v15 = vadd.f32 %v611_v11, %v4729_v39  ;;  %v1481_v24 = vxor.u32 2147483648, %v4455_v27  ;;  %v1767_v12 = vshll.u32 %v5706_v4, %v1765_v19 }
 0x1da   : > { %vm1648_vm15 = vc.u32 %v5732_v51, %v5726_v10  ;;  %v4189_v43 = vadd.s32 4294967169, %v1904_v62  ;;  %v1485_v22 = vsel %vm1483_vm12, %v1484_v45, %v4455_v27  ;;  %v1768_v52 = vshrl.u32 %v1750_v26, %v1766_v36 }
 0x1db   : > { %v1771_v29 = vadd.s32 127, %v1770_v46  ;;  %v1650_v8 = vsel %vm1648_vm15, %v1649_v25, %v5727_v35  ;;  %v1482_v48 = vsel %vm1480_vm11, %v4453_v49, %v1481_v24  ;;  %v1907_v58 = vand.u32 8388607, %v1900_v50 }
 0x1dc   : > { %v1651_v54 = vadd.s32 %v1650_v8, %v1646_v40  ;;  %v1910_v4 = vadd.s32 1, %v4189_v43  ;;  %v1486_v41 = vsel %vm1479_vm10, %v1482_v48, %v1485_v22  ;;  %v1769_v32 = vor.u32 %v1768_v52, %v1767_v12 }
 0x1dd   : > { %v1772_v21 = vshll.u32 %v1771_v29, 23  ;;  %v1781_v0 = vsel %vm1696_vm8, %v1780_v63, %v5688_v3  ;;  %v1487_v42 = vsel %vm1477_vm9, nan, %v1486_v41  ;;  %vm5768_vm1 = vcmp.le.f32.partialorder %v1694_v38, 0.7853982 }
 0x1de   : > { %v1652_v61 = vadd.s32 536870912, %v1651_v54  ;;  %vm1911_vm3 = vcmp.gt.s32.totalorder %v1910_v4, 0  ;;  %v3970_v1 = vsel %vm3960_vm0, %v4114_v55, %v1487_v42  ;;  %v1800_v35 = vand.u32 2139095040, %v5747_v15 }
 0x1df   : > { %v1773_v59 = vor.u32 4788187, %v1772_v21  ;;  %v1912_v2 = vsel %vm1911_vm3, %v1910_v4, 0  ;;  %4003 = vst.msk [vmem:[%s5024_s21 + $0x38] sm:$0xff] %vm3995_vm2, %v3970_v1  ;;  %v1783_v7 = vsel %vm5768_vm1, 0, %v1781_v0  ;;  %v1908_v38 = vor.u32 8388608, %v1907_v58 }
 0x1e0   : > { %v5779_v3 = vshrl.u32 %v1652_v61, 30  ;;  %v1914_v28 = vand.u32 31, %v1912_v2  ;;  %v1776_v11 = vcvt.s32.f32 %v1769_v32  ;;  %v5786_v55 = vsel %vm309_vm14, 1.0, %v7835_v31 }
 0x1e1   : > { %v1774_v30 = vand.u32 2147483647, %v1773_v59  ;;  %v5788_v40 = vand.u32 3, %v1783_v7  ;;  %v1801_v49 = vshrl.u32 %v1800_v35, 23  ;;  %v1913_v25 = vshrl.u32 %v1912_v2, 5 }
 0x1e2   : > { %v1654_v5 = vshll.u32 %v5779_v3, 30  ;;  %v1915_v26 = vsub.s32 32, %v1914_v28  ;;  %v5793_v27 = vshll.u32 %v1908_v38, 8  ;;  %v1917_v36 = vshll.u32 %v7827_v34, %v1914_v28 }
 0x1e3   : > { %v1777_v63 = vmul.f32 %v1776_v11, %v1774_v30  ;;  %v1920_v12 = vshll.u32 %v7818_v13, %v1914_v28  ;;  %v1923_v43 = vshll.u32 %v7819_v57, %v1914_v28  ;;  %v1926_v8 = vshll.u32 %v7820_v60, %v1914_v28 }
 0x1e4   : > { %v5790_v19 = vsub.s32 %v1651_v54, %v1654_v5  ;;  %v1918_v62 = vshrl.u32 %v7818_v13, %v1915_v26  ;;  %v1921_v46 = vshrl.u32 %v7819_v57, %v1915_v26  ;;  %v1924_v18 = vshrl.u32 %v7820_v60, %v1915_v26 }
 0x1e5   : > { %v1778_v45 = vxor.u32 2147483648, %v1777_v63  ;;  %v1927_v22 = vshrl.u32 %v7821_v9, %v1915_v26  ;;  %v4185_v48 = vadd.s32 4294967169, %v1801_v49  ;;  %v1929_v21 = vshll.u32 %v7821_v9, %v1914_v28 }
 0x1e6   : > { %v1657_v24 = vsub.s32 0, %v5790_v19  ;;  %v1919_v29 = vor.u32 %v1918_v62, %v1917_v36  ;;  %v1922_v4 = vor.u32 %v1921_v46, %v1920_v12  ;;  %v1925_v41 = vor.u32 %v1924_v18, %v1923_v43 }
 0x1e7   : > { %v1779_v52 = vsel %vm1696_vm8, %v1778_v45, %v1777_v63  ;;  %v1928_v32 = vor.u32 %v1927_v22, %v1926_v8  ;;  %v1930_v0 = vshrl.u32 %v7822_v16, %v1915_v26  ;;  %v1916_v61 = vshrl.u32 %v7827_v34, %v1915_v26 }
 0x1e8   : > { %v1782_v54 = vsel %vm5768_vm1, %v5508_v33, %v1779_v52  ;;  %v4178_v58 = vmin.u32 %v1657_v24, %v5790_v19  ;;  %vm1932_vm4 = vcmp.lt.s32.totalorder %v1913_v25, 1  ;;  %vm1933_vm5 = vcmp.lt.s32.totalorder %v1913_v25, 2 }
 0x1e9   : > { %4456 = vcosq.f32 %v1782_v54  ;;  %v1931_v1 = vor.u32 %v1930_v0, %v1929_v21  ;;  %vm1934_vm7 = vcmp.lt.s32.totalorder %v1913_v25, 3  ;;  %vm1935_vm6 = vcmp.lt.s32.totalorder %v1913_v25, 4  ;;  %v513_v21 = vpop.permute.xlu1 %512 }
 0x1ea   : > { %4458 = vsinq.f32 %v1782_v54  ;;  %v1659_v42 = vclz %v4178_v58  ;;  %v1937_v59 = vsel %vm1935_vm6, %v1925_v41, 2102212464  ;;  %v1940_v2 = vsel %vm1932_vm4, %v1919_v29, %v1922_v4 }
 0x1eb   : > { %v1941_v35 = vsel %vm1935_vm6, %v1928_v32, 920167782  ;;  %v1936_v7 = vsel %vm1932_vm4, %v1916_v61, %v1919_v29  ;;  %v1944_v30 = vsel %vm1932_vm4, %v1922_v4, %v1925_v41  ;;  %v1945_v11 = vsel %vm1935_vm6, %v1931_v1, 1326507024 }
 0x1ec   : > { %v4179_v44 = vadd.s32 4294967294, %v1659_v42  ;;  %v1942_v38 = vsel %vm1934_vm7, %v1925_v41, %v1941_v35  ;;  %v1938_v28 = vsel %vm1934_vm7, %v1922_v4, %v1937_v59  ;;  %v1946_v63 = vsel %vm1934_vm7, %v1928_v32, %v1945_v11 }
 0x1ed   : > { %v1943_v5 = vsel %vm1933_vm5, %v1940_v2, %v1942_v38  ;;  %vm1593_vm9 = vcmp.lt.s32.totalorder %v5592_v47, 0  ;;  %v1947_v49 = vsel %vm1933_vm5, %v1944_v30, %v1946_v63  ;;  %vm1786_vm10 = vweird.f32 %v5508_v33 }
 0x1ee   : > { %vm4180_vm8 = vcmp.lt.s32.totalorder %v4179_v44, 0  ;;  %v5816_v62 = vmul.u32.u64.low %v5793_v27, %v1943_v5  ;;  %v5817_v45 = vmul.u32.u64.high %v5793_v27, %v1943_v5, %v5816_v62  ;;  %vm1788_vm11 = vcmp.lt.s32.totalorder %v5788_v40, 2 }
 0x1ef   : > { %v1662_v26 = vsel %vm4180_vm8, 0, %v4179_v44  ;;  %v1647_v36 = vadd.s32 %v5726_v10, %v5732_v51  ;;  %v5825_v24 = vmul.u32.u64.low %v5793_v27, %v1947_v49  ;;  %v5826_v12 = vmul.u32.u64.high %v5793_v27, %v1947_v49, %v5825_v24 }
 0x1f0   : > { %v1663_v46 = vsub.s32 32, %v1662_v26  ;;  %v1667_v18 = vsub.s32 4294967266, %v1662_v26  ;;  %v1797_v43 = vand.u32 2147483647, %v5747_v15  ;;  %v1807_v22 = vadd.s32 1, %v4185_v48 }
 0x1f1   : > { %v1664_v52 = vshll.u32 %v5790_v19, %v1662_v26  ;;  %v1939_v54 = vsel %vm1933_vm5, %v1936_v7, %v1938_v28  ;;  %vm1789_vm12 = vcmp.eq.s32.totalorder %v5788_v40, 0  ;;  %v1677_v10 = vsub.s32 4, %v5779_v3 }
 0x1f2   : > { %v1665_v29 = vshrl.u32 %v1647_v36, %v1663_v46  ;;  %v1668_v8 = vadd.s32 127, %v1667_v18  ;;  %v1958_v51 = vadd.s32 1, %v5817_v45  ;;  %vm1808_vm13 = vcmp.gt.s32.totalorder %v1807_v22, 0 }
 0x1f3   : > { %v4457_v58 = vpop.eup %4456  ;;  %vm5836_vm14 = vcmp.le.f32.partialorder %v1591_v53, 0.7853982  ;;  %v1809_v25 = vsel %vm1808_vm13, %v1807_v22, 0  ;;  %vm1792_vm15 = vcmp.eq.s32.totalorder %v5788_v40, 2  ;;  %v1955_v42 = vmul.u32 %v5793_v27, %v1939_v54 }
 0x1f4   : > { %v4459_v4 = vpop.eup %4458  ;;  %v1793_v41 = vxor.u32 2147483648, %v4457_v58  ;;  %v1666_v19 = vor.u32 %v1665_v29, %v1664_v52  ;;  %v1669_v32 = vshll.u32 %v1668_v8, 23  ;;  %vm1957_vm1 = vc.u32 %v5826_v12, %v5816_v62 }
 0x1f5   : > { %v1790_v0 = vxor.u32 2147483648, %v4459_v4  ;;  %v1959_v44 = vsel %vm1957_vm1, %v1958_v51, %v5817_v45  ;;  %v1804_v53 = vand.u32 8388607, %v1797_v43  ;;  %v1811_v35 = vand.u32 31, %v1809_v25 }
 0x1f6   : > { %v1794_v61 = vsel %vm1792_vm15, %v1793_v41, %v4459_v4  ;;  %v1670_v1 = vor.u32 4788187, %v1669_v32  ;;  %v1960_v2 = vadd.s32 %v1959_v44, %v1955_v42  ;;  %v614_v7 = vmul.f32 %v4725_v37, %v513_v21 }
 0x1f7   : > { %v1791_v59 = vsel %vm1789_vm12, %v4457_v58, %v1790_v0  ;;  %v1673_v30 = vcvt.s32.f32 %v1666_v19  ;;  %v1678_v11 = vsel %vm1593_vm9, %v1677_v10, %v5779_v3  ;;  %v5857_v63 = vshrl.u32 %v1809_v25, 5 }
 0x1f8   : > { %v1795_v27 = vsel %vm1788_vm11, %v1791_v59, %v1794_v61  ;;  %v1671_v38 = vand.u32 2147483647, %v1670_v1  ;;  %v1961_v5 = vadd.s32 536870912, %v1960_v2  ;;  %v1812_v26 = vsub.s32 32, %v1811_v35 }
 0x1f9   : > { %v1796_v28 = vsel %vm1786_vm10, nan, %v1795_v27  ;;  %v1814_v40 = vshll.u32 %v7827_v34, %v1811_v35  ;;  %v1817_v36 = vshll.u32 %v7818_v13, %v1811_v35  ;;  %vm308_vm3 = vcmp.eq.s32.totalorder %v4674_v6, %v4689_v14 }
 0x1fa   : > { %v3973_v49 = vsel %vm3960_vm0, %v5786_v55, %v1796_v28  ;;  %v1674_v45 = vmul.f32 %v1673_v30, %v1671_v38  ;;  %v5868_v33 = vshrl.u32 %v1961_v5, 30  ;;  %v1815_v3 = vshrl.u32 %v7818_v13, %v1812_v26 }
 0x1fb   : > { %4006 = vst.msk [vmem:[%s5024_s21 + $0x50] sm:$0xff] %vm3995_vm2, %v3973_v49  ;;  %v1818_v46 = vshrl.u32 %v7819_v57, %v1812_v26  ;;  %v1820_v18 = vshll.u32 %v7819_v57, %v1811_v35  ;;  %v1821_v55 = vshrl.u32 %v7820_v60, %v1812_v26  ;;  %v1823_v22 = vshll.u32 %v7820_v60, %v1811_v35 }
 0x1fc   : > { %v1675_v24 = vxor.u32 2147483648, %v1674_v45  ;;  %v1824_v52 = vshrl.u32 %v7821_v9, %v1812_v26  ;;  %v1680_v29 = vsel %vm5836_vm14, 0, %v1678_v11  ;;  %v1963_v8 = vshll.u32 %v5868_v33, 30 }
 0x1fd   : > { %v1805_v54 = vor.u32 8388608, %v1804_v53  ;;  %v1816_v58 = vor.u32 %v1815_v3, %v1814_v40  ;;  %v1819_v51 = vor.u32 %v1818_v46, %v1817_v36  ;;  %v1822_v4 = vor.u32 %v1821_v55, %v1820_v18 }
 0x1fe   : > { %v1676_v10 = vsel %vm1593_vm9, %v1675_v24, %v1674_v45  ;;  %v1825_v41 = vor.u32 %v1824_v52, %v1823_v22  ;;  %v5884_v32 = vsub.s32 %v1960_v2, %v1963_v8  ;;  %v1826_v25 = vshll.u32 %v7821_v9, %v1811_v35 }
 0x1ff   : > { %v1679_v19 = vsel %vm5836_vm14, %v5592_v47, %v1676_v10  ;;  %v1827_v21 = vshrl.u32 %v7822_v16, %v1812_v26  ;;  %v5888_v0 = vand.u32 3, %v1680_v29  ;;  %vm1829_vm4 = vcmp.lt.s32.totalorder %v5857_v63, 1 }
 0x200   : > { %4460 = vcosq.f32 %v1679_v19  ;;  %v5892_v42 = vadd.f32 %v614_v7, %v4729_v39  ;;  %v1966_v61 = vsub.s32 0, %v5884_v32  ;;  %vm1832_vm5 = vcmp.lt.s32.totalorder %v5857_v63, 4 }
 0x201   : > { %4462 = vsinq.f32 %v1679_v19  ;;  %v1828_v1 = vor.u32 %v1827_v21, %v1826_v25  ;;  %v1813_v48 = vshrl.u32 %v7827_v34, %v1812_v26  ;;  %v1834_v44 = vsel %vm1832_vm5, %v1822_v4, 2102212464 }
 0x202   : > { %v1837_v53 = vsel %vm1829_vm4, %v1816_v58, %v1819_v51  ;;  %v1838_v59 = vsel %vm1832_vm5, %v1825_v41, 920167782  ;;  %v4190_v2 = vmin.u32 %v1966_v61, %v5884_v32  ;;  %vm1831_vm7 = vcmp.lt.s32.totalorder %v5857_v63, 3 }
 0x203   : > { %v1841_v35 = vsel %vm1829_vm4, %v1819_v51, %v1822_v4  ;;  %v1845_v27 = vshll.u32 %v1805_v54, 8  ;;  %vm1830_vm6 = vcmp.lt.s32.totalorder %v5857_v63, 2  ;;  %v1833_v7 = vsel %vm1829_vm4, %v1813_v48, %v1816_v58 }
 0x204   : > { %v1839_v38 = vsel %vm1831_vm7, %v1822_v4, %v1838_v59  ;;  %v1842_v30 = vsel %vm1832_vm5, %v1828_v1, 1326507024  ;;  %v1968_v11 = vclz %v4190_v2  ;;  %v1835_v28 = vsel %vm1831_vm7, %v1819_v51, %v1834_v44  ;;  %v508_v59 = vpop.permute.xlu0 %507 }
 0x205   : > { %v1840_v5 = vsel %vm1830_vm6, %v1837_v53, %v1839_v38  ;;  %v1843_v26 = vsel %vm1831_vm7, %v1825_v41, %v1842_v30  ;;  %v4116_v49 = vsel %vm308_vm3, 1.0, %v7835_v31  ;;  %vm1683_vm8 = vweird.f32 %v5592_v47 }
 0x206   : > { %v1844_v45 = vsel %vm1830_vm6, %v1841_v35, %v1843_v26  ;;  %v5908_v40 = vmul.u32.u64.low %v1845_v27, %v1840_v5  ;;  %v5909_v36 = vmul.u32.u64.high %v1845_v27, %v1840_v5, %v5908_v40  ;;  %vm1902_vm9 = vcmp.lt.s32.totalorder %v5718_v56, 0 }
 0x207   : > { %v4191_v3 = vadd.s32 4294967294, %v1968_v11  ;;  %v5914_v46 = vmul.u32.u64.low %v1845_v27, %v1844_v45  ;;  %v5915_v18 = vmul.u32.u64.high %v1845_v27, %v1844_v45, %v5914_v46  ;;  %vm1685_vm10 = vcmp.lt.s32.totalorder %v5888_v0, 2 }
 0x208   : > { %vm1686_vm11 = vcmp.eq.s32.totalorder %v5888_v0, 0  ;;  %v1836_v14 = vsel %vm1830_vm6, %v1833_v7, %v1835_v28  ;;  %v2109_v24 = vand.u32 2139095040, %v5892_v42  ;;  %vm1689_vm12 = vcmp.eq.s32.totalorder %v5888_v0, 2 }
 0x209   : > { %v1956_v55 = vadd.s32 %v5816_v62, %v5826_v12  ;;  %vm4192_vm13 = vcmp.lt.s32.totalorder %v4191_v3, 0  ;;  %v1986_v22 = vsub.s32 4, %v5868_v33  ;;  %v1855_v8 = vadd.s32 1, %v5909_v36 }
 0x20a   : > { %v4461_v52 = vpop.eup %4460  ;;  %v1971_v29 = vsel %vm4192_vm13, 0, %v4191_v3  ;;  %v2106_v54 = vand.u32 2147483647, %v5892_v42  ;;  %v2110_v58 = vshrl.u32 %v2109_v24, 23  ;;  %v1852_v41 = vmul.u32 %v1845_v27, %v1836_v14 }
 0x20b   : > { %v4463_v10 = vpop.eup %4462  ;;  %v1690_v63 = vxor.u32 2147483648, %v4461_v52  ;;  %v1972_v51 = vsub.s32 32, %v1971_v29  ;;  %v1976_v4 = vsub.s32 4294967266, %v1971_v29  ;;  %v1973_v25 = vshll.u32 %v5884_v32, %v1971_v29 }
 0x20c   : > { %v1687_v19 = vxor.u32 2147483648, %v4463_v10  ;;  %vm1854_vm14 = vc.u32 %v5915_v18, %v5908_v40  ;;  %v4197_v62 = vadd.s32 4294967169, %v2110_v58  ;;  %v2113_v53 = vand.u32 8388607, %v2106_v54 }
 0x20d   : > { %v1691_v12 = vsel %vm1689_vm12, %v1690_v63, %v4463_v10  ;;  %v1974_v21 = vshrl.u32 %v1956_v55, %v1972_v51  ;;  %v1977_v61 = vadd.s32 127, %v1976_v4  ;;  %v1856_v1 = vsel %vm1854_vm14, %v1855_v8, %v5909_v36  ;;  %v523_v36 = vpop.permute.xlu1 %522 }
 0x20e   : > { %v1688_v48 = vsel %vm1686_vm11, %v4461_v52, %v1687_v19  ;;  %v1857_v44 = vadd.s32 %v1856_v1, %v1852_v41  ;;  %v2116_v32 = vadd.s32 1, %v4197_v62  ;;  %v1987_v7 = vsel %vm1902_vm9, %v1986_v22, %v5868_v33 }
 0x20f   : > { %v1692_v2 = vsel %vm1685_vm10, %v1688_v48, %v1691_v12  ;;  %v1975_v35 = vor.u32 %v1974_v21, %v1973_v25  ;;  %v1978_v27 = vshll.u32 %v1977_v61, 23  ;;  %vm5947_vm15 = vcmp.le.f32.partialorder %v1900_v50, 0.7853982 }
 0x210   : > { %v1693_v38 = vsel %vm1683_vm8, nan, %v1692_v2  ;;  %v1858_v11 = vadd.s32 536870912, %v1857_v44  ;;  %vm2117_vm1 = vcmp.gt.s32.totalorder %v2116_v32, 0  ;;  %v613_v26 = vmul.f32 %v4725_v37, %v508_v59 }
 0x211   : > { %v3972_v0 = vsel %vm3960_vm0, %v4116_v49, %v1693_v38  ;;  %v1979_v28 = vor.u32 4788187, %v1978_v27  ;;  %v2118_v5 = vsel %vm2117_vm1, %v2116_v32, 0  ;;  %v1989_v47 = vsel %vm5947_vm15, 0, %v1987_v7 }
 0x212   : > { %4005 = vst.msk [vmem:[%s5024_s21 + $0x48] sm:$0xff] %vm3995_vm2, %v3972_v0  ;;  %v5958_v33 = vshrl.u32 %v1858_v11, 30  ;;  %v2114_v50 = vor.u32 8388608, %v2113_v53  ;;  %v2120_v45 = vand.u32 31, %v2118_v5  ;;  %v1982_v46 = vcvt.s32.f32 %v1975_v35 }
 0x213   : > { %v1980_v3 = vand.u32 2147483647, %v1979_v28  ;;  %v5961_v55 = vand.u32 3, %v1989_v47  ;;  %v5964_v22 = vadd.f32 %v613_v26, %v4729_v39  ;;  %v5967_v52 = vmul.f32 %v4725_v37, %v523_v36 }
 0x214   : > { %v1860_v14 = vshll.u32 %v5958_v33, 30  ;;  %v2121_v24 = vsub.s32 32, %v2120_v45  ;;  %v5971_v8 = vshrl.u32 %v2118_v5, 5  ;;  %v5974_v10 = vshll.u32 %v2114_v50, 8 }
 0x215   : > { %v1983_v49 = vmul.f32 %v1982_v46, %v1980_v3  ;;  %v2123_v51 = vshll.u32 %v7827_v34, %v2120_v45  ;;  %v2126_v25 = vshll.u32 %v7818_v13, %v2120_v45  ;;  %v2129_v62 = vshll.u32 %v7819_v57, %v2120_v45 }
 0x216   : > { %v5969_v29 = vsub.s32 %v1857_v44, %v1860_v14  ;;  %v2124_v58 = vshrl.u32 %v7818_v13, %v2121_v24  ;;  %v2127_v4 = vshrl.u32 %v7819_v57, %v2121_v24  ;;  %v2130_v41 = vshrl.u32 %v7820_v60, %v2121_v24 }
 0x217   : > { %v1984_v63 = vxor.u32 2147483648, %v1983_v49  ;;  %v2133_v12 = vshrl.u32 %v7821_v9, %v2121_v24  ;;  %v2132_v1 = vshll.u32 %v7820_v60, %v2120_v45  ;;  %v2006_v48 = vand.u32 2139095040, %v5964_v22 }
 0x218   : > { %v1863_v19 = vsub.s32 0, %v5969_v29  ;;  %v2125_v61 = vor.u32 %v2124_v58, %v2123_v51  ;;  %v2128_v32 = vor.u32 %v2127_v4, %v2126_v25  ;;  %v2131_v59 = vor.u32 %v2130_v41, %v2129_v62 }
 0x219   : > { %v1985_v21 = vsel %vm1902_vm9, %v1984_v63, %v1983_v49  ;;  %v2134_v2 = vor.u32 %v2133_v12, %v2132_v1  ;;  %v2135_v35 = vshll.u32 %v7821_v9, %v2120_v45  ;;  %v2136_v27 = vshrl.u32 %v7822_v16, %v2121_v24 }
 0x21a   : > { %v1988_v44 = vsel %vm5947_vm15, %v5718_v56, %v1985_v21  ;;  %v4186_v53 = vmin.u32 %v1863_v19, %v5969_v29  ;;  %v2122_v38 = vshrl.u32 %v7827_v34, %v2121_v24  ;;  %vm2138_vm3 = vcmp.lt.s32.totalorder %v5971_v8, 1 }
 0x21b   : > { %4464 = vcosq.f32 %v1988_v44  ;;  %v2137_v11 = vor.u32 %v2136_v27, %v2135_v35  ;;  %vm2139_vm4 = vcmp.lt.s32.totalorder %v5971_v8, 2  ;;  %vm2140_vm5 = vcmp.lt.s32.totalorder %v5971_v8, 3 }
 0x21c   : > { %4466 = vsinq.f32 %v1988_v44  ;;  %v1865_v7 = vclz %v4186_v53  ;;  %vm2141_vm7 = vcmp.lt.s32.totalorder %v5971_v8, 4  ;;  %v2146_v28 = vsel %vm2138_vm3, %v2125_v61, %v2128_v32 }
 0x21d   : > { %v2143_v0 = vsel %vm2141_vm7, %v2131_v59, 2102212464  ;;  %v2147_v5 = vsel %vm2141_vm7, %v2134_v2, 920167782  ;;  %vm1799_vm6 = vcmp.lt.s32.totalorder %v5747_v15, 0  ;;  %v2142_v26 = vsel %vm2138_vm3, %v2122_v38, %v2125_v61 }
 0x21e   : > { %v4187_v30 = vadd.s32 4294967294, %v1865_v7  ;;  %v2148_v47 = vsel %vm2140_vm5, %v2131_v59, %v2147_v5  ;;  %v2150_v50 = vsel %vm2138_vm3, %v2128_v32, %v2131_v59  ;;  %v2151_v45 = vsel %vm2141_vm7, %v2137_v11, 1326507024 }
 0x21f   : > { %vm311_vm8 = vcmp.eq.s32.totalorder %v4674_v6, %v4699_v20  ;;  %vm1995_vm9 = vcmp.eq.s32.totalorder %v5961_v55, 0  ;;  %v2144_v36 = vsel %vm2140_vm5, %v2128_v32, %v2143_v0  ;;  %v2149_v3 = vsel %vm2139_vm4, %v2146_v28, %v2148_v47 }
 0x220   : > { %vm4188_vm10 = vcmp.lt.s32.totalorder %v4187_v30, 0  ;;  %v2152_v46 = vsel %vm2140_vm5, %v2134_v2, %v2151_v45  ;;  %vm1994_vm11 = vcmp.lt.s32.totalorder %v5961_v55, 2  ;;  %vm1992_vm12 = vweird.f32 %v5718_v56 }
 0x221   : > { %v1868_v14 = vsel %vm4188_vm10, 0, %v4187_v30  ;;  %v2153_v24 = vsel %vm2139_vm4, %v2150_v50, %v2152_v46  ;;  %v6014_v49 = vmul.u32.u64.low %v5974_v10, %v2149_v3  ;;  %v6015_v58 = vmul.u32.u64.high %v5974_v10, %v2149_v3, %v6014_v49 }
 0x222   : > { %v1853_v63 = vadd.s32 %v5908_v40, %v5915_v18  ;;  %v1869_v51 = vsub.s32 32, %v1868_v14  ;;  %v1873_v4 = vsub.s32 4294967266, %v1868_v14  ;;  %v2003_v41 = vand.u32 2147483647, %v5964_v22 }
 0x223   : > { %v1883_v19 = vsub.s32 4, %v5958_v33  ;;  %v6024_v25 = vmul.u32.u64.low %v5974_v10, %v2153_v24  ;;  %v6025_v62 = vmul.u32.u64.high %v5974_v10, %v2153_v24, %v6024_v25  ;;  %v2007_v12 = vshrl.u32 %v2006_v48, 23 }
 0x224   : > { %v1870_v21 = vshll.u32 %v5969_v29, %v1868_v14  ;;  %v1871_v61 = vshrl.u32 %v1853_v63, %v1869_v51  ;;  %v1874_v1 = vadd.s32 127, %v1873_v4  ;;  %v2145_v44 = vsel %vm2139_vm4, %v2142_v26, %v2144_v36 }
 0x225   : > { %v4465_v53 = vpop.eup %4464  ;;  %vm1998_vm13 = vcmp.eq.s32.totalorder %v5961_v55, 2  ;;  %v2164_v40 = vadd.s32 1, %v6015_v58  ;;  %v4193_v18 = vadd.s32 4294967169, %v2007_v12  ;;  %v6034_v32 = vadd.f32 %v5967_v52, %v4729_v39 }
 0x226   : > { %v4467_v59 = vpop.eup %4466  ;;  %v1999_v2 = vxor.u32 2147483648, %v4465_v53  ;;  %v1872_v48 = vor.u32 %v1871_v61, %v1870_v21  ;;  %v1875_v35 = vshll.u32 %v1874_v1, 23  ;;  %v2010_v29 = vand.u32 8388607, %v2003_v41 }
 0x227   : > { %v1996_v27 = vxor.u32 2147483648, %v4467_v59  ;;  %v2161_v8 = vmul.u32 %v5974_v10, %v2145_v44  ;;  %vm2163_vm14 = vc.u32 %v6025_v62, %v6014_v49  ;;  %v2013_v7 = vadd.s32 1, %v4193_v18 }
 0x228   : > { %v2000_v38 = vsel %vm1998_vm13, %v1999_v2, %v4467_v59  ;;  %v1876_v11 = vor.u32 4788187, %v1875_v35  ;;  %v1884_v52 = vsel %vm1799_vm6, %v1883_v19, %v5958_v33  ;;  %v2165_v30 = vsel %vm2163_vm14, %v2164_v40, %v6015_v58 }
 0x229   : > { %v1997_v0 = vsel %vm1995_vm9, %v4465_v53, %v1996_v27  ;;  %v2166_v28 = vadd.s32 %v2165_v30, %v2161_v8  ;;  %vm2014_vm15 = vcmp.gt.s32.totalorder %v2013_v7, 0  ;;  %v2315_v10 = vand.u32 2139095040, %v6034_v32 }
 0x22a   : > { %v2001_v5 = vsel %vm1994_vm11, %v1997_v0, %v2000_v38  ;;  %v1877_v26 = vand.u32 2147483647, %v1876_v11  ;;  %v1879_v47 = vcvt.s32.f32 %v1872_v48  ;;  %v2015_v50 = vsel %vm2014_vm15, %v2013_v7, 0 }
 0x22b   : > { %v4119_v33 = vsel %vm311_vm8, 1.0, %v7835_v31  ;;  %v2002_v45 = vsel %vm1992_vm12, nan, %v2001_v5  ;;  %v2167_v36 = vadd.s32 536870912, %v2166_v28  ;;  %v2017_v3 = vand.u32 31, %v2015_v50 }
 0x22c   : > { %v3975_v46 = vsel %vm3960_vm0, %v4119_v33, %v2002_v45  ;;  %vm6060_vm1 = vcmp.le.f32.partialorder %v1797_v43, 0.7853982  ;;  %v1880_v14 = vmul.f32 %v1879_v47, %v1877_v26  ;;  %vm310_vm3 = vcmp.eq.s32.totalorder %v4674_v6, %v4693_v17 }
 0x22d   : > { %4008 = vst.msk [vmem:[%s5024_s21 + $0x60] sm:$0xff] %vm3995_vm2, %v3975_v46  ;;  %v1886_v20 = vsel %vm6060_vm1, 0, %v1884_v52  ;;  %v6070_v56 = vshrl.u32 %v2167_v36, 30  ;;  %v2018_v24 = vsub.s32 32, %v2017_v3  ;;  %v2011_v63 = vor.u32 8388608, %v2010_v29 }
 0x22e   : > { %v1881_v58 = vxor.u32 2147483648, %v1880_v14  ;;  %v6072_v51 = vshrl.u32 %v2015_v50, 5  ;;  %v2316_v43 = vshrl.u32 %v2315_v10, 23  ;;  %v2020_v19 = vshll.u32 %v7827_v34, %v2017_v3 }
 0x22f   : > { %v2169_v4 = vshll.u32 %v6070_v56, 30  ;;  %v2021_v25 = vshrl.u32 %v7818_v13, %v2018_v24  ;;  %v2023_v12 = vshll.u32 %v7818_v13, %v2017_v3  ;;  %v2024_v61 = vshrl.u32 %v7819_v57, %v2018_v24 }
 0x230   : > { %v1882_v21 = vsel %vm1799_vm6, %v1881_v58, %v1880_v14  ;;  %v2027_v1 = vshrl.u32 %v7820_v60, %v2018_v24  ;;  %v2030_v44 = vshrl.u32 %v7821_v9, %v2018_v24  ;;  %v2026_v18 = vshll.u32 %v7819_v57, %v2017_v3 }
 0x231   : > { %v1885_v53 = vsel %vm6060_vm1, %v5747_v15, %v1882_v21  ;;  %v6086_v40 = vsub.s32 %v2166_v28, %v2169_v4  ;;  %v2029_v59 = vshll.u32 %v7820_v60, %v2017_v3  ;;  %v6090_v2 = vand.u32 3, %v1886_v20 }
 0x232   : > { %4468 = vcosq.f32 %v1885_v53  ;;  %v2022_v48 = vor.u32 %v2021_v25, %v2020_v19  ;;  %v2025_v35 = vor.u32 %v2024_v61, %v2023_v12  ;;  %v2028_v27 = vor.u32 %v2027_v1, %v2026_v18 }
 0x233   : > { %4470 = vsinq.f32 %v1885_v53  ;;  %v2172_v29 = vsub.s32 0, %v6086_v40  ;;  %v2031_v8 = vor.u32 %v2030_v44, %v2029_v59  ;;  %v6097_v7 = vsel %vm310_vm3, 1.0, %v7835_v31 }
 0x234   : > { %v2032_v38 = vshll.u32 %v7821_v9, %v2017_v3  ;;  %v2033_v11 = vshrl.u32 %v7822_v16, %v2018_v24  ;;  %v4205_v52 = vadd.s32 4294967169, %v2316_v43  ;;  %v2019_v0 = vshrl.u32 %v7827_v34, %v2018_v24 }
 0x235   : > { %v4198_v30 = vmin.u32 %v2172_v29, %v6086_v40  ;;  %vm2035_vm4 = vcmp.lt.s32.totalorder %v6072_v51, 1  ;;  %v2051_v28 = vshll.u32 %v2011_v63, 8  ;;  %vm1895_vm5 = vcmp.eq.s32.totalorder %v6090_v2, 2 }
 0x236   : > { %v2034_v10 = vor.u32 %v2033_v11, %v2032_v38  ;;  %vm2037_vm7 = vcmp.lt.s32.totalorder %v6072_v51, 3  ;;  %vm2038_vm6 = vcmp.lt.s32.totalorder %v6072_v51, 4  ;;  %v2043_v17 = vsel %vm2035_vm4, %v2022_v48, %v2025_v35 }
 0x237   : > { %vm1892_vm8 = vcmp.eq.s32.totalorder %v6090_v2, 0  ;;  %v2174_v5 = vclz %v4198_v30  ;;  %v2040_v26 = vsel %vm2038_vm6, %v2028_v27, 2102212464  ;;  %v2044_v47 = vsel %vm2038_vm6, %v2031_v8, 920167782 }
 0x238   : > { %v2047_v50 = vsel %vm2035_vm4, %v2025_v35, %v2028_v27  ;;  %vm1891_vm9 = vcmp.lt.s32.totalorder %v6090_v2, 2  ;;  %vm2036_vm10 = vcmp.lt.s32.totalorder %v6072_v51, 2  ;;  %v2045_v33 = vsel %vm2037_vm7, %v2028_v27, %v2044_v47 }
 0x239   : > { %v2048_v45 = vsel %vm2038_vm6, %v2034_v10, 1326507024  ;;  %v2322_v36 = vadd.s32 1, %v4205_v52  ;;  %vm1889_vm11 = vweird.f32 %v5747_v15  ;;  %vm2108_vm12 = vcmp.lt.s32.totalorder %v5892_v42, 0 }
 0x23a   : > { %v4199_v3 = vadd.s32 4294967294, %v2174_v5  ;;  %v2039_v46 = vsel %vm2035_vm4, %v2019_v0, %v2022_v48  ;;  %v2046_v55 = vsel %vm2036_vm10, %v2043_v17, %v2045_v33  ;;  %v2049_v14 = vsel %vm2037_vm7, %v2031_v8, %v2048_v45 }
 0x23b   : > { %v2041_v20 = vsel %vm2037_vm7, %v2025_v35, %v2040_v26  ;;  %v2050_v24 = vsel %vm2036_vm10, %v2047_v50, %v2049_v14  ;;  %v6128_v58 = vmul.u32.u64.low %v2051_v28, %v2046_v55  ;;  %v6129_v63 = vmul.u32.u64.high %v2051_v28, %v2046_v55, %v6128_v58 }
 0x23c   : > { %vm4200_vm13 = vcmp.lt.s32.totalorder %v4199_v3, 0  ;;  %v6132_v43 = vmul.u32.u64.low %v2051_v28, %v2050_v24  ;;  %v6133_v4 = vmul.u32.u64.high %v2051_v28, %v2050_v24, %v6132_v43  ;;  %vm2323_vm14 = vcmp.gt.s32.totalorder %v2322_v36, 0  ;;  %v4469_v19 = vpop.eup %4468 }
 0x23d   : > { %v2162_v25 = vadd.s32 %v6014_v49, %v6025_v62  ;;  %v2177_v12 = vsel %vm4200_vm13, 0, %v4199_v3  ;;  %v2312_v21 = vand.u32 2147483647, %v6034_v32  ;;  %v2324_v61 = vsel %vm2323_vm14, %v2322_v36, 0  ;;  %v4471_v1 = vpop.eup %4470  ;;  %v518_v43 = vpop.permute.xlu0 %517 }
 0x23e   : > { %v1896_v44 = vxor.u32 2147483648, %v4469_v19  ;;  %v2178_v53 = vsub.s32 32, %v2177_v12  ;;  %v2182_v18 = vsub.s32 4294967266, %v2177_v12  ;;  %v2042_v59 = vsel %vm2036_vm10, %v2039_v46, %v2041_v20 }
 0x23f   : > { %v1893_v48 = vxor.u32 2147483648, %v4471_v1  ;;  %vm6142_vm15 = vcmp.le.f32.partialorder %v2106_v54, 0.7853982  ;;  %v2192_v49 = vsub.s32 4, %v6070_v56  ;;  %v2061_v62 = vadd.s32 1, %v6129_v63 }
 0x240   : > { %v2326_v29 = vand.u32 31, %v2324_v61  ;;  %v1897_v27 = vsel %vm1895_vm5, %v1896_v44, %v4471_v1  ;;  %v2179_v8 = vshll.u32 %v6086_v40, %v2177_v12  ;;  %v2180_v38 = vshrl.u32 %v2162_v25, %v2178_v53 }
 0x241   : > { %v2183_v51 = vadd.s32 127, %v2182_v18  ;;  %v1894_v11 = vsel %vm1892_vm8, %v4469_v19, %v1893_v48  ;;  %v2058_v54 = vmul.u32 %v2051_v28, %v2042_v59  ;;  %vm2060_vm1 = vc.u32 %v6133_v4, %v6128_v58 }
 0x242   : > { %v2327_v52 = vsub.s32 32, %v2326_v29  ;;  %v1898_v30 = vsel %vm1891_vm9, %v1894_v11, %v1897_v27  ;;  %v2181_v0 = vor.u32 %v2180_v38, %v2179_v8  ;;  %v2062_v17 = vsel %vm2060_vm1, %v2061_v62, %v6129_v63 }
 0x243   : > { %v2184_v10 = vshll.u32 %v2183_v51, 23  ;;  %v1899_v40 = vsel %vm1889_vm11, nan, %v1898_v30  ;;  %v2193_v5 = vsel %vm2108_vm12, %v2192_v49, %v6070_v56  ;;  %v2063_v26 = vadd.s32 %v2062_v17, %v2058_v54 }
 0x244   : > { %v2319_v28 = vand.u32 8388607, %v2312_v21  ;;  %v3974_v2 = vsel %vm3960_vm0, %v6097_v7, %v1899_v40  ;;  %v6168_v50 = vshrl.u32 %v2324_v61, 5  ;;  %v2329_v33 = vshll.u32 %v7827_v34, %v2326_v29 }
 0x245   : > { %v2185_v47 = vor.u32 4788187, %v2184_v10  ;;  %4007 = vst.msk [vmem:[%s5024_s21 + $0x58] sm:$0xff] %vm3995_vm2, %v3974_v2  ;;  %v2188_v15 = vcvt.s32.f32 %v2181_v0  ;;  %v2064_v45 = vadd.s32 536870912, %v2063_v26  ;;  %v2330_v36 = vshrl.u32 %v7818_v13, %v2327_v52 }
 0x246   : > { %v2333_v56 = vshrl.u32 %v7819_v57, %v2327_v52  ;;  %v2336_v46 = vshrl.u32 %v7820_v60, %v2327_v52  ;;  %v2338_v55 = vshll.u32 %v7820_v60, %v2326_v29  ;;  %v2339_v7 = vshrl.u32 %v7821_v9, %v2327_v52 }
 0x247   : > { %v2186_v3 = vand.u32 2147483647, %v2185_v47  ;;  %v6178_v14 = vshrl.u32 %v2064_v45, 30  ;;  %v2332_v20 = vshll.u32 %v7818_v13, %v2326_v29  ;;  %v2335_v24 = vshll.u32 %v7819_v57, %v2326_v29 }
 0x248   : > { %v2342_v63 = vshrl.u32 %v7822_v16, %v2327_v52  ;;  %vm313_vm3 = vcmp.eq.s32.totalorder %v4674_v6, %v4703_v23  ;;  %v2195_v25 = vsel %vm6142_vm15, 0, %v2193_v5  ;;  %v2340_v12 = vor.u32 %v2339_v7, %v2338_v55 }
 0x249   : > { %v2189_v19 = vmul.f32 %v2188_v15, %v2186_v3  ;;  %v2341_v61 = vshll.u32 %v7821_v9, %v2326_v29  ;;  %v2066_v1 = vshll.u32 %v6178_v14, 30  ;;  %v2331_v44 = vor.u32 %v2330_v36, %v2329_v33  ;;  %v533_v36 = vpop.permute.xlu1 %532 }
 0x24a   : > { %v2334_v53 = vor.u32 %v2333_v56, %v2332_v20  ;;  %v2337_v18 = vor.u32 %v2336_v46, %v2335_v24  ;;  %v2320_v48 = vor.u32 8388608, %v2319_v28  ;;  %v615_v62 = vmul.f32 %v4725_v37, %v518_v43 }
 0x24b   : > { %v2190_v59 = vxor.u32 2147483648, %v2189_v19  ;;  %v2343_v49 = vor.u32 %v2342_v63, %v2341_v61  ;;  %v6190_v27 = vand.u32 3, %v2195_v25  ;;  %v6192_v8 = vsub.s32 %v2063_v26, %v2066_v1 }
 0x24c   : > { %v2328_v38 = vshrl.u32 %v7827_v34, %v2327_v52  ;;  %vm2347_vm4 = vcmp.lt.s32.totalorder %v6168_v50, 4  ;;  %vm2344_vm5 = vcmp.lt.s32.totalorder %v6168_v50, 1  ;;  %vm2346_vm7 = vcmp.lt.s32.totalorder %v6168_v50, 3 }
 0x24d   : > { %v2191_v29 = vsel %vm2108_vm12, %v2190_v59, %v2189_v19  ;;  %v2353_v51 = vsel %vm2347_vm4, %v2340_v12, 920167782  ;;  %v2069_v54 = vsub.s32 0, %v6192_v8  ;;  %v2349_v30 = vsel %vm2347_vm4, %v2337_v18, 2102212464 }
 0x24e   : > { %v2194_v11 = vsel %vm6142_vm15, %v5892_v42, %v2191_v29  ;;  %v2352_v0 = vsel %vm2344_vm5, %v2331_v44, %v2334_v53  ;;  %v2354_v52 = vsel %vm2346_vm7, %v2337_v18, %v2353_v51  ;;  %v2356_v10 = vsel %vm2344_vm5, %v2334_v53, %v2337_v18 }
 0x24f   : > { %4472 = vcosq.f32 %v2194_v11  ;;  %v2357_v17 = vsel %vm2347_vm4, %v2343_v49, 1326507024  ;;  %v4194_v40 = vmin.u32 %v2069_v54, %v6192_v8  ;;  %vm2345_vm6 = vcmp.lt.s32.totalorder %v6168_v50, 2 }
 0x250   : > { %4474 = vsinq.f32 %v2194_v11  ;;  %v2360_v5 = vshll.u32 %v2320_v48, 8  ;;  %v2348_v26 = vsel %vm2344_vm5, %v2328_v38, %v2331_v44  ;;  %v2350_v35 = vsel %vm2346_vm7, %v2334_v53, %v2349_v30 }
 0x251   : > { %v2355_v28 = vsel %vm2345_vm6, %v2352_v0, %v2354_v52  ;;  %v2358_v2 = vsel %vm2346_vm7, %v2340_v12, %v2357_v17  ;;  %v2071_v47 = vclz %v4194_v40  ;;  %v6220_v46 = vadd.f32 %v615_v62, %v4729_v39 }
 0x252   : > { %v2359_v33 = vsel %vm2345_vm6, %v2356_v10, %v2358_v2  ;;  %v6212_v15 = vmul.u32.u64.low %v2360_v5, %v2355_v28  ;;  %v6213_v45 = vmul.u32.u64.high %v2360_v5, %v2355_v28, %v6212_v15  ;;  %v4121_v55 = vsel %vm313_vm3, 1.0, %v7835_v31 }
 0x253   : > { %v6216_v56 = vmul.u32.u64.low %v2360_v5, %v2359_v33  ;;  %v6217_v3 = vmul.u32.u64.high %v2360_v5, %v2359_v33, %v6216_v56  ;;  %v4195_v50 = vadd.s32 4294967294, %v2071_v47  ;;  %v2089_v7 = vsub.s32 4, %v6178_v14 }
 0x254   : > { %v2351_v20 = vsel %vm2345_vm6, %v2348_v26, %v2350_v35  ;;  %vm6229_vm8 = vcmp.le.f32.partialorder %v2003_v41, 0.7853982  ;;  %vm2005_vm9 = vcmp.lt.s32.totalorder %v5964_v22, 0  ;;  %v2212_v63 = vand.u32 2139095040, %v6220_v46 }
 0x255   : > { %v618_v43 = vmul.f32 %v4725_v37, %v533_v36  ;;  %vm2198_vm10 = vweird.f32 %v5892_v42  ;;  %vm2200_vm11 = vcmp.lt.s32.totalorder %v6190_v27, 2  ;;  %vm4196_vm12 = vcmp.lt.s32.totalorder %v4195_v50, 0 }
 0x256   : > { %v2370_v23 = vadd.s32 1, %v6213_v45  ;;  %v2209_v19 = vand.u32 2147483647, %v6220_v46  ;;  %v2059_v41 = vadd.s32 %v6128_v58, %v6133_v4  ;;  %v2074_v25 = vsel %vm4196_vm12, 0, %v4195_v50 }
 0x257   : > { %v2367_v12 = vmul.u32 %v2360_v5, %v2351_v20  ;;  %vm2369_vm13 = vc.u32 %v6217_v3, %v6212_v15  ;;  %v2075_v61 = vsub.s32 32, %v2074_v25  ;;  %v2079_v1 = vsub.s32 4294967266, %v2074_v25 }
 0x258   : > { %v2090_v44 = vsel %vm2005_vm9, %v2089_v7, %v6178_v14  ;;  %v2371_v53 = vsel %vm2369_vm13, %v2370_v23, %v6213_v45  ;;  %v2076_v59 = vshll.u32 %v6192_v8, %v2074_v25  ;;  %v2213_v49 = vshrl.u32 %v2212_v63, 23 }
 0x259   : > { %v4473_v18 = vpop.eup %4472  ;;  %v2372_v48 = vadd.s32 %v2371_v53, %v2367_v12  ;;  %v6250_v58 = vadd.f32 %v618_v43, %v4729_v39  ;;  %v2077_v38 = vshrl.u32 %v2059_v41, %v2075_v61  ;;  %v2080_v29 = vadd.s32 127, %v2079_v1 }
 0x25a   : > { %v4475_v4 = vpop.eup %4474  ;;  %v2205_v62 = vxor.u32 2147483648, %v4473_v18  ;;  %v2216_v51 = vand.u32 8388607, %v2209_v19  ;;  %vm2204_vm14 = vcmp.eq.s32.totalorder %v6190_v27, 2  ;;  %v4201_v54 = vadd.s32 4294967169, %v2213_v49 }
 0x25b   : > { %v2202_v11 = vxor.u32 2147483648, %v4475_v4  ;;  %v2373_v14 = vadd.s32 536870912, %v2372_v48  ;;  %vm2201_vm15 = vcmp.eq.s32.totalorder %v6190_v27, 0  ;;  %v2078_v30 = vor.u32 %v2077_v38, %v2076_v59 }
 0x25c   : > { %v2206_v8 = vsel %vm2204_vm14, %v2205_v62, %v4475_v4  ;;  %v2081_v0 = vshll.u32 %v2080_v29, 23  ;;  %v2092_v10 = vsel %vm6229_vm8, 0, %v2090_v44  ;;  %v2219_v40 = vadd.s32 1, %v4201_v54 }
 0x25d   : > { %v2203_v52 = vsel %vm2201_vm15, %v4473_v18, %v2202_v11  ;;  %v6258_v17 = vshrl.u32 %v2373_v14, 30  ;;  %v2217_v35 = vor.u32 8388608, %v2216_v51  ;;  %v2521_v28 = vand.u32 2139095040, %v6250_v58 }
 0x25e   : > { %v2207_v5 = vsel %vm2200_vm11, %v2203_v52, %v2206_v8  ;;  %v2082_v26 = vor.u32 4788187, %v2081_v0  ;;  %v2085_v47 = vcvt.s32.f32 %v2078_v30  ;;  %vm2220_vm1 = vcmp.gt.s32.totalorder %v2219_v40, 0 }
 0x25f   : > { %v2208_v2 = vsel %vm2198_vm10, nan, %v2207_v5  ;;  %v2375_v33 = vshll.u32 %v6258_v17, 30  ;;  %v2221_v56 = vsel %vm2220_vm1, %v2219_v40, 0  ;;  %v2522_v50 = vshrl.u32 %v2521_v28, 23 }
 0x260   : > { %v3977_v45 = vsel %vm3960_vm0, %v4121_v55, %v2208_v2  ;;  %v2083_v36 = vand.u32 2147483647, %v2082_v26  ;;  %v2223_v7 = vand.u32 31, %v2221_v56  ;;  %v6272_v63 = vand.u32 3, %v2092_v10  ;;  %v7862_v26 = vld [vmem:[#allocation2_spill] sm:$0xff] }
 0x261   : > { %4010 = vst.msk [vmem:[%s5024_s21 + $0x70] sm:$0xff] %vm3995_vm2, %v3977_v45  ;;  %v6270_v27 = vsub.s32 %v2372_v48, %v2375_v33  ;;  %v2368_v42 = vadd.s32 %v6212_v15, %v6217_v3  ;;  %v6277_v41 = vshll.u32 %v2217_v35, 8  ;;  %v2398_v25 = vsub.s32 4, %v6258_v17 }
 0x262   : > { %v2086_v20 = vmul.f32 %v2085_v47, %v2083_v36  ;;  %v2224_v23 = vsub.s32 32, %v2223_v7  ;;  %v2222_v12 = vshrl.u32 %v2221_v56, 5  ;;  %v4213_v61 = vadd.s32 4294967169, %v2522_v50 }
 0x263   : > { %v2378_v43 = vsub.s32 0, %v6270_v27  ;;  %v2226_v44 = vshll.u32 %v7827_v34, %v2223_v7  ;;  %v2229_v53 = vshll.u32 %v7818_v13, %v2223_v7  ;;  %v2232_v18 = vshll.u32 %v7819_v57, %v2223_v7 }
 0x264   : > { %v2087_v55 = vxor.u32 2147483648, %v2086_v20  ;;  %v2227_v3 = vshrl.u32 %v7818_v13, %v2224_v23  ;;  %v2230_v59 = vshrl.u32 %v7819_v57, %v2224_v23  ;;  %v2235_v48 = vshll.u32 %v7820_v60, %v2223_v7 }
 0x265   : > { %v4206_v1 = vmin.u32 %v2378_v43, %v6270_v27  ;;  %v2233_v62 = vshrl.u32 %v7820_v60, %v2224_v23  ;;  %v2236_v38 = vshrl.u32 %v7821_v9, %v2224_v23  ;;  %v2225_v29 = vshrl.u32 %v7827_v34, %v2224_v23 }
 0x266   : > { %v2088_v15 = vsel %vm2005_vm9, %v2087_v55, %v2086_v20  ;;  %v2228_v51 = vor.u32 %v2227_v3, %v2226_v44  ;;  %v2231_v11 = vor.u32 %v2230_v59, %v2229_v53  ;;  %vm2314_vm3 = vcmp.lt.s32.totalorder %v6034_v32, 0  ;;  %v528_v44 = vpop.permute.xlu0 %527 }
 0x267   : > { %v2091_v49 = vsel %vm6229_vm8, %v5964_v22, %v2088_v15  ;;  %v2380_v4 = vclz %v4206_v1  ;;  %v2234_v54 = vor.u32 %v2233_v62, %v2232_v18  ;;  %v2237_v8 = vor.u32 %v2236_v38, %v2235_v48 }
 0x268   : > { %4476 = vcosq.f32 %v2091_v49  ;;  %v2238_v30 = vshll.u32 %v7821_v9, %v2223_v7  ;;  %v2239_v24 = vshrl.u32 %v7822_v16, %v2224_v23  ;;  %vm2241_vm4 = vcmp.lt.s32.totalorder %v2222_v12, 1 }
 0x269   : > { %4478 = vsinq.f32 %v2091_v49  ;;  %v4207_v14 = vadd.s32 4294967294, %v2380_v4  ;;  %vm2242_vm5 = vcmp.lt.s32.totalorder %v2222_v12, 2  ;;  %vm2243_vm6 = vcmp.lt.s32.totalorder %v2222_v12, 3 }
 0x26a   : > { %vm2244_vm8 = vcmp.lt.s32.totalorder %v2222_v12, 4  ;;  %v2249_v0 = vsel %vm2241_vm4, %v2228_v51, %v2231_v11  ;;  %v2240_v10 = vor.u32 %v2239_v24, %v2238_v30  ;;  %vm312_vm9 = vcmp.eq.s32.totalorder %v4674_v6, %v7862_v26 }
 0x26b   : > { %vm4208_vm7 = vcmp.lt.s32.totalorder %v4207_v14, 0  ;;  %v2246_v40 = vsel %vm2244_vm8, %v2234_v54, 2102212464  ;;  %v2250_v5 = vsel %vm2244_vm8, %v2237_v8, 920167782  ;;  %v2245_v2 = vsel %vm2241_vm4, %v2225_v29, %v2228_v51 }
 0x26c   : > { %v2383_v52 = vsel %vm4208_vm7, 0, %v4207_v14  ;;  %v2247_v47 = vsel %vm2243_vm6, %v2231_v11, %v2246_v40  ;;  %vm2097_vm10 = vcmp.lt.s32.totalorder %v6272_v63, 2  ;;  %vm6308_vm11 = vcmp.le.f32.partialorder %v2312_v21, 0.7853982  ;;  %v7865_v40 = vld [vmem:[#allocation5_spill] sm:$0xff] }
 0x26d   : > { %v2384_v35 = vsub.s32 32, %v2383_v52  ;;  %v2388_v28 = vsub.s32 4294967266, %v2383_v52  ;;  %v2385_v45 = vshll.u32 %v6270_v27, %v2383_v52  ;;  %v2251_v36 = vsel %vm2243_vm6, %v2234_v54, %v2250_v5 }
 0x26e   : > { %v2253_v56 = vsel %vm2241_vm4, %v2231_v11, %v2234_v54  ;;  %v2254_v50 = vsel %vm2244_vm8, %v2240_v10, 1326507024  ;;  %vm2095_vm12 = vweird.f32 %v5964_v22  ;;  %v2252_v43 = vsel %vm2242_vm5, %v2249_v0, %v2251_v36 }
 0x26f   : > { %v2386_v7 = vshrl.u32 %v2368_v42, %v2384_v35  ;;  %v2389_v20 = vadd.s32 127, %v2388_v28  ;;  %v2255_v23 = vsel %vm2243_vm6, %v2237_v8, %v2254_v50  ;;  %v2248_v21 = vsel %vm2242_vm5, %v2245_v2, %v2247_v47 }
 0x270   : > { %v2256_v55 = vsel %vm2242_vm5, %v2253_v56, %v2255_v23  ;;  %v6322_v27 = vmul.u32.u64.low %v6277_v41, %v2252_v43  ;;  %v6323_v1 = vmul.u32.u64.high %v6277_v41, %v2252_v43, %v6322_v27  ;;  %vm2098_vm13 = vcmp.eq.s32.totalorder %v6272_v63, 0 }
 0x271   : > { %v2387_v53 = vor.u32 %v2386_v7, %v2385_v45  ;;  %v2390_v18 = vshll.u32 %v2389_v20, 23  ;;  %v6327_v15 = vmul.u32.u64.low %v6277_v41, %v2256_v55  ;;  %v6328_v42 = vmul.u32.u64.high %v6277_v41, %v2256_v55, %v6327_v15 }
 0x272   : > { %v4477_v3 = vpop.eup %4476  ;;  %vm2101_vm14 = vcmp.eq.s32.totalorder %v6272_v63, 2  ;;  %v2518_v12 = vand.u32 2147483647, %v6250_v58  ;;  %v2528_v59 = vadd.s32 1, %v4213_v61  ;;  %v2399_v62 = vsel %vm2314_vm3, %v2398_v25, %v6258_v17 }
 0x273   : > { %v4479_v48 = vpop.eup %4478  ;;  %v2102_v49 = vxor.u32 2147483648, %v4477_v3  ;;  %v2391_v4 = vor.u32 4788187, %v2390_v18  ;;  %v617_v38 = vmul.f32 %v4725_v37, %v528_v44  ;;  %v2264_v51 = vmul.u32 %v6277_v41, %v2248_v21 }
 0x274   : > { %v2099_v29 = vxor.u32 2147483648, %v4479_v48  ;;  %v2267_v11 = vadd.s32 1, %v6323_v1  ;;  %vm2529_vm15 = vcmp.gt.s32.totalorder %v2528_v59, 0  ;;  %v2394_v61 = vcvt.s32.f32 %v2387_v53 }
 0x275   : > { %v2103_v14 = vsel %vm2101_vm14, %v2102_v49, %v4479_v48  ;;  %v2392_v54 = vand.u32 2147483647, %v2391_v4  ;;  %vm2266_vm1 = vc.u32 %v6328_v42, %v6322_v27  ;;  %v2525_v25 = vand.u32 8388607, %v2518_v12 }
 0x276   : > { %v2100_v8 = vsel %vm2098_vm13, %v4477_v3, %v2099_v29  ;;  %v2268_v17 = vsel %vm2266_vm1, %v2267_v11, %v6323_v1  ;;  %v2530_v30 = vsel %vm2529_vm15, %v2528_v59, 0  ;;  %v2401_v0 = vsel %vm6308_vm11, 0, %v2399_v62 }
 0x277   : > { %v2104_v41 = vsel %vm2097_vm10, %v2100_v8, %v2103_v14  ;;  %v2395_v24 = vmul.f32 %v2394_v61, %v2392_v54  ;;  %v2269_v52 = vadd.s32 %v2268_v17, %v2264_v51  ;;  %v4120_v10 = vsel %vm312_vm9, 1.0, %v7835_v31 }
 0x278   : > { %vm315_vm4 = vcmp.eq.s32.totalorder %v4674_v6, %v7865_v40  ;;  %v2105_v5 = vsel %vm2095_vm12, nan, %v2104_v41  ;;  %v2532_v35 = vand.u32 31, %v2530_v30  ;;  %v6363_v47 = vadd.f32 %v617_v38, %v4729_v39 }
 0x279   : > { %v3976_v63 = vsel %vm3960_vm0, %v4120_v10, %v2105_v5  ;;  %v2396_v28 = vxor.u32 2147483648, %v2395_v24  ;;  %v2270_v2 = vadd.s32 536870912, %v2269_v52  ;;  %v6367_v45 = vand.u32 3, %v2401_v0 }
 0x27a   : > { %4009 = vst.msk [vmem:[%s5024_s21 + $0x68] sm:$0xff] %vm3995_vm2, %v3976_v63  ;;  %v2526_v26 = vor.u32 8388608, %v2525_v25  ;;  %v2531_v36 = vshrl.u32 %v2530_v30, 5  ;;  %v2533_v56 = vsub.s32 32, %v2532_v35  ;;  %v2535_v7 = vshll.u32 %v7827_v34, %v2532_v35 }
 0x27b   : > { %v2397_v22 = vsel %vm2314_vm3, %v2396_v28, %v2395_v24  ;;  %v6371_v50 = vshrl.u32 %v2270_v2, 30  ;;  %v2538_v20 = vshll.u32 %v7818_v13, %v2532_v35  ;;  %v2541_v55 = vshll.u32 %v7819_v57, %v2532_v35 }
 0x27c   : > { %v2400_v43 = vsel %vm6308_vm11, %v6034_v32, %v2397_v22  ;;  %v2536_v23 = vshrl.u32 %v7818_v13, %v2533_v56  ;;  %v2539_v21 = vshrl.u32 %v7819_v57, %v2533_v56  ;;  %v2542_v44 = vshrl.u32 %v7820_v60, %v2533_v56 }
 0x27d   : > { %4480 = vcosq.f32 %v2400_v43  ;;  %v2272_v1 = vshll.u32 %v6371_v50, 30  ;;  %v2544_v53 = vshll.u32 %v7820_v60, %v2532_v35  ;;  %v2545_v3 = vshrl.u32 %v7821_v9, %v2533_v56 }
 0x27e   : > { %4482 = vsinq.f32 %v2400_v43  ;;  %v2537_v18 = vor.u32 %v2536_v23, %v2535_v7  ;;  %v2540_v15 = vor.u32 %v2539_v21, %v2538_v20  ;;  %v2543_v59 = vor.u32 %v2542_v44, %v2541_v55 }
 0x27f   : > { %v6385_v33 = vsub.s32 %v2269_v52, %v2272_v1  ;;  %v2547_v48 = vshll.u32 %v7821_v9, %v2532_v35  ;;  %v2548_v49 = vshrl.u32 %v7822_v16, %v2533_v56  ;;  %v6393_v4 = vsel %vm315_vm4, 1.0, %v7835_v31 }
 0x280   : > { %v2546_v62 = vor.u32 %v2545_v3, %v2544_v53  ;;  %v6395_v38 = vshll.u32 %v2526_v26, 8  ;;  %vm2211_vm3 = vcmp.lt.s32.totalorder %v6220_v46, 0  ;;  %vm2550_vm5 = vcmp.lt.s32.totalorder %v2531_v36, 1  ;;  %v7866_v26 = vld [vmem:[#allocation3_spill] sm:$0xff] }
 0x281   : > { %v2275_v29 = vsub.s32 0, %v6385_v33  ;;  %v2549_v51 = vor.u32 %v2548_v49, %v2547_v48  ;;  %vm2553_vm7 = vcmp.lt.s32.totalorder %v2531_v36, 4  ;;  %vm2407_vm6 = vcmp.eq.s32.totalorder %v6367_v45, 0 }
 0x282   : > { %v2534_v11 = vshrl.u32 %v7827_v34, %v2533_v56  ;;  %v2555_v14 = vsel %vm2553_vm7, %v2543_v59, 2102212464  ;;  %v2558_v54 = vsel %vm2550_vm5, %v2537_v18, %v2540_v15  ;;  %v2559_v61 = vsel %vm2553_vm7, %v2546_v62, 920167782 }
 0x283   : > { %vm2406_vm8 = vcmp.lt.s32.totalorder %v6367_v45, 2  ;;  %v4202_v8 = vmin.u32 %v2275_v29, %v6385_v33  ;;  %vm2551_vm9 = vcmp.lt.s32.totalorder %v2531_v36, 2  ;;  %vm2552_vm10 = vcmp.lt.s32.totalorder %v2531_v36, 3 }
 0x284   : > { %v2418_v17 = vand.u32 2139095040, %v6363_v47  ;;  %vm2404_vm11 = vweird.f32 %v6034_v32  ;;  %v2554_v25 = vsel %vm2550_vm5, %v2534_v11, %v2537_v18  ;;  %v2560_v30 = vsel %vm2552_vm10, %v2543_v59, %v2559_v61 }
 0x285   : > { %v2562_v41 = vsel %vm2550_vm5, %v2540_v15, %v2543_v59  ;;  %v2563_v24 = vsel %vm2553_vm7, %v2549_v51, 1326507024  ;;  %v2277_v0 = vclz %v4202_v8  ;;  %v2556_v52 = vsel %vm2552_vm10, %v2540_v15, %v2555_v14 }
 0x286   : > { %v2561_v10 = vsel %vm2551_vm9, %v2558_v54, %v2560_v30  ;;  %v2564_v40 = vsel %vm2552_vm10, %v2546_v62, %v2563_v24  ;;  %v2295_v5 = vsub.s32 4, %v6371_v50  ;;  %vm314_vm12 = vcmp.eq.s32.totalorder %v4674_v6, %v7866_v26  ;;  %v543_v54 = vpop.permute.xlu1 %542 }
 0x287   : > { %v2565_v35 = vsel %vm2551_vm9, %v2562_v41, %v2564_v40  ;;  %v6409_v63 = vmul.u32.u64.low %v6395_v38, %v2561_v10  ;;  %v6410_v28 = vmul.u32.u64.high %v6395_v38, %v2561_v10, %v6409_v63  ;;  %v4481_v2 = vpop.eup %4480  ;;  %v4203_v56 = vadd.s32 4294967294, %v2277_v0 }
 0x288   : > { %v6416_v22 = vmul.u32.u64.low %v6395_v38, %v2565_v35  ;;  %v6417_v7 = vmul.u32.u64.high %v6395_v38, %v2565_v35, %v6416_v22  ;;  %v2419_v20 = vshrl.u32 %v2418_v17, 23  ;;  %v4483_v43 = vpop.eup %4482  ;;  %vm2410_vm13 = vcmp.eq.s32.totalorder %v6367_v45, 2 }
 0x289   : > { %v2411_v23 = vxor.u32 2147483648, %v4481_v2  ;;  %v2557_v21 = vsel %vm2551_vm9, %v2554_v25, %v2556_v52  ;;  %v2415_v55 = vand.u32 2147483647, %v6363_v47  ;;  %v2408_v1 = vxor.u32 2147483648, %v4483_v43  ;;  %v538_v25 = vpop.permute.xlu0 %537 }
 0x28a   : > { %v2265_v44 = vadd.s32 %v6322_v27, %v6328_v42  ;;  %vm4204_vm14 = vcmp.lt.s32.totalorder %v4203_v56, 0  ;;  %v4209_v53 = vadd.s32 4294967169, %v2419_v20  ;;  %v2296_v3 = vsel %vm2211_vm3, %v2295_v5, %v6371_v50 }
 0x28b   : > { %v2412_v18 = vsel %vm2410_vm13, %v2411_v23, %v4483_v43  ;;  %v2280_v15 = vsel %vm4204_vm14, 0, %v4203_v56  ;;  %v2576_v59 = vadd.s32 1, %v6410_v28  ;;  %v2409_v36 = vsel %vm2407_vm6, %v4481_v2, %v2408_v1 }
 0x28c   : > { %v2281_v48 = vsub.s32 32, %v2280_v15  ;;  %v2285_v49 = vsub.s32 4294967266, %v2280_v15  ;;  %v2573_v62 = vmul.u32 %v6395_v38, %v2557_v21  ;;  %v2413_v27 = vsel %vm2406_vm8, %v2409_v36, %v2412_v18 }
 0x28d   : > { %v2282_v42 = vshll.u32 %v6385_v33, %v2280_v15  ;;  %vm2575_vm15 = vc.u32 %v6417_v7, %v6409_v63  ;;  %v2425_v29 = vadd.s32 1, %v4209_v53  ;;  %v2414_v50 = vsel %vm2404_vm11, nan, %v2413_v27 }
 0x28e   : > { %v2283_v51 = vshrl.u32 %v2265_v44, %v2281_v48  ;;  %v2286_v11 = vadd.s32 127, %v2285_v49  ;;  %v2577_v14 = vsel %vm2575_vm15, %v2576_v59, %v6410_v28  ;;  %v3979_v38 = vsel %vm3960_vm0, %v6393_v4, %v2414_v50 }
 0x28f   : > { %vm6444_vm1 = vcmp.le.f32.partialorder %v2209_v19, 0.7853982  ;;  %v2578_v33 = vadd.s32 %v2577_v14, %v2573_v62  ;;  %vm2426_vm4 = vcmp.gt.s32.totalorder %v2425_v29, 0  ;;  %4012 = vst.msk [vmem:[%s5024_s21 + $0x80] sm:$0xff] %vm3995_vm2, %v3979_v38  ;;  %v2422_v8 = vand.u32 8388607, %v2415_v55 }
 0x290   : > { %v2284_v32 = vor.u32 %v2283_v51, %v2282_v42  ;;  %v2287_v61 = vshll.u32 %v2286_v11, 23  ;;  %v2427_v17 = vsel %vm2426_vm4, %v2425_v29, 0  ;;  %v2298_v4 = vsel %vm6444_vm1, 0, %v2296_v3 }
 0x291   : > { %v2579_v30 = vadd.s32 536870912, %v2578_v33  ;;  %v2429_v41 = vand.u32 31, %v2427_v17  ;;  %v620_v19 = vmul.f32 %v4725_v37, %v543_v54  ;;  %v6459_v0 = vsel %vm314_vm12, 1.0, %v7835_v31 }
 0x292   : > { %v2288_v24 = vor.u32 4788187, %v2287_v61  ;;  %v6464_v40 = vmul.f32 %v4725_v37, %v538_v25  ;;  %v2291_v35 = vcvt.s32.f32 %v2284_v32  ;;  %v6466_v28 = vand.u32 3, %v2298_v4 }
 0x293   : > { %v6461_v52 = vshrl.u32 %v2579_v30, 30  ;;  %v2430_v10 = vsub.s32 32, %v2429_v41  ;;  %v2423_v2 = vor.u32 8388608, %v2422_v8  ;;  %v2432_v22 = vshll.u32 %v7827_v34, %v2429_v41 }
 0x294   : > { %v2289_v5 = vand.u32 2147483647, %v2288_v24  ;;  %v6472_v26 = vadd.f32 %v620_v19, %v4729_v39  ;;  %v2435_v53 = vshll.u32 %v7818_v13, %v2429_v41  ;;  %v2438_v18 = vshll.u32 %v7819_v57, %v2429_v41 }
 0x295   : > { %v2581_v56 = vshll.u32 %v6461_v52, 30  ;;  %v2433_v20 = vshrl.u32 %v7818_v13, %v2430_v10  ;;  %v2436_v23 = vshrl.u32 %v7819_v57, %v2430_v10  ;;  %v2439_v21 = vshrl.u32 %v7820_v60, %v2430_v10 }
 0x296   : > { %v2292_v43 = vmul.f32 %v2291_v35, %v2289_v5  ;;  %v2442_v1 = vshrl.u32 %v7821_v9, %v2430_v10  ;;  %v2445_v15 = vshrl.u32 %v7822_v16, %v2430_v10  ;;  %v2428_v59 = vshrl.u32 %v2427_v17, 5 }
 0x297   : > { %v6477_v44 = vsub.s32 %v2578_v33, %v2581_v56  ;;  %v2441_v36 = vshll.u32 %v7820_v60, %v2429_v41  ;;  %v2444_v48 = vshll.u32 %v7821_v9, %v2429_v41  ;;  %v2434_v62 = vor.u32 %v2433_v20, %v2432_v22 }
 0x298   : > { %v2293_v3 = vxor.u32 2147483648, %v2292_v43  ;;  %v2437_v27 = vor.u32 %v2436_v23, %v2435_v53  ;;  %v2440_v42 = vor.u32 %v2439_v21, %v2438_v18  ;;  %v6487_v11 = vshll.u32 %v2423_v2, 8 }
 0x299   : > { %v2584_v49 = vsub.s32 0, %v6477_v44  ;;  %v2443_v50 = vor.u32 %v2442_v1, %v2441_v36  ;;  %v2446_v51 = vor.u32 %v2445_v15, %v2444_v48  ;;  %v2431_v38 = vshrl.u32 %v7827_v34, %v2430_v10 }
 0x29a   : > { %v2294_v29 = vsel %vm2211_vm3, %v2293_v3, %v2292_v43  ;;  %v2727_v33 = vand.u32 2139095040, %v6472_v26  ;;  %vm2447_vm5 = vcmp.lt.s32.totalorder %v2428_v59, 1  ;;  %vm2448_vm7 = vcmp.lt.s32.totalorder %v2428_v59, 2 }
 0x29b   : > { %v2297_v14 = vsel %vm6444_vm1, %v6220_v46, %v2294_v29  ;;  %v4214_v54 = vmin.u32 %v2584_v49, %v6477_v44  ;;  %vm2450_vm6 = vcmp.lt.s32.totalorder %v2428_v59, 4  ;;  %vm2520_vm3 = vcmp.lt.s32.totalorder %v6250_v58, 0 }
 0x29c   : > { %4484 = vcosq.f32 %v2297_v14  ;;  %v2452_v61 = vsel %vm2450_vm6, %v2440_v42, 2102212464  ;;  %v2455_v8 = vsel %vm2447_vm5, %v2434_v62, %v2437_v27  ;;  %vm2449_vm8 = vcmp.lt.s32.totalorder %v2428_v59, 3 }
 0x29d   : > { %4486 = vsinq.f32 %v2297_v14  ;;  %v2586_v32 = vclz %v4214_v54  ;;  %v2456_v17 = vsel %vm2450_vm6, %v2443_v50, 920167782  ;;  %v2459_v45 = vsel %vm2447_vm5, %v2437_v27, %v2440_v42 }
 0x29e   : > { %v2460_v25 = vsel %vm2450_vm6, %v2446_v51, 1326507024  ;;  %v2451_v30 = vsel %vm2447_vm5, %v2431_v38, %v2434_v62  ;;  %v2457_v41 = vsel %vm2449_vm8, %v2440_v42, %v2456_v17  ;;  %vm6498_vm9 = vcmp.le.f32.partialorder %v2518_v12, 0.7853982 }
 0x29f   : > { %v4215_v4 = vadd.s32 4294967294, %v2586_v32  ;;  %v2461_v19 = vsel %vm2449_vm8, %v2443_v50, %v2460_v25  ;;  %v2453_v10 = vsel %vm2449_vm8, %v2437_v27, %v2452_v61  ;;  %v2458_v5 = vsel %vm2448_vm7, %v2455_v8, %v2457_v41 }
 0x2a0   : > { %v2462_v35 = vsel %vm2448_vm7, %v2459_v45, %v2461_v19  ;;  %v2728_v2 = vshrl.u32 %v2727_v33, 23  ;;  %v2604_v56 = vsub.s32 4, %v6461_v52  ;;  %vm2301_vm11 = vweird.f32 %v6220_v46  ;;  %v7872_v46 = vld [vmem:[#allocation7_spill] sm:$0xff] }
 0x2a1   : > { %vm4216_vm10 = vcmp.lt.s32.totalorder %v4215_v4, 0  ;;  %v6506_v22 = vmul.u32.u64.low %v6487_v11, %v2462_v35  ;;  %v6507_v20 = vmul.u32.u64.high %v6487_v11, %v2462_v35, %v6506_v22  ;;  %v2574_v1 = vadd.s32 %v6409_v63, %v6417_v7 }
 0x2a2   : > { %v2589_v43 = vsel %vm4216_vm10, 0, %v4215_v4  ;;  %v6510_v23 = vmul.u32.u64.low %v6487_v11, %v2458_v5  ;;  %v6511_v12 = vmul.u32.u64.high %v6487_v11, %v2458_v5, %v6510_v23  ;;  %v4221_v21 = vadd.s32 4294967169, %v2728_v2  ;;  %v7871_v2 = vld [vmem:[#allocation4_spill] sm:$0xff] }
 0x2a3   : > { %v2590_v53 = vsub.s32 32, %v2589_v43  ;;  %v2594_v18 = vsub.s32 4294967266, %v2589_v43  ;;  %v2454_v15 = vsel %vm2448_vm7, %v2451_v30, %v2453_v10  ;;  %vm2303_vm12 = vcmp.lt.s32.totalorder %v6466_v28, 2 }
 0x2a4   : > { %vm2304_vm13 = vcmp.eq.s32.totalorder %v6466_v28, 0  ;;  %v2724_v3 = vand.u32 2147483647, %v6472_v26  ;;  %v2734_v36 = vadd.s32 1, %v4221_v21  ;;  %v2591_v48 = vshll.u32 %v6477_v44, %v2589_v43 }
 0x2a5   : > { %v2592_v49 = vshrl.u32 %v2574_v1, %v2590_v53  ;;  %v2595_v62 = vadd.s32 127, %v2594_v18  ;;  %vm2472_vm14 = vc.u32 %v6507_v20, %v6510_v23  ;;  %v2605_v63 = vsel %vm2520_vm3, %v2604_v56, %v6461_v52 }
 0x2a6   : > { %v4485_v27 = vpop.eup %4484  ;;  %v2470_v7 = vmul.u32 %v6487_v11, %v2454_v15  ;;  %v2473_v59 = vadd.s32 1, %v6511_v12  ;;  %vm2735_vm15 = vcmp.gt.s32.totalorder %v2734_v36, 0  ;;  %vm2307_vm1 = vcmp.eq.s32.totalorder %v6466_v28, 2 }
 0x2a7   : > { %v4487_v42 = vpop.eup %4486  ;;  %v2308_v29 = vxor.u32 2147483648, %v4485_v27  ;;  %v2593_v50 = vor.u32 %v2592_v49, %v2591_v48  ;;  %v2596_v51 = vshll.u32 %v2595_v62, 23  ;;  %v2736_v44 = vsel %vm2735_vm15, %v2734_v36, 0 }
 0x2a8   : > { %v2305_v14 = vxor.u32 2147483648, %v4487_v42  ;;  %v2474_v54 = vsel %vm2472_vm14, %v2473_v59, %v6511_v12  ;;  %v2738_v38 = vand.u32 31, %v2736_v44  ;;  %v2607_v52 = vsel %vm6498_vm9, 0, %v2605_v63 }
 0x2a9   : > { %v2309_v33 = vsel %vm2307_vm1, %v2308_v29, %v4487_v42  ;;  %v2597_v32 = vor.u32 4788187, %v2596_v51  ;;  %v2475_v11 = vadd.s32 %v2474_v54, %v2470_v7  ;;  %v2731_v8 = vand.u32 8388607, %v2724_v3 }
 0x2aa   : > { %v2306_v61 = vsel %vm2304_vm13, %v4485_v27, %v2305_v14  ;;  %v2739_v17 = vsub.s32 32, %v2738_v38  ;;  %v6539_v45 = vadd.f32 %v6464_v40, %v4729_v39  ;;  %v2600_v30 = vcvt.s32.f32 %v2593_v50 }
 0x2ab   : > { %v2310_v25 = vsel %vm2303_vm12, %v2306_v61, %v2309_v33  ;;  %v2598_v4 = vand.u32 2147483647, %v2597_v32  ;;  %v2476_v41 = vadd.s32 536870912, %v2475_v11  ;;  %v6545_v10 = vand.u32 3, %v2607_v52 }
 0x2ac   : > { %v2311_v19 = vsel %vm2301_vm11, nan, %v2310_v25  ;;  %v2742_v5 = vshrl.u32 %v7818_v13, %v2739_v17  ;;  %v2745_v35 = vshrl.u32 %v7819_v57, %v2739_v17  ;;  %vm316_vm4 = vcmp.eq.s32.totalorder %v4674_v6, %v7871_v2 }
 0x2ad   : > { %v3978_v40 = vsel %vm3960_vm0, %v6459_v0, %v2311_v19  ;;  %v2601_v28 = vmul.f32 %v2600_v30, %v2598_v4  ;;  %v6554_v56 = vshrl.u32 %v2476_v41, 30  ;;  %v2748_v22 = vshrl.u32 %v7820_v60, %v2739_v17 }
 0x2ae   : > { %vm317_vm5 = vcmp.eq.s32.totalorder %v4674_v6, %v7872_v46  ;;  %4011 = vst.msk [vmem:[%s5024_s21 + $0x78] sm:$0xff] %vm3995_vm2, %v3978_v40  ;;  %v2732_v43 = vor.u32 8388608, %v2731_v8  ;;  %v2737_v12 = vshrl.u32 %v2736_v44, 5  ;;  %v2747_v21 = vshll.u32 %v7819_v57, %v2738_v38 }
 0x2af   : > { %v2751_v1 = vshrl.u32 %v7821_v9, %v2739_v17  ;;  %v2602_v53 = vxor.u32 2147483648, %v2601_v28  ;;  %v2478_v18 = vshll.u32 %v6554_v56, 30  ;;  %v2741_v0 = vshll.u32 %v7827_v34, %v2738_v38 }
 0x2b0   : > { %v2744_v15 = vshll.u32 %v7818_v13, %v2738_v38  ;;  %v2749_v36 = vor.u32 %v2748_v22, %v2747_v21  ;;  %v2750_v48 = vshll.u32 %v7820_v60, %v2738_v38  ;;  %v2753_v49 = vshll.u32 %v7821_v9, %v2738_v38 }
 0x2b1   : > { %v2754_v62 = vshrl.u32 %v7822_v16, %v2739_v17  ;;  %v2603_v27 = vsel %vm2520_vm3, %v2602_v53, %v2601_v28  ;;  %v6571_v63 = vsub.s32 %v2475_v11, %v2478_v18  ;;  %v2743_v7 = vor.u32 %v2742_v5, %v2741_v0 }
 0x2b2   : > { %v2746_v59 = vor.u32 %v2745_v35, %v2744_v15  ;;  %v2606_v42 = vsel %vm6498_vm9, %v6250_v58, %v2603_v27  ;;  %v2752_v29 = vor.u32 %v2751_v1, %v2750_v48  ;;  %v6576_v51 = vshll.u32 %v2732_v43, 8 }
 0x2b3   : > { %v2755_v50 = vor.u32 %v2754_v62, %v2753_v49  ;;  %4488 = vcosq.f32 %v2606_v42  ;;  %v2481_v44 = vsub.s32 0, %v6571_v63  ;;  %vm2759_vm7 = vcmp.lt.s32.totalorder %v2737_v12, 4 }
 0x2b4   : > { %v2624_v14 = vand.u32 2139095040, %v6539_v45  ;;  %4490 = vsinq.f32 %v2606_v42  ;;  %v2740_v54 = vshrl.u32 %v7827_v34, %v2739_v17  ;;  %vm2756_vm6 = vcmp.lt.s32.totalorder %v2737_v12, 1 }
 0x2b5   : > { %v2761_v38 = vsel %vm2759_vm7, %v2749_v36, 2102212464  ;;  %v4210_v33 = vmin.u32 %v2481_v44, %v6571_v63  ;;  %vm2757_vm3 = vcmp.lt.s32.totalorder %v2737_v12, 2  ;;  %vm2758_vm8 = vcmp.lt.s32.totalorder %v2737_v12, 3 }
 0x2b6   : > { %v2764_v24 = vsel %vm2756_vm6, %v2743_v7, %v2746_v59  ;;  %v2760_v32 = vsel %vm2756_vm6, %v2740_v54, %v2743_v7  ;;  %v2765_v52 = vsel %vm2759_vm7, %v2752_v29, 920167782  ;;  %v2768_v11 = vsel %vm2756_vm6, %v2746_v59, %v2749_v36 }
 0x2b7   : > { %v2769_v61 = vsel %vm2759_vm7, %v2755_v50, 1326507024  ;;  %v2483_v8 = vclz %v4210_v33  ;;  %v2762_v25 = vsel %vm2758_vm8, %v2746_v59, %v2761_v38  ;;  %v2766_v4 = vsel %vm2758_vm8, %v2749_v36, %v2765_v52 }
 0x2b8   : > { %v2770_v30 = vsel %vm2758_vm8, %v2752_v29, %v2769_v61  ;;  %v6586_v17 = vsel %vm316_vm4, 1.0, %v7835_v31  ;;  %v2767_v41 = vsel %vm2757_vm3, %v2764_v24, %v2766_v4  ;;  %v2625_v5 = vshrl.u32 %v2624_v14, 23 }
 0x2b9   : > { %v2771_v19 = vsel %vm2757_vm3, %v2768_v11, %v2770_v30  ;;  %v4125_v35 = vsel %vm317_vm5, 1.0, %v7835_v31  ;;  %v4211_v40 = vadd.s32 4294967294, %v2483_v8  ;;  %vm2610_vm9 = vweird.f32 %v6250_v58 }
 0x2ba   : > { %v6595_v28 = vmul.u32.u64.low %v6576_v51, %v2771_v19  ;;  %v6596_v22 = vmul.u32.u64.high %v6576_v51, %v2771_v19, %v6595_v28  ;;  %v2763_v2 = vsel %vm2757_vm3, %v2760_v32, %v2762_v25  ;;  %v4217_v1 = vadd.s32 4294967169, %v2625_v5 }
 0x2bb   : > { %v6601_v43 = vmul.u32.u64.low %v6576_v51, %v2767_v41  ;;  %v6602_v21 = vmul.u32.u64.high %v6576_v51, %v2767_v41, %v6601_v43  ;;  %vm2612_vm10 = vcmp.lt.s32.totalorder %v6545_v10, 2  ;;  %vm2613_vm11 = vcmp.eq.s32.totalorder %v6545_v10, 0 }
 0x2bc   : > { %vm2616_vm12 = vcmp.eq.s32.totalorder %v6545_v10, 2  ;;  %vm4212_vm13 = vcmp.lt.s32.totalorder %v4211_v40, 0  ;;  %v2471_v46 = vadd.s32 %v6510_v23, %v6507_v20  ;;  %v2501_v12 = vsub.s32 4, %v6554_v56 }
 0x2bd   : > { %v2486_v53 = vsel %vm4212_vm13, 0, %v4211_v40  ;;  %v2631_v18 = vadd.s32 1, %v4217_v1  ;;  %v4489_v0 = vpop.eup %4488  ;;  %v2779_v49 = vmul.u32 %v6576_v51, %v2763_v2  ;;  %vm2781_vm14 = vc.u32 %v6596_v22, %v6601_v43 }
 0x2be   : > { %v2487_v15 = vsub.s32 32, %v2486_v53  ;;  %v2488_v36 = vshll.u32 %v6571_v63, %v2486_v53  ;;  %v2491_v48 = vsub.s32 4294967266, %v2486_v53  ;;  %v4491_v62 = vpop.eup %4490  ;;  %v2617_v27 = vxor.u32 2147483648, %v4489_v0 }
 0x2bf   : > { %v2782_v7 = vadd.s32 1, %v6602_v21  ;;  %vm2632_vm15 = vcmp.gt.s32.totalorder %v2631_v18, 0  ;;  %v2614_v20 = vxor.u32 2147483648, %v4491_v62  ;;  %v2621_v50 = vand.u32 2147483647, %v6539_v45 }
 0x2c0   : > { %v2489_v23 = vshrl.u32 %v2471_v46, %v2487_v15  ;;  %v2492_v59 = vadd.s32 127, %v2491_v48  ;;  %v2633_v42 = vsel %vm2632_vm15, %v2631_v18, 0  ;;  %v2618_v29 = vsel %vm2616_vm12, %v2617_v27, %v4491_v62  ;;  %v553_v46 = vpop.permute.xlu1 %552 }
 0x2c1   : > { %v2783_v63 = vsel %vm2781_vm14, %v2782_v7, %v6602_v21  ;;  %v2635_v51 = vand.u32 31, %v2633_v42  ;;  %v2615_v44 = vsel %vm2613_vm11, %v4489_v0, %v2614_v20  ;;  %vm6626_vm1 = vcmp.le.f32.partialorder %v2415_v55, 0.7853982 }
 0x2c2   : > { %v2490_v14 = vor.u32 %v2489_v23, %v2488_v36  ;;  %v2493_v54 = vshll.u32 %v2492_v59, 23  ;;  %v2784_v38 = vadd.s32 %v2783_v63, %v2779_v49  ;;  %v2619_v33 = vsel %vm2612_vm10, %v2615_v44, %v2618_v29 }
 0x2c3   : > { %vm2417_vm4 = vcmp.lt.s32.totalorder %v6363_v47, 0  ;;  %v2636_v32 = vsub.s32 32, %v2635_v51  ;;  %v2620_v52 = vsel %vm2610_vm9, nan, %v2619_v33  ;;  %v2628_v55 = vand.u32 8388607, %v2621_v50 }
 0x2c4   : > { %v2494_v11 = vor.u32 4788187, %v2493_v54  ;;  %v2502_v61 = vsel %vm2417_vm4, %v2501_v12, %v6554_v56  ;;  %v2785_v8 = vadd.s32 536870912, %v2784_v38  ;;  %v3981_v10 = vsel %vm3960_vm0, %v4125_v35, %v2620_v52 }
 0x2c5   : > { %v2639_v25 = vshrl.u32 %v7818_v13, %v2636_v32  ;;  %v2642_v4 = vshrl.u32 %v7819_v57, %v2636_v32  ;;  %4014 = vst.msk [vmem:[%s5024_s21 + $0x90] sm:$0xff] %vm3995_vm2, %v3981_v10  ;;  %v2497_v30 = vcvt.s32.f32 %v2490_v14  ;;  %v2645_v19 = vshrl.u32 %v7820_v60, %v2636_v32 }
 0x2c6   : > { %v2495_v58 = vand.u32 2147483647, %v2494_v11  ;;  %v6644_v41 = vshrl.u32 %v2785_v8, 30  ;;  %v2638_v56 = vshll.u32 %v7827_v34, %v2635_v51  ;;  %v2641_v5 = vshll.u32 %v7818_v13, %v2635_v51 }
 0x2c7   : > { %v2647_v35 = vshll.u32 %v7820_v60, %v2635_v51  ;;  %v2648_v40 = vshrl.u32 %v7821_v9, %v2636_v32  ;;  %v2634_v21 = vshrl.u32 %v2633_v42, 5  ;;  %v2644_v1 = vshll.u32 %v7819_v57, %v2635_v51 }
 0x2c8   : > { %v2498_v28 = vmul.f32 %v2497_v30, %v2495_v58  ;;  %v2787_v2 = vshll.u32 %v6644_v41, 30  ;;  %v2640_v53 = vor.u32 %v2639_v25, %v2638_v56  ;;  %v2643_v12 = vor.u32 %v2642_v4, %v2641_v5  ;;  %v548_v5 = vpop.permute.xlu0 %547 }
 0x2c9   : > { %v2649_v18 = vor.u32 %v2648_v40, %v2647_v35  ;;  %v2651_v0 = vshrl.u32 %v7822_v16, %v2636_v32  ;;  %v2504_v36 = vsel %vm6626_vm1, 0, %v2502_v61  ;;  %v2646_v49 = vor.u32 %v2645_v19, %v2644_v1  ;;  %v7877_v1 = vld [vmem:[#allocation9_spill] sm:$0xff] }
 0x2ca   : > { %v2499_v15 = vxor.u32 2147483648, %v2498_v28  ;;  %v6656_v48 = vsub.s32 %v2784_v38, %v2787_v2  ;;  %v2629_v62 = vor.u32 8388608, %v2628_v55  ;;  %v2637_v27 = vshrl.u32 %v7827_v34, %v2636_v32 }
 0x2cb   : > { %v2650_v7 = vshll.u32 %v7821_v9, %v2635_v51  ;;  %v622_v20 = vmul.f32 %v4725_v37, %v553_v46  ;;  %vm2653_vm5 = vcmp.lt.s32.totalorder %v2634_v21, 1  ;;  %vm2656_vm7 = vcmp.lt.s32.totalorder %v2634_v21, 4 }
 0x2cc   : > { %v2500_v23 = vsel %vm2417_vm4, %v2499_v15, %v2498_v28  ;;  %v2790_v59 = vsub.s32 0, %v6656_v48  ;;  %v2661_v63 = vsel %vm2653_vm5, %v2640_v53, %v2643_v12  ;;  %v2662_v44 = vsel %vm2656_vm7, %v2649_v18, 920167782 }
 0x2cd   : > { %v2503_v42 = vsel %vm6626_vm1, %v6363_v47, %v2500_v23  ;;  %v2652_v29 = vor.u32 %v2651_v0, %v2650_v7  ;;  %vm2655_vm6 = vcmp.lt.s32.totalorder %v2634_v21, 3  ;;  %v2658_v14 = vsel %vm2656_vm7, %v2646_v49, 2102212464 }
 0x2ce   : > { %4492 = vcosq.f32 %v2503_v42  ;;  %v4222_v51 = vmin.u32 %v2790_v59, %v6656_v48  ;;  %v2508_v54 = vand.u32 3, %v2504_v36  ;;  %vm2654_vm3 = vcmp.lt.s32.totalorder %v2634_v21, 2 }
 0x2cf   : > { %4494 = vsinq.f32 %v2503_v42  ;;  %v2663_v38 = vsel %vm2655_vm6, %v2646_v49, %v2662_v44  ;;  %v2657_v24 = vsel %vm2653_vm5, %v2637_v27, %v2640_v53  ;;  %v2665_v52 = vsel %vm2653_vm5, %v2643_v12, %v2646_v49 }
 0x2d0   : > { %v2792_v33 = vclz %v4222_v51  ;;  %v2664_v32 = vsel %vm2654_vm3, %v2661_v63, %v2663_v38  ;;  %v2659_v11 = vsel %vm2655_vm6, %v2643_v12, %v2658_v14  ;;  %v2666_v61 = vsel %vm2656_vm7, %v2652_v29, 1326507024 }
 0x2d1   : > { %v2669_v8 = vshll.u32 %v2629_v62, 8  ;;  %v6678_v10 = vadd.f32 %v622_v20, %v4729_v39  ;;  %vm6682_vm8 = vcmp.le.f32.partialorder %v2724_v3, 0.7853982  ;;  %vm2726_vm9 = vcmp.lt.s32.totalorder %v6472_v26, 0 }
 0x2d2   : > { %v4223_v25 = vadd.s32 4294967294, %v2792_v33  ;;  %v2667_v4 = vsel %vm2655_vm6, %v2649_v18, %v2666_v61  ;;  %v2810_v58 = vsub.s32 4, %v6644_v41  ;;  %v2660_v3 = vsel %vm2654_vm3, %v2657_v24, %v2659_v11 }
 0x2d3   : > { %v2668_v30 = vsel %vm2654_vm3, %v2665_v52, %v2667_v4  ;;  %v6690_v19 = vmul.u32.u64.low %v2669_v8, %v2664_v32  ;;  %v6691_v56 = vmul.u32.u64.high %v2669_v8, %v2664_v32, %v6690_v19  ;;  %vm2507_vm11 = vweird.f32 %v6363_v47 }
 0x2d4   : > { %vm4224_vm10 = vcmp.lt.s32.totalorder %v4223_v25, 0  ;;  %v6695_v35 = vmul.u32.u64.low %v2669_v8, %v2668_v30  ;;  %v6696_v40 = vmul.u32.u64.high %v2669_v8, %v2668_v30, %v6695_v35  ;;  %vm2509_vm12 = vcmp.lt.s32.totalorder %v2508_v54, 2 }
 0x2d5   : > { %vm2513_vm13 = vcmp.eq.s32.totalorder %v2508_v54, 2  ;;  %v2795_v28 = vsel %vm4224_vm10, 0, %v4223_v25  ;;  %v2933_v2 = vand.u32 2139095040, %v6678_v10  ;;  %vm319_vm14 = vcmp.eq.s32.totalorder %v4674_v6, %v7877_v1 }
 0x2d6   : > { %v2780_v46 = vadd.s32 %v6601_v43, %v6596_v22  ;;  %v2796_v53 = vsub.s32 32, %v2795_v28  ;;  %v2800_v12 = vsub.s32 4294967266, %v2795_v28  ;;  %v621_v21 = vmul.f32 %v4725_v37, %v548_v5 }
 0x2d7   : > { %v2811_v18 = vsel %vm2726_vm9, %v2810_v58, %v6644_v41  ;;  %v2676_v0 = vmul.u32 %v2669_v8, %v2660_v3  ;;  %v2679_v15 = vadd.s32 1, %v6691_v56  ;;  %v2934_v36 = vshrl.u32 %v2933_v2, 23 }
 0x2d8   : > { %v4493_v49 = vpop.eup %4492  ;;  %v2797_v62 = vshll.u32 %v6656_v48, %v2795_v28  ;;  %v2798_v27 = vshrl.u32 %v2780_v46, %v2796_v53  ;;  %v2801_v7 = vadd.s32 127, %v2800_v12  ;;  %vm2678_vm15 = vc.u32 %v6696_v40, %v6690_v19 }
 0x2d9   : > { %v4495_v22 = vpop.eup %4494  ;;  %v2514_v43 = vxor.u32 2147483648, %v4493_v49  ;;  %v2680_v20 = vsel %vm2678_vm15, %v2679_v15, %v6691_v56  ;;  %v2930_v23 = vand.u32 2147483647, %v6678_v10  ;;  %v4229_v59 = vadd.s32 4294967169, %v2934_v36 }
 0x2da   : > { %v2511_v41 = vxor.u32 2147483648, %v4495_v22  ;;  %v2799_v42 = vor.u32 %v2798_v27, %v2797_v62  ;;  %v2802_v29 = vshll.u32 %v2801_v7, 23  ;;  %v2681_v63 = vadd.s32 %v2680_v20, %v2676_v0 }
 0x2db   : > { %vm2510_vm1 = vcmp.eq.s32.totalorder %v2508_v54, 0  ;;  %v2515_v44 = vsel %vm2513_vm13, %v2514_v43, %v4495_v22  ;;  %v2813_v48 = vsel %vm6682_vm8, 0, %v2811_v18  ;;  %v2940_v51 = vadd.s32 1, %v4229_v59 }
 0x2dc   : > { %v2512_v14 = vsel %vm2510_vm1, %v4493_v49, %v2511_v41  ;;  %v2803_v38 = vor.u32 4788187, %v2802_v29  ;;  %v2682_v33 = vadd.s32 536870912, %v2681_v63  ;;  %v6718_v24 = vadd.f32 %v621_v21, %v4729_v39 }
 0x2dd   : > { %v2516_v32 = vsel %vm2509_vm12, %v2512_v14, %v2515_v44  ;;  %v2806_v52 = vcvt.s32.f32 %v2799_v42  ;;  %v2937_v11 = vand.u32 8388607, %v2930_v23  ;;  %vm2941_vm4 = vcmp.gt.s32.totalorder %v2940_v51, 0 }
 0x2de   : > { %v2517_v61 = vsel %vm2507_vm11, nan, %v2516_v32  ;;  %v2804_v8 = vand.u32 2147483647, %v2803_v38  ;;  %v6725_v25 = vshrl.u32 %v2682_v33, 30  ;;  %v2942_v4 = vsel %vm2941_vm4, %v2940_v51, 0 }
 0x2df   : > { %v3980_v58 = vsel %vm3960_vm0, %v6586_v17, %v2517_v61  ;;  %v2944_v30 = vand.u32 31, %v2942_v4  ;;  %v6737_v47 = vsel %vm319_vm14, 1.0, %v7835_v31  ;;  %v6739_v5 = vand.u32 3, %v2813_v48 }
 0x2e0   : > { %4013 = vst.msk [vmem:[%s5024_s21 + $0x88] sm:$0xff] %vm3995_vm2, %v3980_v58  ;;  %v2807_v54 = vmul.f32 %v2806_v52, %v2804_v8  ;;  %v2684_v56 = vshll.u32 %v6725_v25, 30  ;;  %v2938_v2 = vor.u32 8388608, %v2937_v11  ;;  %v2830_v17 = vand.u32 2139095040, %v6718_v24 }
 0x2e1   : > { %v2945_v3 = vsub.s32 32, %v2944_v30  ;;  %v6744_v46 = vshrl.u32 %v2942_v4, 5  ;;  %v2947_v53 = vshll.u32 %v7827_v34, %v2944_v30  ;;  %v2950_v0 = vshll.u32 %v7818_v13, %v2944_v30 }
 0x2e2   : > { %v2808_v35 = vxor.u32 2147483648, %v2807_v54  ;;  %v6741_v28 = vsub.s32 %v2681_v63, %v2684_v56  ;;  %v2953_v49 = vshll.u32 %v7819_v57, %v2944_v30  ;;  %v2956_v62 = vshll.u32 %v7820_v60, %v2944_v30 }
 0x2e3   : > { %v2948_v12 = vshrl.u32 %v7818_v13, %v2945_v3  ;;  %v2951_v21 = vshrl.u32 %v7819_v57, %v2945_v3  ;;  %v2954_v15 = vshrl.u32 %v7820_v60, %v2945_v3  ;;  %v2957_v27 = vshrl.u32 %v7821_v9, %v2945_v3 }
 0x2e4   : > { %v2809_v1 = vsel %vm2726_vm9, %v2808_v35, %v2807_v54  ;;  %v2687_v18 = vsub.s32 0, %v6741_v28  ;;  %v2677_v20 = vadd.s32 %v6690_v19, %v6696_v40  ;;  %v2959_v55 = vshll.u32 %v7821_v9, %v2944_v30 }
 0x2e5   : > { %v2812_v36 = vsel %vm6682_vm8, %v6472_v26, %v2809_v1  ;;  %v2949_v22 = vor.u32 %v2948_v12, %v2947_v53  ;;  %v2952_v43 = vor.u32 %v2951_v21, %v2950_v0  ;;  %v2955_v59 = vor.u32 %v2954_v15, %v2953_v49 }
 0x2e6   : > { %4496 = vcosq.f32 %v2812_v36  ;;  %v4218_v7 = vmin.u32 %v2687_v18, %v6741_v28  ;;  %v2958_v41 = vor.u32 %v2957_v27, %v2956_v62  ;;  %v2960_v29 = vshrl.u32 %v7822_v16, %v2945_v3 }
 0x2e7   : > { %4498 = vsinq.f32 %v2812_v36  ;;  %v2831_v63 = vshrl.u32 %v2830_v17, 23  ;;  %v2946_v44 = vshrl.u32 %v7827_v34, %v2945_v3  ;;  %vm2962_vm5 = vcmp.lt.s32.totalorder %v6744_v46, 1 }
 0x2e8   : > { %v2689_v42 = vclz %v4218_v7  ;;  %vm2963_vm7 = vcmp.lt.s32.totalorder %v6744_v46, 2  ;;  %v2978_v48 = vshll.u32 %v2938_v2, 8  ;;  %v2961_v14 = vor.u32 %v2960_v29, %v2959_v55  ;;  %v563_v55 = vpop.permute.xlu1 %562 }
 0x2e9   : > { %vm2965_vm6 = vcmp.lt.s32.totalorder %v6744_v46, 4  ;;  %v2970_v19 = vsel %vm2962_vm5, %v2949_v22, %v2952_v43  ;;  %vm2819_vm3 = vcmp.eq.s32.totalorder %v6739_v5, 0  ;;  %vm2964_vm8 = vcmp.lt.s32.totalorder %v6744_v46, 3 }
 0x2ea   : > { %v4219_v51 = vadd.s32 4294967294, %v2689_v42  ;;  %v2967_v40 = vsel %vm2965_vm6, %v2955_v59, 2102212464  ;;  %v2971_v38 = vsel %vm2965_vm6, %v2958_v41, 920167782  ;;  %v2974_v33 = vsel %vm2962_vm5, %v2952_v43, %v2955_v59 }
 0x2eb   : > { %vm2818_vm9 = vcmp.lt.s32.totalorder %v6739_v5, 2  ;;  %vm2623_vm10 = vcmp.lt.s32.totalorder %v6539_v45, 0  ;;  %v2972_v32 = vsel %vm2964_vm8, %v2955_v59, %v2971_v38  ;;  %v2975_v52 = vsel %vm2965_vm6, %v2961_v14, 1326507024 }
 0x2ec   : > { %vm4220_vm11 = vcmp.lt.s32.totalorder %v4219_v51, 0  ;;  %v4225_v11 = vadd.s32 4294967169, %v2831_v63  ;;  %vm2816_vm12 = vweird.f32 %v6472_v26  ;;  %v2966_v8 = vsel %vm2962_vm5, %v2946_v44, %v2949_v22 }
 0x2ed   : > { %v2692_v61 = vsel %vm4220_vm11, 0, %v4219_v51  ;;  %v2973_v4 = vsel %vm2963_vm7, %v2970_v19, %v2972_v32  ;;  %v2976_v58 = vsel %vm2964_vm8, %v2958_v41, %v2975_v52  ;;  %v2968_v56 = vsel %vm2964_vm8, %v2952_v43, %v2967_v40 }
 0x2ee   : > { %v2693_v30 = vsub.s32 32, %v2692_v61  ;;  %v2697_v54 = vsub.s32 4294967266, %v2692_v61  ;;  %v2977_v3 = vsel %vm2963_vm7, %v2974_v33, %v2976_v58  ;;  %vm6792_vm13 = vcmp.le.f32.partialorder %v2621_v50, 0.7853982 }
 0x2ef   : > { %v6796_v2 = vmul.u32.u64.low %v2978_v48, %v2977_v3  ;;  %v6797_v17 = vmul.u32.u64.high %v2978_v48, %v2977_v3, %v6796_v2  ;;  %v6799_v53 = vmul.u32.u64.low %v2978_v48, %v2973_v4  ;;  %v6800_v12 = vmul.u32.u64.high %v2978_v48, %v2973_v4, %v6799_v53 }
 0x2f0   : > { %v4497_v21 = vpop.eup %4496  ;;  %v2694_v1 = vshll.u32 %v6741_v28, %v2692_v61  ;;  %v2695_v18 = vshrl.u32 %v2677_v20, %v2693_v30  ;;  %v2698_v0 = vadd.s32 127, %v2697_v54  ;;  %v2837_v15 = vadd.s32 1, %v4225_v11  ;;  %v7880_v61 = vld [vmem:[#allocation6_spill] sm:$0xff] }
 0x2f1   : > { %v4499_v36 = vpop.eup %4498  ;;  %vm2822_vm14 = vcmp.eq.s32.totalorder %v6739_v5, 2  ;;  %v2823_v50 = vxor.u32 2147483648, %v4497_v21  ;;  %v2707_v49 = vsub.s32 4, %v6725_v25  ;;  %v2969_v62 = vsel %vm2963_vm7, %v2966_v8, %v2968_v56 }
 0x2f2   : > { %v2820_v27 = vxor.u32 2147483648, %v4499_v36  ;;  %v2696_v7 = vor.u32 %v2695_v18, %v2694_v1  ;;  %v2699_v22 = vshll.u32 %v2698_v0, 23  ;;  %vm2838_vm15 = vcmp.gt.s32.totalorder %v2837_v15, 0  ;;  %v558_v18 = vpop.permute.xlu0 %557 }
 0x2f3   : > { %v2824_v43 = vsel %vm2822_vm14, %v2823_v50, %v4499_v36  ;;  %vm2987_vm1 = vc.u32 %v6797_v17, %v6799_v53  ;;  %v2988_v28 = vadd.s32 1, %v6800_v12  ;;  %v2827_v20 = vand.u32 2147483647, %v6718_v24 }
 0x2f4   : > { %v2821_v59 = vsel %vm2819_vm3, %v4497_v21, %v2820_v27  ;;  %v2700_v41 = vor.u32 4788187, %v2699_v22  ;;  %v2985_v42 = vmul.u32 %v2978_v48, %v2969_v62  ;;  %v2839_v46 = vsel %vm2838_vm15, %v2837_v15, 0 }
 0x2f5   : > { %v2825_v29 = vsel %vm2818_vm9, %v2821_v59, %v2824_v43  ;;  %v2708_v63 = vsel %vm2623_vm10, %v2707_v49, %v6725_v25  ;;  %v2989_v44 = vsel %vm2987_vm1, %v2988_v28, %v6800_v12  ;;  %v2841_v51 = vand.u32 31, %v2839_v46 }
 0x2f6   : > { %v2826_v14 = vsel %vm2816_vm12, nan, %v2825_v29  ;;  %v2701_v19 = vand.u32 2147483647, %v2700_v41  ;;  %v2703_v40 = vcvt.s32.f32 %v2696_v7  ;;  %v2990_v38 = vadd.s32 %v2989_v44, %v2985_v42 }
 0x2f7   : > { %v3983_v48 = vsel %vm3960_vm0, %v6737_v47, %v2826_v14  ;;  %v2834_v5 = vand.u32 8388607, %v2827_v20  ;;  %v2842_v33 = vsub.s32 32, %v2841_v51  ;;  %v624_v32 = vmul.f32 %v4725_v37, %v563_v55 }
 0x2f8   : > { %4016 = vst.msk [vmem:[%s5024_s21 + $0xa0] sm:$0xff] %vm3995_vm2, %v3983_v48  ;;  %v2704_v25 = vmul.f32 %v2703_v40, %v2701_v19  ;;  %v2710_v26 = vsel %vm6792_vm13, 0, %v2708_v63  ;;  %v2991_v52 = vadd.s32 536870912, %v2990_v38  ;;  %v2840_v11 = vshrl.u32 %v2839_v46, 5 }
 0x2f9   : > { %vm318_vm4 = vcmp.eq.s32.totalorder %v4674_v6, %v7880_v61  ;;  %v2844_v8 = vshll.u32 %v7827_v34, %v2841_v51  ;;  %v2845_v47 = vshrl.u32 %v7818_v13, %v2842_v33  ;;  %v2848_v4 = vshrl.u32 %v7819_v57, %v2842_v33 }
 0x2fa   : > { %v2851_v58 = vshrl.u32 %v7820_v60, %v2842_v33  ;;  %v2705_v30 = vxor.u32 2147483648, %v2704_v25  ;;  %v6838_v54 = vshrl.u32 %v2991_v52, 30  ;;  %v2850_v56 = vshll.u32 %v7819_v57, %v2841_v51 }
 0x2fb   : > { %v2854_v3 = vshrl.u32 %v7821_v9, %v2842_v33  ;;  %v2847_v2 = vshll.u32 %v7818_v13, %v2841_v51  ;;  %v2853_v12 = vshll.u32 %v7820_v60, %v2841_v51  ;;  %v2856_v21 = vshll.u32 %v7821_v9, %v2841_v51 }
 0x2fc   : > { %v2857_v1 = vshrl.u32 %v7822_v16, %v2842_v33  ;;  %v2706_v0 = vsel %vm2623_vm10, %v2705_v30, %v2704_v25  ;;  %v2993_v15 = vshll.u32 %v6838_v54, 30  ;;  %v2846_v36 = vor.u32 %v2845_v47, %v2844_v8 }
 0x2fd   : > { %v2852_v50 = vor.u32 %v2851_v58, %v2850_v56  ;;  %v2709_v49 = vsel %vm6792_vm13, %v6539_v45, %v2706_v0  ;;  %v2849_v62 = vor.u32 %v2848_v4, %v2847_v2  ;;  %v2855_v27 = vor.u32 %v2854_v3, %v2853_v12  ;;  %v7881_v4 = vld [vmem:[#allocation8_spill] sm:$0xff]  ;;  %v7882_v2 = vld [vmem:[#allocation11_spill] sm:$0xff] }
 0x2fe   : > { %v2858_v7 = vor.u32 %v2857_v1, %v2856_v21  ;;  %4500 = vcosq.f32 %v2709_v49  ;;  %v6852_v22 = vsub.s32 %v2990_v38, %v2993_v15  ;;  %v2835_v43 = vor.u32 8388608, %v2834_v5 }
 0x2ff   : > { %v623_v28 = vmul.f32 %v4725_v37, %v558_v18  ;;  %4502 = vsinq.f32 %v2709_v49  ;;  %v2714_v59 = vand.u32 3, %v2710_v26  ;;  %vm2862_vm5 = vcmp.lt.s32.totalorder %v2840_v11, 4 }
 0x300   : > { %v6856_v41 = vadd.f32 %v624_v32, %v4729_v39  ;;  %v2996_v42 = vsub.s32 0, %v6852_v22  ;;  %v2843_v35 = vshrl.u32 %v7827_v34, %v2842_v33  ;;  %vm2859_vm7 = vcmp.lt.s32.totalorder %v2840_v11, 1 }
 0x301   : > { %v2864_v46 = vsel %vm2862_vm5, %v2852_v50, 2102212464  ;;  %v2867_v55 = vsel %vm2859_vm7, %v2846_v36, %v2849_v62  ;;  %v2868_v29 = vsel %vm2862_vm5, %v2855_v27, 920167782  ;;  %v2871_v63 = vsel %vm2859_vm7, %v2849_v62, %v2852_v50 }
 0x302   : > { %v2872_v44 = vsel %vm2862_vm5, %v2858_v7, 1326507024  ;;  %v4230_v51 = vmin.u32 %v2996_v42, %v6852_v22  ;;  %vm2860_vm6 = vcmp.lt.s32.totalorder %v2840_v11, 2  ;;  %vm2861_vm3 = vcmp.lt.s32.totalorder %v2840_v11, 3 }
 0x303   : > { %v2875_v14 = vshll.u32 %v2835_v43, 8  ;;  %v2863_v19 = vsel %vm2859_vm7, %v2843_v35, %v2846_v36  ;;  %v2865_v40 = vsel %vm2861_vm3, %v2849_v62, %v2864_v46  ;;  %v2869_v38 = vsel %vm2861_vm3, %v2852_v50, %v2868_v29 }
 0x304   : > { %v2873_v48 = vsel %vm2861_vm3, %v2855_v27, %v2872_v44  ;;  %v4126_v5 = vsel %vm318_vm4, 1.0, %v7835_v31  ;;  %v2998_v33 = vclz %v4230_v51  ;;  %v2870_v32 = vsel %vm2860_vm6, %v2867_v55, %v2869_v38 }
 0x305   : > { %v2874_v25 = vsel %vm2860_vm6, %v2871_v63, %v2873_v48  ;;  %v6870_v8 = vmul.u32.u64.low %v2875_v14, %v2870_v32  ;;  %v6871_v47 = vmul.u32.u64.high %v2875_v14, %v2870_v32, %v6870_v8  ;;  %vm320_vm8 = vcmp.eq.s32.totalorder %v4674_v6, %v7881_v4 }
 0x306   : > { %v6867_v26 = vmul.u32.u64.low %v2875_v14, %v2874_v25  ;;  %v6868_v52 = vmul.u32.u64.high %v2875_v14, %v2874_v25, %v6867_v26  ;;  %vm2713_vm9 = vweird.f32 %v6539_v45  ;;  %v4231_v58 = vadd.s32 4294967294, %v2998_v33 }
 0x307   : > { %v2866_v61 = vsel %vm2860_vm6, %v2863_v19, %v2865_v40  ;;  %v3139_v30 = vand.u32 2139095040, %v6856_v41  ;;  %vm2715_vm10 = vcmp.lt.s32.totalorder %v2714_v59, 2  ;;  %vm2716_vm11 = vcmp.eq.s32.totalorder %v2714_v59, 0 }
 0x308   : > { %vm2719_vm12 = vcmp.eq.s32.totalorder %v2714_v59, 2  ;;  %v6880_v56 = vadd.f32 %v623_v28, %v4729_v39  ;;  %v4501_v3 = vpop.eup %4500  ;;  %vm321_vm13 = vcmp.eq.s32.totalorder %v4674_v6, %v7882_v2  ;;  %v2986_v12 = vadd.s32 %v6799_v53, %v6797_v17 }
 0x309   : > { %vm4232_vm14 = vcmp.lt.s32.totalorder %v4231_v58, 0  ;;  %v3136_v21 = vand.u32 2147483647, %v6856_v41  ;;  %v3140_v11 = vshrl.u32 %v3139_v30, 23  ;;  %v4503_v1 = vpop.eup %4502  ;;  %v2720_v18 = vxor.u32 2147483648, %v4501_v3 }
 0x30a   : > { %v3001_v0 = vsel %vm4232_vm14, 0, %v4231_v58  ;;  %v3016_v15 = vsub.s32 4, %v6838_v54  ;;  %v2882_v36 = vmul.u32 %v2875_v14, %v2866_v61  ;;  %v2717_v50 = vxor.u32 2147483648, %v4503_v1 }
 0x30b   : > { %v3002_v49 = vsub.s32 32, %v3001_v0  ;;  %v3006_v62 = vsub.s32 4294967266, %v3001_v0  ;;  %vm2884_vm15 = vc.u32 %v6868_v52, %v6870_v8  ;;  %v2721_v27 = vsel %vm2719_vm12, %v2720_v18, %v4503_v1 }
 0x30c   : > { %v2885_v17 = vadd.s32 1, %v6871_v47  ;;  %v4237_v53 = vadd.s32 4294967169, %v3140_v11  ;;  %v3036_v7 = vand.u32 2139095040, %v6880_v56  ;;  %v2718_v43 = vsel %vm2716_vm11, %v4501_v3, %v2717_v50 }
 0x30d   : > { %v3003_v28 = vshll.u32 %v6852_v22, %v3001_v0  ;;  %v3004_v42 = vshrl.u32 %v2986_v12, %v3002_v49  ;;  %v3007_v35 = vadd.s32 127, %v3006_v62  ;;  %v2722_v46 = vsel %vm2715_vm10, %v2718_v43, %v2721_v27 }
 0x30e   : > { %vm2932_vm1 = vcmp.lt.s32.totalorder %v6678_v10, 0  ;;  %v2886_v55 = vsel %vm2884_vm15, %v2885_v17, %v6871_v47  ;;  %v3146_v29 = vadd.s32 1, %v4237_v53  ;;  %v2723_v63 = vsel %vm2713_vm9, nan, %v2722_v46 }
 0x30f   : > { %v3005_v44 = vor.u32 %v3004_v42, %v3003_v28  ;;  %v3008_v51 = vshll.u32 %v3007_v35, 23  ;;  %v2887_v14 = vadd.s32 %v2886_v55, %v2882_v36  ;;  %v3982_v19 = vsel %vm3960_vm0, %v4126_v5, %v2723_v63 }
 0x310   : > { %v3017_v22 = vsel %vm2932_vm1, %v3016_v15, %v6838_v54  ;;  %v3143_v59 = vand.u32 8388607, %v3136_v21  ;;  %vm3147_vm4 = vcmp.gt.s32.totalorder %v3146_v29, 0  ;;  %4015 = vst.msk [vmem:[%s5024_s21 + $0x98] sm:$0xff] %vm3995_vm2, %v3982_v19  ;;  %v3037_v48 = vshrl.u32 %v3036_v7, 23 }
 0x311   : > { %v3009_v40 = vor.u32 4788187, %v3008_v51  ;;  %v2888_v38 = vadd.s32 536870912, %v2887_v14  ;;  %v3148_v45 = vsel %vm3147_vm4, %v3146_v29, 0  ;;  %v6913_v33 = vsel %vm320_vm8, 1.0, %v7835_v31 }
 0x312   : > { %v3150_v5 = vand.u32 31, %v3148_v45  ;;  %vm6917_vm5 = vcmp.le.f32.partialorder %v2930_v23, 0.7853982  ;;  %v3012_v25 = vcvt.s32.f32 %v3005_v44  ;;  %v6927_v47 = vsel %vm321_vm13, 1.0, %v7835_v31 }
 0x313   : > { %v3010_v32 = vand.u32 2147483647, %v3009_v40  ;;  %v6921_v26 = vshrl.u32 %v2888_v38, 30  ;;  %v3019_v4 = vsel %vm6917_vm5, 0, %v3017_v22  ;;  %v3144_v58 = vor.u32 8388608, %v3143_v59 }
 0x314   : > { %v3151_v61 = vsub.s32 32, %v3150_v5  ;;  %v3153_v3 = vshll.u32 %v7827_v34, %v3150_v5  ;;  %v4233_v12 = vadd.s32 4294967169, %v3037_v48  ;;  %v3156_v1 = vshll.u32 %v7818_v13, %v3150_v5 }
 0x315   : > { %v3013_v30 = vmul.f32 %v3012_v25, %v3010_v32  ;;  %v2890_v23 = vshll.u32 %v6921_v26, 30  ;;  %v3159_v36 = vshll.u32 %v7819_v57, %v3150_v5  ;;  %v6941_v49 = vand.u32 3, %v3019_v4 }
 0x316   : > { %v3154_v11 = vshrl.u32 %v7818_v13, %v3151_v61  ;;  %v3157_v18 = vshrl.u32 %v7819_v57, %v3151_v61  ;;  %v3160_v2 = vshrl.u32 %v7820_v60, %v3151_v61  ;;  %v3163_v50 = vshrl.u32 %v7821_v9, %v3151_v61 }
 0x317   : > { %v3014_v0 = vxor.u32 2147483648, %v3013_v30  ;;  %v6937_v15 = vsub.s32 %v2887_v14, %v2890_v23  ;;  %v3149_v62 = vshrl.u32 %v3148_v45, 5  ;;  %v3162_v17 = vshll.u32 %v7820_v60, %v3150_v5 }
 0x318   : > { %v3155_v27 = vor.u32 %v3154_v11, %v3153_v3  ;;  %v3158_v43 = vor.u32 %v3157_v18, %v3156_v1  ;;  %v3161_v28 = vor.u32 %v3160_v2, %v3159_v36  ;;  %v3165_v46 = vshll.u32 %v7821_v9, %v3150_v5 }
 0x319   : > { %v3015_v53 = vsel %vm2932_vm1, %v3014_v0, %v3013_v30  ;;  %v2893_v7 = vsub.s32 0, %v6937_v15  ;;  %v3164_v35 = vor.u32 %v3163_v50, %v3162_v17  ;;  %v3166_v55 = vshrl.u32 %v7822_v16, %v3151_v61 }
 0x31a   : > { %v3018_v42 = vsel %vm6917_vm5, %v6678_v10, %v3015_v53  ;;  %v3184_v63 = vshll.u32 %v3144_v58, 8  ;;  %v3043_v44 = vadd.s32 1, %v4233_v12  ;;  %v3152_v51 = vshrl.u32 %v7827_v34, %v3151_v61 }
 0x31b   : > { %4504 = vcosq.f32 %v3018_v42  ;;  %v4226_v29 = vmin.u32 %v2893_v7, %v6937_v15  ;;  %v3167_v14 = vor.u32 %v3166_v55, %v3165_v46  ;;  %vm3168_vm7 = vcmp.lt.s32.totalorder %v3149_v62, 1 }
 0x31c   : > { %4506 = vsinq.f32 %v3018_v42  ;;  %vm3169_vm6 = vcmp.lt.s32.totalorder %v3149_v62, 2  ;;  %vm3170_vm3 = vcmp.lt.s32.totalorder %v3149_v62, 3  ;;  %vm3171_vm8 = vcmp.lt.s32.totalorder %v3149_v62, 4 }
 0x31d   : > { %v2895_v19 = vclz %v4226_v29  ;;  %v3173_v22 = vsel %vm3171_vm8, %v3161_v28, 2102212464  ;;  %v3176_v59 = vsel %vm3168_vm7, %v3155_v27, %v3158_v43  ;;  %v3177_v40 = vsel %vm3171_vm8, %v3164_v35, 920167782 }
 0x31e   : > { %v3180_v38 = vsel %vm3168_vm7, %v3158_v43, %v3161_v28  ;;  %v3172_v48 = vsel %vm3168_vm7, %v3152_v51, %v3155_v27  ;;  %v3178_v5 = vsel %vm3170_vm3, %v3161_v28, %v3177_v40  ;;  %v3181_v54 = vsel %vm3171_vm8, %v3167_v14, 1326507024 }
 0x31f   : > { %v4227_v45 = vadd.s32 4294967294, %v2895_v19  ;;  %vm2829_vm9 = vcmp.lt.s32.totalorder %v6718_v24, 0  ;;  %v3174_v32 = vsel %vm3170_vm3, %v3158_v43, %v3173_v22  ;;  %v3179_v25 = vsel %vm3169_vm6, %v3176_v59, %v3178_v5  ;;  %v573_v43 = vpop.permute.xlu1 %572 }
 0x320   : > { %v3182_v4 = vsel %vm3170_vm3, %v3164_v35, %v3181_v54  ;;  %vm3044_vm10 = vcmp.gt.s32.totalorder %v3043_v44, 0  ;;  %vm3024_vm11 = vcmp.lt.s32.totalorder %v6941_v49, 2  ;;  %vm3022_vm13 = vweird.f32 %v6678_v10 }
 0x321   : > { %vm4228_vm12 = vcmp.lt.s32.totalorder %v4227_v45, 0  ;;  %v3183_v58 = vsel %vm3169_vm6, %v3180_v38, %v3182_v4  ;;  %v6958_v61 = vmul.u32.u64.low %v3184_v63, %v3179_v25  ;;  %v6959_v30 = vmul.u32.u64.high %v3184_v63, %v3179_v25, %v6958_v61 }
 0x322   : > { %v2883_v23 = vadd.s32 %v6870_v8, %v6868_v52  ;;  %v2898_v3 = vsel %vm4228_vm12, 0, %v4227_v45  ;;  %v6965_v12 = vmul.u32.u64.low %v3184_v63, %v3183_v58  ;;  %v6966_v11 = vmul.u32.u64.high %v3184_v63, %v3183_v58, %v6965_v12 }
 0x323   : > { %v2899_v1 = vsub.s32 32, %v2898_v3  ;;  %v2903_v18 = vsub.s32 4294967266, %v2898_v3  ;;  %v3175_v2 = vsel %vm3169_vm6, %v3172_v48, %v3174_v32  ;;  %v3045_v0 = vsel %vm3044_vm10, %v3043_v44, 0 }
 0x324   : > { %vm3028_vm14 = vcmp.eq.s32.totalorder %v6941_v49, 2  ;;  %v2913_v36 = vsub.s32 4, %v6921_v26  ;;  %v3033_v50 = vand.u32 2147483647, %v6880_v56  ;;  %v3047_v27 = vand.u32 31, %v3045_v0 }
 0x325   : > { %v4505_v17 = vpop.eup %4504  ;;  %vm6974_vm15 = vcmp.le.f32.partialorder %v2827_v20, 0.7853982  ;;  %v2900_v8 = vshll.u32 %v6937_v15, %v2898_v3  ;;  %v2901_v53 = vshrl.u32 %v2883_v23, %v2899_v1  ;;  %v2904_v62 = vadd.s32 127, %v2903_v18 }
 0x326   : > { %v3194_v7 = vadd.s32 1, %v6959_v30  ;;  %v4507_v28 = vpop.eup %4506  ;;  %v3029_v42 = vxor.u32 2147483648, %v4505_v17  ;;  %v3191_v35 = vmul.u32 %v3184_v63, %v3175_v2  ;;  %vm3193_vm1 = vc.u32 %v6966_v11, %v6958_v61 }
 0x327   : > { %v3048_v46 = vsub.s32 32, %v3047_v27  ;;  %v3026_v55 = vxor.u32 2147483648, %v4507_v28  ;;  %v2902_v29 = vor.u32 %v2901_v53, %v2900_v8  ;;  %v2905_v20 = vshll.u32 %v2904_v62, 23 }
 0x328   : > { %v3195_v44 = vsel %vm3193_vm1, %v3194_v7, %v6959_v30  ;;  %vm3025_vm4 = vcmp.eq.s32.totalorder %v6941_v49, 0  ;;  %v3030_v15 = vsel %vm3028_vm14, %v3029_v42, %v4507_v28  ;;  %v626_v14 = vmul.f32 %v4725_v37, %v573_v43 }
 0x329   : > { %v3196_v51 = vadd.s32 %v3195_v44, %v3191_v35  ;;  %v3027_v19 = vsel %vm3025_vm4, %v4505_v17, %v3026_v55  ;;  %v2906_v63 = vor.u32 4788187, %v2905_v20  ;;  %v2914_v22 = vsel %vm2829_vm9, %v2913_v36, %v6921_v26 }
 0x32a   : > { %v3040_v59 = vand.u32 8388607, %v3033_v50  ;;  %v3031_v40 = vsel %vm3024_vm11, %v3027_v19, %v3030_v15  ;;  %v2909_v38 = vcvt.s32.f32 %v2902_v29  ;;  %v6994_v48 = vshrl.u32 %v3045_v0, 5 }
 0x32b   : > { %v3197_v45 = vadd.s32 536870912, %v3196_v51  ;;  %v3032_v5 = vsel %vm3022_vm13, nan, %v3031_v40  ;;  %v2907_v54 = vand.u32 2147483647, %v2906_v63  ;;  %v3051_v32 = vshrl.u32 %v7818_v13, %v3048_v46  ;;  %v568_v40 = vpop.permute.xlu0 %567 }
 0x32c   : > { %v3054_v25 = vshrl.u32 %v7819_v57, %v3048_v46  ;;  %v3985_v26 = vsel %vm3960_vm0, %v6927_v47, %v3032_v5  ;;  %v3050_v49 = vshll.u32 %v7827_v34, %v3047_v27  ;;  %v3057_v58 = vshrl.u32 %v7820_v60, %v3048_v46 }
 0x32d   : > { %v7003_v4 = vshrl.u32 %v3197_v45, 30  ;;  %4018 = vst.msk [vmem:[%s5024_s21 + $0xb0] sm:$0xff] %vm3995_vm2, %v3985_v26  ;;  %v2910_v30 = vmul.f32 %v2909_v38, %v2907_v54  ;;  %v3053_v10 = vshll.u32 %v7818_v13, %v3047_v27  ;;  %v3059_v23 = vshll.u32 %v7820_v60, %v3047_v27 }
 0x32e   : > { %v3060_v3 = vshrl.u32 %v7821_v9, %v3048_v46  ;;  %v2916_v12 = vsel %vm6974_vm15, 0, %v2914_v22  ;;  %v3056_v1 = vshll.u32 %v7819_v57, %v3047_v27  ;;  %v3063_v18 = vshrl.u32 %v7822_v16, %v3048_v46 }
 0x32f   : > { %v3199_v47 = vshll.u32 %v7003_v4, 30  ;;  %v2911_v2 = vxor.u32 2147483648, %v2910_v30  ;;  %v3052_v0 = vor.u32 %v3051_v32, %v3050_v49  ;;  %v3055_v36 = vor.u32 %v3054_v25, %v3053_v10 }
 0x330   : > { %v3061_v17 = vor.u32 %v3060_v3, %v3059_v23  ;;  %v3041_v53 = vor.u32 8388608, %v3040_v59  ;;  %v3058_v62 = vor.u32 %v3057_v58, %v3056_v1  ;;  %v3062_v7 = vshll.u32 %v7821_v9, %v3047_v27  ;;  %v7889_v3 = vld [vmem:[#allocation13_spill] sm:$0xff] }
 0x331   : > { %v7017_v8 = vsub.s32 %v3196_v51, %v3199_v47  ;;  %v2912_v43 = vsel %vm2829_vm9, %v2911_v2, %v2910_v30  ;;  %v7022_v28 = vand.u32 3, %v2916_v12  ;;  %vm3065_vm5 = vcmp.lt.s32.totalorder %v6994_v48, 1 }
 0x332   : > { %v7026_v42 = vadd.f32 %v626_v14, %v4729_v39  ;;  %v2915_v35 = vsel %vm6974_vm15, %v6718_v24, %v2912_v43  ;;  %v3064_v29 = vor.u32 %v3063_v18, %v3062_v7  ;;  %vm3068_vm7 = vcmp.lt.s32.totalorder %v6994_v48, 4 }
 0x333   : > { %v3202_v55 = vsub.s32 0, %v7017_v8  ;;  %4508 = vcosq.f32 %v2915_v35  ;;  %vm3138_vm6 = vcmp.lt.s32.totalorder %v6856_v41, 0  ;;  %v3049_v27 = vshrl.u32 %v7827_v34, %v3048_v46 }
 0x334   : > { %v3073_v20 = vsel %vm3065_vm5, %v3052_v0, %v3055_v36  ;;  %v3074_v44 = vsel %vm3068_vm7, %v3061_v17, 920167782  ;;  %4510 = vsinq.f32 %v2915_v35  ;;  %vm3067_vm3 = vcmp.lt.s32.totalorder %v6994_v48, 3 }
 0x335   : > { %v4238_v52 = vmin.u32 %v3202_v55, %v7017_v8  ;;  %v3070_v15 = vsel %vm3068_vm7, %v3058_v62, 2102212464  ;;  %vm3066_vm8 = vcmp.lt.s32.totalorder %v6994_v48, 2  ;;  %v3075_v51 = vsel %vm3067_vm3, %v3058_v62, %v3074_v44 }
 0x336   : > { %v3077_v46 = vsel %vm3065_vm5, %v3055_v36, %v3058_v62  ;;  %v3081_v14 = vshll.u32 %v3041_v53, 8  ;;  %v3069_v63 = vsel %vm3065_vm5, %v3049_v27, %v3052_v0  ;;  %v3076_v22 = vsel %vm3066_vm8, %v3073_v20, %v3075_v51 }
 0x337   : > { %v3204_v19 = vclz %v4238_v52  ;;  %v3078_v59 = vsel %vm3068_vm7, %v3064_v29, 1326507024  ;;  %v3071_v38 = vsel %vm3067_vm3, %v3055_v36, %v3070_v15  ;;  %vm7058_vm9 = vcmp.le.f32.partialorder %v3136_v21, 0.7853982 }
 0x338   : > { %v3079_v45 = vsel %vm3067_vm3, %v3061_v17, %v3078_v59  ;;  %v7052_v5 = vmul.u32.u64.low %v3081_v14, %v3076_v22  ;;  %v7053_v54 = vmul.u32.u64.high %v3081_v14, %v3076_v22, %v7052_v5  ;;  %v3222_v26 = vsub.s32 4, %v7003_v4 }
 0x339   : > { %v4239_v25 = vadd.s32 4294967294, %v3204_v19  ;;  %v3080_v49 = vsel %vm3066_vm8, %v3077_v46, %v3079_v45  ;;  %v3345_v58 = vand.u32 2139095040, %v7026_v42  ;;  %vm2921_vm10 = vcmp.lt.s32.totalorder %v7022_v28, 2 }
 0x33a   : > { %v7067_v30 = vmul.u32.u64.low %v3081_v14, %v3080_v49  ;;  %v7068_v10 = vmul.u32.u64.high %v3081_v14, %v3080_v49, %v7067_v30  ;;  %v625_v23 = vmul.f32 %v4725_v37, %v568_v40  ;;  %vm323_vm11 = vcmp.eq.s32.totalorder %v4674_v6, %v7889_v3 }
 0x33b   : > { %vm2919_vm12 = vweird.f32 %v6718_v24  ;;  %vm2925_vm13 = vcmp.eq.s32.totalorder %v7022_v28, 2  ;;  %vm4240_vm14 = vcmp.lt.s32.totalorder %v4239_v25, 0  ;;  %v3072_v21 = vsel %vm3066_vm8, %v3069_v63, %v3071_v38 }
 0x33c   : > { %v3346_v12 = vshrl.u32 %v3345_v58, 23  ;;  %v3192_v47 = vadd.s32 %v6958_v61, %v6966_v11  ;;  %v3207_v1 = vsel %vm4240_vm14, 0, %v4239_v25  ;;  %v3091_v18 = vadd.s32 1, %v7053_v54 }
 0x33d   : > { %v3342_v2 = vand.u32 2147483647, %v7026_v42  ;;  %v3208_v0 = vsub.s32 32, %v3207_v1  ;;  %v3212_v36 = vsub.s32 4294967266, %v3207_v1  ;;  %v3223_v17 = vsel %vm3138_vm6, %v3222_v26, %v7003_v4  ;;  %v4509_v62 = vpop.eup %4508 }
 0x33e   : > { %v4245_v53 = vadd.s32 4294967169, %v3346_v12  ;;  %v3209_v48 = vshll.u32 %v7017_v8, %v3207_v1  ;;  %v3088_v7 = vmul.u32 %v3081_v14, %v3072_v21  ;;  %vm3090_vm15 = vc.u32 %v7068_v10, %v7052_v5  ;;  %v4511_v11 = vpop.eup %4510 }
 0x33f   : > { %v7088_v61 = vadd.f32 %v625_v23, %v4729_v39  ;;  %v2926_v43 = vxor.u32 2147483648, %v4509_v62  ;;  %v3210_v35 = vshrl.u32 %v3192_v47, %v3208_v0  ;;  %v3213_v55 = vadd.s32 127, %v3212_v36 }
 0x340   : > { %v3092_v29 = vsel %vm3090_vm15, %v3091_v18, %v7053_v54  ;;  %v2923_v27 = vxor.u32 2147483648, %v4511_v11  ;;  %v3349_v4 = vand.u32 8388607, %v3342_v2  ;;  %v3352_v44 = vadd.s32 1, %v4245_v53 }
 0x341   : > { %v3093_v20 = vadd.s32 %v3092_v29, %v3088_v7  ;;  %vm2922_vm1 = vcmp.eq.s32.totalorder %v7022_v28, 0  ;;  %v2927_v8 = vsel %vm2925_vm13, %v2926_v43, %v4511_v11  ;;  %v3211_v52 = vor.u32 %v3210_v35, %v3209_v48 }
 0x342   : > { %v3214_v15 = vshll.u32 %v3213_v55, 23  ;;  %v2924_v51 = vsel %vm2922_vm1, %v4509_v62, %v2923_v27  ;;  %v3225_v46 = vsel %vm7058_vm9, 0, %v3223_v17  ;;  %vm3353_vm4 = vcmp.gt.s32.totalorder %v3352_v44, 0 }
 0x343   : > { %v3094_v14 = vadd.s32 536870912, %v3093_v20  ;;  %v2928_v19 = vsel %vm2921_vm10, %v2924_v51, %v2927_v8  ;;  %v3354_v22 = vsel %vm3353_vm4, %v3352_v44, 0  ;;  %v3242_v59 = vand.u32 2139095040, %v7088_v61 }
 0x344   : > { %v3215_v63 = vor.u32 4788187, %v3214_v15  ;;  %v2929_v40 = vsel %vm2919_vm12, nan, %v2928_v19  ;;  %v3350_v45 = vor.u32 8388608, %v3349_v4  ;;  %v3356_v54 = vand.u32 31, %v3354_v22 }
 0x345   : > { %v7103_v38 = vshrl.u32 %v3094_v14, 30  ;;  %v3984_v25 = vsel %vm3960_vm0, %v6913_v33, %v2929_v40  ;;  %v3218_v49 = vcvt.s32.f32 %v3211_v52  ;;  %v7112_v28 = vsel %vm323_vm11, 1.0, %v7835_v31 }
 0x346   : > { %v3216_v26 = vand.u32 2147483647, %v3215_v63  ;;  %4017 = vst.msk [vmem:[%s5024_s21 + $0xa8] sm:$0xff] %vm3995_vm2, %v3984_v25  ;;  %v3357_v58 = vsub.s32 32, %v3356_v54  ;;  %v7117_v23 = vand.u32 3, %v3225_v46  ;;  %v3243_v12 = vshrl.u32 %v3242_v59, 23 }
 0x347   : > { %v3096_v24 = vshll.u32 %v7103_v38, 30  ;;  %v3239_v21 = vand.u32 2147483647, %v7088_v61  ;;  %v7122_v47 = vshrl.u32 %v3354_v22, 5  ;;  %v7125_v3 = vshll.u32 %v3350_v45, 8 }
 0x348   : > { %v3219_v30 = vmul.f32 %v3218_v49, %v3216_v26  ;;  %v3360_v1 = vshrl.u32 %v7818_v13, %v3357_v58  ;;  %v3359_v0 = vshll.u32 %v7827_v34, %v3356_v54  ;;  %v3363_v36 = vshrl.u32 %v7819_v57, %v3357_v58 }
 0x349   : > { %v7120_v33 = vsub.s32 %v3093_v20, %v3096_v24  ;;  %v3366_v17 = vshrl.u32 %v7820_v60, %v3357_v58  ;;  %v3362_v62 = vshll.u32 %v7818_v13, %v3356_v54  ;;  %v3365_v48 = vshll.u32 %v7819_v57, %v3356_v54 }
 0x34a   : > { %v3220_v18 = vxor.u32 2147483648, %v3219_v30  ;;  %v3369_v7 = vshrl.u32 %v7821_v9, %v3357_v58  ;;  %v3361_v43 = vor.u32 %v3360_v1, %v3359_v0  ;;  %v3368_v35 = vshll.u32 %v7820_v60, %v3356_v54 }
 0x34b   : > { %v3099_v53 = vsub.s32 0, %v7120_v33  ;;  %v4241_v55 = vadd.s32 4294967169, %v3243_v12  ;;  %v3364_v20 = vor.u32 %v3363_v36, %v3362_v62  ;;  %v3367_v4 = vor.u32 %v3366_v17, %v3365_v48  ;;  %v7892_v62 = vld [vmem:[#allocation10_spill] sm:$0xff] }
 0x34c   : > { %v3221_v11 = vsel %vm3138_vm6, %v3220_v18, %v3219_v30  ;;  %v3370_v44 = vor.u32 %v3369_v7, %v3368_v35  ;;  %v3371_v8 = vshll.u32 %v7821_v9, %v3356_v54  ;;  %v3372_v52 = vshrl.u32 %v7822_v16, %v3357_v58 }
 0x34d   : > { %v3224_v29 = vsel %vm7058_vm9, %v6856_v41, %v3221_v11  ;;  %v4234_v27 = vmin.u32 %v3099_v53, %v7120_v33  ;;  %v3358_v51 = vshrl.u32 %v7827_v34, %v3357_v58  ;;  %vm3374_vm5 = vcmp.lt.s32.totalorder %v7122_v47, 1 }
 0x34e   : > { %4512 = vcosq.f32 %v3224_v29  ;;  %v3373_v46 = vor.u32 %v3372_v52, %v3371_v8  ;;  %vm3375_vm7 = vcmp.lt.s32.totalorder %v7122_v47, 2  ;;  %vm3376_vm6 = vcmp.lt.s32.totalorder %v7122_v47, 3 }
 0x34f   : > { %4514 = vsinq.f32 %v3224_v29  ;;  %v3101_v15 = vclz %v4234_v27  ;;  %vm3377_vm3 = vcmp.lt.s32.totalorder %v7122_v47, 4  ;;  %vm3035_vm8 = vcmp.lt.s32.totalorder %v6880_v56, 0 }
 0x350   : > { %v3379_v14 = vsel %vm3377_vm3, %v3367_v4, 2102212464  ;;  %v3382_v19 = vsel %vm3374_vm5, %v3361_v43, %v3364_v20  ;;  %v3383_v63 = vsel %vm3377_vm3, %v3370_v44, 920167782  ;;  %v3378_v22 = vsel %vm3374_vm5, %v3358_v51, %v3361_v43 }
 0x351   : > { %v4235_v32 = vadd.s32 4294967294, %v3101_v15  ;;  %v3384_v59 = vsel %vm3376_vm6, %v3367_v4, %v3383_v63  ;;  %v3386_v40 = vsel %vm3374_vm5, %v3364_v20, %v3367_v4  ;;  %v3387_v45 = vsel %vm3377_vm3, %v3373_v46, 1326507024 }
 0x352   : > { %v3380_v54 = vsel %vm3376_vm6, %v3364_v20, %v3379_v14  ;;  %v3385_v25 = vsel %vm3375_vm7, %v3382_v19, %v3384_v59  ;;  %v3388_v26 = vsel %vm3376_vm6, %v3370_v44, %v3387_v45  ;;  %vm3230_vm10 = vcmp.lt.s32.totalorder %v7117_v23, 2 }
 0x353   : > { %vm4236_vm9 = vcmp.lt.s32.totalorder %v4235_v32, 0  ;;  %vm7154_vm11 = vcmp.le.f32.partialorder %v3033_v50, 0.7853982  ;;  %v3389_v58 = vsel %vm3375_vm7, %v3386_v40, %v3388_v26  ;;  %vm3228_vm12 = vweird.f32 %v6856_v41 }
 0x354   : > { %v3104_v24 = vsel %vm4236_vm9, 0, %v4235_v32  ;;  %v7161_v30 = vmul.u32.u64.low %v7125_v3, %v3385_v25  ;;  %v7162_v12 = vmul.u32.u64.high %v7125_v3, %v3385_v25, %v7161_v30  ;;  %vm3231_vm13 = vcmp.eq.s32.totalorder %v7117_v23, 0 }
 0x355   : > { %v3089_v1 = vadd.s32 %v7052_v5, %v7068_v10  ;;  %v3105_v50 = vsub.s32 32, %v3104_v24  ;;  %v3109_v18 = vsub.s32 4294967266, %v3104_v24  ;;  %v3119_v0 = vsub.s32 4, %v7103_v38 }
 0x356   : > { %v7171_v36 = vmul.u32.u64.low %v7125_v3, %v3389_v58  ;;  %v7172_v17 = vmul.u32.u64.high %v7125_v3, %v3389_v58, %v7171_v36  ;;  %v3249_v53 = vadd.s32 1, %v4241_v55  ;;  %vm322_vm14 = vcmp.eq.s32.totalorder %v4674_v6, %v7892_v62  ;;  %v583_v55 = vpop.permute.xlu1 %582 }
 0x357   : > { %v3106_v48 = vshll.u32 %v7120_v33, %v3104_v24  ;;  %v3107_v7 = vshrl.u32 %v3089_v1, %v3105_v50  ;;  %v3110_v11 = vadd.s32 127, %v3109_v18  ;;  %v3381_v43 = vsel %vm3375_vm7, %v3378_v22, %v3380_v54 }
 0x358   : > { %v4513_v5 = vpop.eup %4512  ;;  %vm3234_vm15 = vcmp.eq.s32.totalorder %v7117_v23, 2  ;;  %v3400_v10 = vadd.s32 1, %v7162_v12  ;;  %v3246_v35 = vand.u32 8388607, %v3239_v21  ;;  %vm3250_vm1 = vcmp.gt.s32.totalorder %v3249_v53, 0 }
 0x359   : > { %v4515_v29 = vpop.eup %4514  ;;  %v3235_v27 = vxor.u32 2147483648, %v4513_v5  ;;  %v3108_v20 = vor.u32 %v3107_v7, %v3106_v48  ;;  %v3111_v4 = vshll.u32 %v3110_v11, 23  ;;  %v3251_v33 = vsel %vm3250_vm1, %v3249_v53, 0 }
 0x35a   : > { %v3232_v44 = vxor.u32 2147483648, %v4515_v29  ;;  %v3120_v47 = vsel %vm3035_vm8, %v3119_v0, %v7103_v38  ;;  %v3397_v8 = vmul.u32 %v7125_v3, %v3381_v43  ;;  %vm3399_vm4 = vc.u32 %v7172_v17, %v7161_v30 }
 0x35b   : > { %v3236_v52 = vsel %vm3234_vm15, %v3235_v27, %v4515_v29  ;;  %v3112_v15 = vor.u32 4788187, %v3111_v4  ;;  %v3401_v51 = vsel %vm3399_vm4, %v3400_v10, %v7162_v12  ;;  %v628_v46 = vmul.f32 %v4725_v37, %v583_v55 }
 0x35c   : > { %v3233_v32 = vsel %vm3231_vm13, %v4513_v5, %v3232_v44  ;;  %v3402_v14 = vadd.s32 %v3401_v51, %v3397_v8  ;;  %v3247_v19 = vor.u32 8388608, %v3246_v35  ;;  %v3253_v63 = vand.u32 31, %v3251_v33 }
 0x35d   : > { %v3237_v38 = vsel %vm3230_vm10, %v3233_v32, %v3236_v52  ;;  %v3113_v3 = vand.u32 2147483647, %v3112_v15  ;;  %v3115_v22 = vcvt.s32.f32 %v3108_v20  ;;  %v3122_v59 = vsel %vm7154_vm11, 0, %v3120_v47 }
 0x35e   : > { %v3238_v40 = vsel %vm3228_vm12, nan, %v3237_v38  ;;  %v3403_v45 = vadd.s32 536870912, %v3402_v14  ;;  %v3252_v54 = vshrl.u32 %v3251_v33, 5  ;;  %v3254_v25 = vsub.s32 32, %v3253_v63 }
 0x35f   : > { %v3987_v26 = vsel %vm3960_vm0, %v7112_v28, %v3238_v40  ;;  %v3116_v24 = vmul.f32 %v3115_v22, %v3113_v3  ;;  %v3256_v58 = vshll.u32 %v7827_v34, %v3253_v63  ;;  %v3259_v23 = vshll.u32 %v7818_v13, %v3253_v63 }
 0x360   : > { %4020 = vst.msk [vmem:[%s5024_s21 + $0xc0] sm:$0xff] %vm3995_vm2, %v3987_v26  ;;  %v7206_v12 = vshrl.u32 %v3403_v45, 30  ;;  %v3257_v1 = vshrl.u32 %v7818_v13, %v3254_v25  ;;  %v3260_v41 = vshrl.u32 %v7819_v57, %v3254_v25  ;;  %v3262_v50 = vshll.u32 %v7819_v57, %v3253_v63 }
 0x361   : > { %v3117_v18 = vxor.u32 2147483648, %v3116_v24  ;;  %v3263_v0 = vshrl.u32 %v7820_v60, %v3254_v25  ;;  %v3265_v28 = vshll.u32 %v7820_v60, %v3253_v63  ;;  %v3266_v36 = vshrl.u32 %v7821_v9, %v3254_v25 }
 0x362   : > { %v7218_v53 = vsel %vm322_vm14, 1.0, %v7835_v31  ;;  %v7220_v48 = vand.u32 3, %v3122_v59  ;;  %v3405_v7 = vshll.u32 %v7206_v12, 30  ;;  %v3258_v11 = vor.u32 %v3257_v1, %v3256_v58 }
 0x363   : > { %v3118_v43 = vsel %vm3035_vm8, %v3117_v18, %v3116_v24  ;;  %v3261_v5 = vor.u32 %v3260_v41, %v3259_v23  ;;  %v3264_v10 = vor.u32 %v3263_v0, %v3262_v50  ;;  %v3267_v35 = vor.u32 %v3266_v36, %v3265_v28  ;;  %v578_v24 = vpop.permute.xlu0 %577  ;;  %v7895_v41 = vld [vmem:[#allocation12_spill] sm:$0xff]  ;;  %v7896_v18 = vld [vmem:[#allocation14_spill] sm:$0xff] }
 0x364   : > { %v3121_v55 = vsel %vm7154_vm11, %v6880_v56, %v3118_v43  ;;  %v7228_v29 = vsub.s32 %v3402_v14, %v3405_v7  ;;  %v3268_v62 = vshll.u32 %v7821_v9, %v3253_v63  ;;  %v3269_v27 = vshrl.u32 %v7822_v16, %v3254_v25 }
 0x365   : > { %4516 = vcosq.f32 %v3121_v55  ;;  %vm3344_vm5 = vcmp.lt.s32.totalorder %v7026_v42, 0  ;;  %vm3271_vm7 = vcmp.lt.s32.totalorder %v3252_v54, 1  ;;  %v7233_v20 = vshll.u32 %v3247_v19, 8 }
 0x366   : > { %v7236_v4 = vadd.f32 %v628_v46, %v4729_v39  ;;  %4518 = vsinq.f32 %v3121_v55  ;;  %v3408_v33 = vsub.s32 0, %v7228_v29  ;;  %v3270_v49 = vor.u32 %v3269_v27, %v3268_v62 }
 0x367   : > { %vm3274_vm6 = vcmp.lt.s32.totalorder %v3252_v54, 4  ;;  %v3255_v44 = vshrl.u32 %v7827_v34, %v3254_v25  ;;  %v3279_v8 = vsel %vm3271_vm7, %v3258_v11, %v3261_v5  ;;  %vm3272_vm3 = vcmp.lt.s32.totalorder %v3252_v54, 2 }
 0x368   : > { %v3276_v47 = vsel %vm3274_vm6, %v3264_v10, 2102212464  ;;  %v3280_v52 = vsel %vm3274_vm6, %v3267_v35, 920167782  ;;  %v4246_v15 = vmin.u32 %v3408_v33, %v7228_v29  ;;  %vm3273_vm8 = vcmp.lt.s32.totalorder %v3252_v54, 3 }
 0x369   : > { %v3283_v51 = vsel %vm3271_vm7, %v3261_v5, %v3264_v10  ;;  %v3275_v32 = vsel %vm3271_vm7, %v3255_v44, %v3258_v11  ;;  %v3277_v14 = vsel %vm3273_vm8, %v3261_v5, %v3276_v47  ;;  %v3281_v19 = vsel %vm3273_vm8, %v3264_v10, %v3280_v52 }
 0x36a   : > { %v3284_v46 = vsel %vm3274_vm6, %v3270_v49, 1326507024  ;;  %v3410_v63 = vclz %v4246_v15  ;;  %v3428_v38 = vsub.s32 4, %v7206_v12  ;;  %v3282_v3 = vsel %vm3272_vm3, %v3279_v8, %v3281_v19 }
 0x36b   : > { %v3285_v22 = vsel %vm3273_vm8, %v3267_v35, %v3284_v46  ;;  %vm7245_vm9 = vcmp.le.f32.partialorder %v3342_v2, 0.7853982  ;;  %v7251_v45 = vmul.u32.u64.low %v7233_v20, %v3282_v3  ;;  %v7252_v25 = vmul.u32.u64.high %v7233_v20, %v3282_v3, %v7251_v45 }
 0x36c   : > { %v3286_v40 = vsel %vm3272_vm3, %v3283_v51, %v3285_v22  ;;  %v3548_v26 = vand.u32 2147483647, %v7236_v4  ;;  %vm3125_vm10 = vweird.f32 %v6880_v56  ;;  %v4247_v58 = vadd.s32 4294967294, %v3410_v63 }
 0x36d   : > { %v3278_v23 = vsel %vm3272_vm3, %v3275_v32, %v3277_v14  ;;  %v7259_v2 = vmul.u32.u64.low %v7233_v20, %v3286_v40  ;;  %v7260_v1 = vmul.u32.u64.high %v7233_v20, %v3286_v40, %v7259_v2  ;;  %vm324_vm11 = vcmp.eq.s32.totalorder %v4674_v6, %v7895_v41 }
 0x36e   : > { %vm3127_vm12 = vcmp.lt.s32.totalorder %v7220_v48, 2  ;;  %vm3128_vm13 = vcmp.eq.s32.totalorder %v7220_v48, 0  ;;  %vm3131_vm14 = vcmp.eq.s32.totalorder %v7220_v48, 2  ;;  %v3551_v50 = vand.u32 2139095040, %v7236_v4 }
 0x36f   : > { %vm325_vm15 = vcmp.eq.s32.totalorder %v4674_v6, %v7896_v18  ;;  %v3398_v54 = vadd.s32 %v7161_v30, %v7172_v17  ;;  %vm4248_vm1 = vcmp.lt.s32.totalorder %v4247_v58, 0  ;;  %v3429_v0 = vsel %vm3344_vm5, %v3428_v38, %v7206_v12  ;;  %v4517_v36 = vpop.eup %4516  ;;  %v593_v17 = vpop.permute.xlu1 %592 }
 0x370   : > { %v627_v28 = vmul.f32 %v4725_v37, %v578_v24  ;;  %v3413_v7 = vsel %vm4248_vm1, 0, %v4247_v58  ;;  %v3294_v11 = vmul.u32 %v7233_v20, %v3278_v23  ;;  %v3297_v43 = vadd.s32 1, %v7252_v25  ;;  %v4519_v10 = vpop.eup %4518 }
 0x371   : > { %v3552_v5 = vshrl.u32 %v3551_v50, 23  ;;  %v3132_v35 = vxor.u32 2147483648, %v4517_v36  ;;  %v3414_v55 = vsub.s32 32, %v3413_v7  ;;  %v3418_v62 = vsub.s32 4294967266, %v3413_v7 }
 0x372   : > { %v3555_v30 = vand.u32 8388607, %v3548_v26  ;;  %v3129_v27 = vxor.u32 2147483648, %v4519_v10  ;;  %v3415_v12 = vshll.u32 %v7228_v29, %v3413_v7  ;;  %vm3296_vm4 = vc.u32 %v7260_v1, %v7251_v45 }
 0x373   : > { %v4253_v33 = vadd.s32 4294967169, %v3552_v5  ;;  %v3133_v20 = vsel %vm3131_vm14, %v3132_v35, %v4519_v10  ;;  %v3416_v49 = vshrl.u32 %v3398_v54, %v3414_v55  ;;  %v3419_v44 = vadd.s32 127, %v3418_v62 }
 0x374   : > { %v3298_v47 = vsel %vm3296_vm4, %v3297_v43, %v7252_v25  ;;  %v3130_v8 = vsel %vm3128_vm13, %v4517_v36, %v3129_v27  ;;  %v630_v51 = vmul.f32 %v4725_v37, %v593_v17  ;;  %v3431_v19 = vsel %vm7245_vm9, 0, %v3429_v0 }
 0x375   : > { %v3299_v52 = vadd.s32 %v3298_v47, %v3294_v11  ;;  %v3558_v15 = vadd.s32 1, %v4253_v33  ;;  %v3134_v29 = vsel %vm3127_vm12, %v3130_v8, %v3133_v20  ;;  %v3417_v32 = vor.u32 %v3416_v49, %v3415_v12 }
 0x376   : > { %v3420_v14 = vshll.u32 %v3419_v44, 23  ;;  %v3135_v46 = vsel %vm3125_vm10, nan, %v3134_v29  ;;  %v7296_v38 = vadd.f32 %v627_v28, %v4729_v39  ;;  %v3556_v48 = vor.u32 8388608, %v3555_v30 }
 0x377   : > { %v3300_v63 = vadd.s32 536870912, %v3299_v52  ;;  %vm3559_vm7 = vcmp.gt.s32.totalorder %v3558_v15, 0  ;;  %v3986_v3 = vsel %vm3960_vm0, %v7218_v53, %v3135_v46  ;;  %v7309_v56 = vsel %vm324_vm11, 1.0, %v7835_v31 }
 0x378   : > { %v3421_v22 = vor.u32 4788187, %v3420_v14  ;;  %v3560_v40 = vsel %vm3559_vm7, %v3558_v15, 0  ;;  %4019 = vst.msk [vmem:[%s5024_s21 + $0xb8] sm:$0xff] %vm3995_vm2, %v3986_v3  ;;  %v3424_v23 = vcvt.s32.f32 %v3417_v32  ;;  %v7315_v53 = vsel %vm325_vm15, 1.0, %v7835_v31 }
 0x379   : > { %v7303_v25 = vshrl.u32 %v3300_v63, 30  ;;  %v3562_v24 = vand.u32 31, %v3560_v40  ;;  %v7317_v2 = vand.u32 3, %v3431_v19  ;;  %v7320_v28 = vshll.u32 %v3556_v48, 8 }
 0x37a   : > { %v3422_v58 = vand.u32 2147483647, %v3421_v22  ;;  %v3445_v41 = vand.u32 2147483647, %v7296_v38  ;;  %v7324_v36 = vadd.f32 %v630_v51, %v4729_v39  ;;  %v7328_v11 = vshrl.u32 %v3560_v40, 5 }
 0x37b   : > { %v3302_v50 = vshll.u32 %v7303_v25, 30  ;;  %v3563_v54 = vsub.s32 32, %v3562_v24  ;;  %v3448_v43 = vand.u32 2139095040, %v7296_v38  ;;  %v3565_v10 = vshll.u32 %v7827_v34, %v3562_v24 }
 0x37c   : > { %v3425_v0 = vmul.f32 %v3424_v23, %v3422_v58  ;;  %v3568_v30 = vshll.u32 %v7818_v13, %v3562_v24  ;;  %v3571_v17 = vshll.u32 %v7819_v57, %v3562_v24  ;;  %v3325_v33 = vsub.s32 4, %v7303_v25 }
 0x37d   : > { %v7326_v7 = vsub.s32 %v3299_v52, %v3302_v50  ;;  %v3566_v18 = vshrl.u32 %v7818_v13, %v3563_v54  ;;  %v3569_v35 = vshrl.u32 %v7819_v57, %v3563_v54  ;;  %v3572_v55 = vshrl.u32 %v7820_v60, %v3563_v54 }
 0x37e   : > { %v3426_v5 = vxor.u32 2147483648, %v3425_v0  ;;  %v3575_v27 = vshrl.u32 %v7821_v9, %v3563_v54  ;;  %v3574_v49 = vshll.u32 %v7820_v60, %v3562_v24  ;;  %vm3241_vm6 = vcmp.lt.s32.totalorder %v7088_v61, 0 }
 0x37f   : > { %v3305_v62 = vsub.s32 0, %v7326_v7  ;;  %v3567_v20 = vor.u32 %v3566_v18, %v3565_v10  ;;  %v3570_v8 = vor.u32 %v3569_v35, %v3568_v30  ;;  %v3573_v52 = vor.u32 %v3572_v55, %v3571_v17  ;;  %v588_v30 = vpop.permute.xlu0 %587 }
 0x380   : > { %v3427_v12 = vsel %vm3344_vm5, %v3426_v5, %v3425_v0  ;;  %v3576_v15 = vor.u32 %v3575_v27, %v3574_v49  ;;  %v3577_v51 = vshll.u32 %v7821_v9, %v3562_v24  ;;  %v3578_v29 = vshrl.u32 %v7822_v16, %v3563_v54 }
 0x381   : > { %v3430_v44 = vsel %vm7245_vm9, %v7026_v42, %v3427_v12  ;;  %v4242_v47 = vmin.u32 %v3305_v62, %v7326_v7  ;;  %v3564_v14 = vshrl.u32 %v7827_v34, %v3563_v54  ;;  %vm3580_vm5 = vcmp.lt.s32.totalorder %v7328_v11, 1 }
 0x382   : > { %4520 = vcosq.f32 %v3430_v44  ;;  %vm7354_vm3 = vcmp.le.f32.partialorder %v3239_v21, 0.7853982  ;;  %v3579_v19 = vor.u32 %v3578_v29, %v3577_v51  ;;  %vm3581_vm8 = vcmp.lt.s32.totalorder %v7328_v11, 2 }
 0x383   : > { %4522 = vsinq.f32 %v3430_v44  ;;  %v3307_v32 = vclz %v4242_v47  ;;  %vm3582_vm9 = vcmp.lt.s32.totalorder %v7328_v11, 3  ;;  %vm3583_vm10 = vcmp.lt.s32.totalorder %v7328_v11, 4 }
 0x384   : > { %v3585_v63 = vsel %vm3583_vm10, %v3573_v52, 2102212464  ;;  %v3588_v3 = vsel %vm3580_vm5, %v3567_v20, %v3570_v8  ;;  %v3589_v22 = vsel %vm3583_vm10, %v3576_v15, 920167782  ;;  %vm3440_vm11 = vcmp.eq.s32.totalorder %v7317_v2, 2 }
 0x385   : > { %v4243_v46 = vadd.s32 4294967294, %v3307_v32  ;;  %v3584_v48 = vsel %vm3580_vm5, %v3564_v14, %v3567_v20  ;;  %v3590_v40 = vsel %vm3582_vm9, %v3573_v52, %v3589_v22  ;;  %v3592_v24 = vsel %vm3580_vm5, %v3570_v8, %v3573_v52 }
 0x386   : > { %v3593_v21 = vsel %vm3583_vm10, %v3579_v19, 1326507024  ;;  %vm3437_vm12 = vcmp.eq.s32.totalorder %v7317_v2, 0  ;;  %v3586_v58 = vsel %vm3582_vm9, %v3570_v8, %v3585_v63  ;;  %v3591_v23 = vsel %vm3581_vm8, %v3588_v3, %v3590_v40 }
 0x387   : > { %vm4244_vm13 = vcmp.lt.s32.totalorder %v4243_v46, 0  ;;  %v3594_v50 = vsel %vm3582_vm9, %v3576_v15, %v3593_v21  ;;  %vm3436_vm14 = vcmp.lt.s32.totalorder %v7317_v2, 2  ;;  %vm3434_vm15 = vweird.f32 %v7026_v42 }
 0x388   : > { %v3310_v54 = vsel %vm4244_vm13, 0, %v4243_v46  ;;  %v3595_v0 = vsel %vm3581_vm8, %v3592_v24, %v3594_v50  ;;  %v7369_v18 = vmul.u32.u64.low %v7320_v28, %v3591_v23  ;;  %v7370_v5 = vmul.u32.u64.high %v7320_v28, %v3591_v23, %v7369_v18 }
 0x389   : > { %v3295_v10 = vadd.s32 %v7251_v45, %v7260_v1  ;;  %v3311_v35 = vsub.s32 32, %v3310_v54  ;;  %v3315_v55 = vsub.s32 4294967266, %v3310_v54  ;;  %v3452_v62 = vand.u32 8388607, %v3445_v41 }
 0x38a   : > { %v3326_v17 = vsel %vm3241_vm6, %v3325_v33, %v7303_v25  ;;  %v7382_v27 = vmul.u32.u64.low %v7320_v28, %v3595_v0  ;;  %v7383_v12 = vmul.u32.u64.high %v7320_v28, %v3595_v0, %v7382_v27  ;;  %v3449_v20 = vshrl.u32 %v3448_v43, 23 }
 0x38b   : > { %v3312_v49 = vshll.u32 %v7326_v7, %v3310_v54  ;;  %v3313_v44 = vshrl.u32 %v3295_v10, %v3311_v35  ;;  %v3316_v47 = vadd.s32 127, %v3315_v55  ;;  %v3587_v45 = vsel %vm3581_vm8, %v3584_v48, %v3586_v58 }
 0x38c   : > { %v4521_v1 = vpop.eup %4520  ;;  %v3606_v8 = vadd.s32 1, %v7370_v5  ;;  %v4249_v52 = vadd.s32 4294967169, %v3449_v20  ;;  %v3757_v15 = vand.u32 2139095040, %v7324_v36  ;;  %v7391_v25 = vmul.f32 %v4725_v37, %v588_v30 }
 0x38d   : > { %v4523_v33 = vpop.eup %4522  ;;  %v3441_v51 = vxor.u32 2147483648, %v4521_v1  ;;  %v3314_v29 = vor.u32 %v3313_v44, %v3312_v49  ;;  %v3317_v43 = vshll.u32 %v3316_v47, 23  ;;  %v3328_v7 = vsel %vm7354_vm3, 0, %v3326_v17 }
 0x38e   : > { %v3438_v32 = vxor.u32 2147483648, %v4523_v33  ;;  %v3603_v11 = vmul.u32 %v7320_v28, %v3587_v45  ;;  %vm3605_vm1 = vc.u32 %v7383_v12, %v7369_v18  ;;  %v3455_v14 = vadd.s32 1, %v4249_v52 }
 0x38f   : > { %v3442_v19 = vsel %vm3440_vm11, %v3441_v51, %v4523_v33  ;;  %v3318_v46 = vor.u32 4788187, %v3317_v43  ;;  %v3607_v63 = vsel %vm3605_vm1, %v3606_v8, %v7370_v5  ;;  %v3453_v3 = vor.u32 8388608, %v3452_v62 }
 0x390   : > { %v3439_v22 = vsel %vm3437_vm12, %v4521_v1, %v3438_v32  ;;  %v3608_v48 = vadd.s32 %v3607_v63, %v3603_v11  ;;  %vm3456_vm4 = vcmp.gt.s32.totalorder %v3455_v14, 0  ;;  %v3758_v40 = vshrl.u32 %v3757_v15, 23 }
 0x391   : > { %v3443_v28 = vsel %vm3436_vm14, %v3439_v22, %v3442_v19  ;;  %v3319_v24 = vand.u32 2147483647, %v3318_v46  ;;  %v3321_v21 = vcvt.s32.f32 %v3314_v29  ;;  %v3457_v58 = vsel %vm3456_vm4, %v3455_v14, 0 }
 0x392   : > { %v3444_v23 = vsel %vm3434_vm15, nan, %v3443_v28  ;;  %v7407_v50 = vand.u32 3, %v3328_v7  ;;  %v3609_v54 = vadd.s32 536870912, %v3608_v48  ;;  %v3459_v0 = vand.u32 31, %v3457_v58 }
 0x393   : > { %v3989_v5 = vsel %vm3960_vm0, %v7315_v53, %v3444_v23  ;;  %v3322_v10 = vmul.f32 %v3321_v21, %v3319_v24  ;;  %v3458_v35 = vshrl.u32 %v3457_v58, 5  ;;  %v7412_v55 = vshll.u32 %v3453_v3, 8 }
 0x394   : > { %4022 = vst.msk [vmem:[%s5024_s21 + $0xd0] sm:$0xff] %vm3995_vm2, %v3989_v5  ;;  %v7416_v2 = vshrl.u32 %v3609_v54, 30  ;;  %v3460_v62 = vsub.s32 32, %v3459_v0  ;;  %v3462_v42 = vshll.u32 %v7827_v34, %v3459_v0  ;;  %v4261_v30 = vadd.s32 4294967169, %v3758_v40 }
 0x395   : > { %v3323_v17 = vxor.u32 2147483648, %v3322_v10  ;;  %v3465_v27 = vshll.u32 %v7818_v13, %v3459_v0  ;;  %v3468_v20 = vshll.u32 %v7819_v57, %v3459_v0  ;;  %v3471_v49 = vshll.u32 %v7820_v60, %v3459_v0 }
 0x396   : > { %v3611_v53 = vshll.u32 %v7416_v2, 30  ;;  %v3463_v44 = vshrl.u32 %v7818_v13, %v3460_v62  ;;  %v3466_v47 = vshrl.u32 %v7819_v57, %v3460_v62  ;;  %v3474_v45 = vshll.u32 %v7821_v9, %v3459_v0 }
 0x397   : > { %v3324_v1 = vsel %vm3241_vm6, %v3323_v17, %v3322_v10  ;;  %v3469_v8 = vshrl.u32 %v7820_v60, %v3460_v62  ;;  %v3472_v52 = vshrl.u32 %v7821_v9, %v3460_v62  ;;  %v3475_v15 = vshrl.u32 %v7822_v16, %v3460_v62 }
 0x398   : > { %v3327_v33 = vsel %vm7354_vm3, %v7088_v61, %v3324_v1  ;;  %v7434_v51 = vsub.s32 %v3608_v48, %v3611_v53  ;;  %v3464_v29 = vor.u32 %v3463_v44, %v3462_v42  ;;  %v3467_v43 = vor.u32 %v3466_v47, %v3465_v27 }
 0x399   : > { %4524 = vcosq.f32 %v3327_v33  ;;  %v3470_v7 = vor.u32 %v3469_v8, %v3468_v20  ;;  %v3473_v32 = vor.u32 %v3472_v52, %v3471_v49  ;;  %v3476_v11 = vor.u32 %v3475_v15, %v3474_v45 }
 0x39a   : > { %4526 = vsinq.f32 %v3327_v33  ;;  %v3614_v14 = vsub.s32 0, %v7434_v51  ;;  %v3461_v19 = vshrl.u32 %v7827_v34, %v3460_v62  ;;  %vm3477_vm7 = vcmp.lt.s32.totalorder %v3458_v35, 1 }
 0x39b   : > { %vm3478_vm6 = vcmp.lt.s32.totalorder %v3458_v35, 2  ;;  %vm3479_vm5 = vcmp.lt.s32.totalorder %v3458_v35, 3  ;;  %vm3480_vm8 = vcmp.lt.s32.totalorder %v3458_v35, 4  ;;  %v3485_v46 = vsel %vm3477_vm7, %v3464_v29, %v3467_v43 }
 0x39c   : > { %v4254_v59 = vmin.u32 %v3614_v14, %v7434_v51  ;;  %v3482_v63 = vsel %vm3480_vm8, %v3470_v7, 2102212464  ;;  %v3486_v3 = vsel %vm3480_vm8, %v3473_v32, 920167782  ;;  %v3489_v22 = vsel %vm3477_vm7, %v3467_v43, %v3470_v7 }
 0x39d   : > { %v3481_v48 = vsel %vm3477_vm7, %v3461_v19, %v3464_v29  ;;  %v3487_v40 = vsel %vm3479_vm5, %v3470_v7, %v3486_v3  ;;  %v3490_v28 = vsel %vm3480_vm8, %v3476_v11, 1326507024  ;;  %v3764_v24 = vadd.s32 1, %v4261_v30 }
 0x39e   : > { %v3616_v21 = vclz %v4254_v59  ;;  %v3483_v58 = vsel %vm3479_vm5, %v3467_v43, %v3482_v63  ;;  %v3488_v23 = vsel %vm3478_vm6, %v3485_v46, %v3487_v40  ;;  %v3491_v54 = vsel %vm3479_vm5, %v3473_v32, %v3490_v28 }
 0x39f   : > { %v3492_v0 = vsel %vm3478_vm6, %v3489_v22, %v3491_v54  ;;  %v7442_v5 = vmul.u32.u64.low %v7412_v55, %v3488_v23  ;;  %v7443_v10 = vmul.u32.u64.high %v7412_v55, %v3488_v23, %v7442_v5  ;;  %v3754_v62 = vand.u32 2147483647, %v7324_v36 }
 0x3a0   : > { %vm3331_vm3 = vweird.f32 %v7088_v61  ;;  %v4255_v42 = vadd.s32 4294967294, %v3616_v21  ;;  %v7449_v17 = vmul.u32.u64.low %v7412_v55, %v3492_v0  ;;  %v7450_v30 = vmul.u32.u64.high %v7412_v55, %v3492_v0, %v7449_v17 }
 0x3a1   : > { %vm3765_vm9 = vcmp.gt.s32.totalorder %v3764_v24, 0  ;;  %vm3333_vm10 = vcmp.lt.s32.totalorder %v7407_v50, 2  ;;  %vm3334_vm11 = vcmp.eq.s32.totalorder %v7407_v50, 0  ;;  %v3484_v27 = vsel %vm3478_vm6, %v3481_v48, %v3483_v58 }
 0x3a2   : > { %v3766_v20 = vsel %vm3765_vm9, %v3764_v24, 0  ;;  %vm3337_vm12 = vcmp.eq.s32.totalorder %v7407_v50, 2  ;;  %vm4256_vm13 = vcmp.lt.s32.totalorder %v4255_v42, 0  ;;  %v7458_v53 = vadd.f32 %v7391_v25, %v4729_v39 }
 0x3a3   : > { %v3768_v49 = vand.u32 31, %v3766_v20  ;;  %v4525_v44 = vpop.eup %4524  ;;  %v3604_v47 = vadd.s32 %v7369_v18, %v7383_v12  ;;  %v3619_v45 = vsel %vm4256_vm13, 0, %v4255_v42  ;;  %v3503_v1 = vadd.s32 1, %v7443_v10 }
 0x3a4   : > { %v3761_v35 = vand.u32 8388607, %v3754_v62  ;;  %v4527_v8 = vpop.eup %4526  ;;  %v3338_v52 = vxor.u32 2147483648, %v4525_v44  ;;  %v3620_v15 = vsub.s32 32, %v3619_v45  ;;  %v3624_v33 = vsub.s32 4294967266, %v3619_v45 }
 0x3a5   : > { %v3500_v29 = vmul.u32 %v7412_v55, %v3484_v27  ;;  %v3335_v43 = vxor.u32 2147483648, %v4527_v8  ;;  %v3621_v25 = vshll.u32 %v7434_v51, %v3619_v45  ;;  %vm3502_vm14 = vc.u32 %v7450_v30, %v7442_v5 }
 0x3a6   : > { %v3769_v7 = vsub.s32 32, %v3768_v49  ;;  %v3339_v18 = vsel %vm3337_vm12, %v3338_v52, %v4527_v8  ;;  %v3622_v12 = vshrl.u32 %v3604_v47, %v3620_v15  ;;  %v3625_v32 = vadd.s32 127, %v3624_v33 }
 0x3a7   : > { %v3504_v11 = vsel %vm3502_vm14, %v3503_v1, %v7443_v10  ;;  %v3336_v14 = vsel %vm3334_vm11, %v4525_v44, %v3335_v43  ;;  %v3762_v55 = vor.u32 8388608, %v3761_v35  ;;  %v3767_v46 = vshrl.u32 %v3766_v20, 5 }
 0x3a8   : > { %v3505_v19 = vadd.s32 %v3504_v11, %v3500_v29  ;;  %v3340_v51 = vsel %vm3333_vm10, %v3336_v14, %v3339_v18  ;;  %v3623_v59 = vor.u32 %v3622_v12, %v3621_v25  ;;  %v3626_v63 = vshll.u32 %v3625_v32, 23 }
 0x3a9   : > { %v3772_v3 = vshrl.u32 %v7818_v13, %v3769_v7  ;;  %v3341_v22 = vsel %vm3331_vm3, nan, %v3340_v51  ;;  %v3771_v40 = vshll.u32 %v7827_v34, %v3768_v49  ;;  %v3775_v28 = vshrl.u32 %v7819_v57, %v3769_v7 }
 0x3aa   : > { %v3506_v48 = vadd.s32 536870912, %v3505_v19  ;;  %v3988_v24 = vsel %vm3960_vm0, %v7309_v56, %v3341_v22  ;;  %v3627_v21 = vor.u32 4788187, %v3626_v63  ;;  %v3630_v58 = vcvt.s32.f32 %v3623_v59 }
 0x3ab   : > { %v3774_v50 = vshll.u32 %v7818_v13, %v3768_v49  ;;  %4021 = vst.msk [vmem:[%s5024_s21 + $0xc8] sm:$0xff] %vm3995_vm2, %v3988_v24  ;;  %v3773_v54 = vor.u32 %v3772_v3, %v3771_v40  ;;  %v3777_v61 = vshll.u32 %v7819_v57, %v3768_v49  ;;  %v3778_v0 = vshrl.u32 %v7820_v60, %v3769_v7 }
 0x3ac   : > { %v7487_v23 = vshrl.u32 %v3506_v48, 30  ;;  %v3628_v10 = vand.u32 2147483647, %v3627_v21  ;;  %v3780_v17 = vshll.u32 %v7820_v60, %v3768_v49  ;;  %v3781_v27 = vshrl.u32 %v7821_v9, %v3769_v7 }
 0x3ad   : > { %v3776_v42 = vor.u32 %v3775_v28, %v3774_v50  ;;  %v3779_v20 = vor.u32 %v3778_v0, %v3777_v61  ;;  %v3783_v44 = vshll.u32 %v7821_v9, %v3768_v49  ;;  %v3784_v47 = vshrl.u32 %v7822_v16, %v3769_v7 }
 0x3ae   : > { %v3508_v56 = vshll.u32 %v7487_v23, 30  ;;  %v3770_v45 = vshrl.u32 %v7827_v34, %v3769_v7  ;;  %v3782_v1 = vor.u32 %v3781_v27, %v3780_v17  ;;  %vm3786_vm15 = vcmp.lt.s32.totalorder %v3767_v46, 1 }
 0x3af   : > { %v3802_v35 = vshll.u32 %v3762_v55, 8  ;;  %v3631_v8 = vmul.f32 %v3630_v58, %v3628_v10  ;;  %v3785_v15 = vor.u32 %v3784_v47, %v3783_v44  ;;  %vm3789_vm1 = vcmp.lt.s32.totalorder %v3767_v46, 4 }
 0x3b0   : > { %v7497_v52 = vsub.s32 %v3505_v19, %v3508_v56  ;;  %vm3788_vm4 = vcmp.lt.s32.totalorder %v3767_v46, 3  ;;  %v3791_v33 = vsel %vm3789_vm1, %v3779_v20, 2102212464  ;;  %v3794_v29 = vsel %vm3786_vm15, %v3773_v54, %v3776_v42 }
 0x3b1   : > { %v3795_v43 = vsel %vm3789_vm1, %v3782_v1, 920167782  ;;  %vm3787_vm7 = vcmp.lt.s32.totalorder %v3767_v46, 2  ;;  %v3798_v18 = vsel %vm3786_vm15, %v3776_v42, %v3779_v20  ;;  %v3799_v12 = vsel %vm3789_vm1, %v3785_v15, 1326507024 }
 0x3b2   : > { %v3511_v25 = vsub.s32 0, %v7497_v52  ;;  %v3796_v49 = vsel %vm3788_vm4, %v3779_v20, %v3795_v43  ;;  %v3651_v32 = vand.u32 2147483647, %v7458_v53  ;;  %v3654_v11 = vand.u32 2139095040, %v7458_v53 }
 0x3b3   : > { %v3797_v7 = vsel %vm3787_vm7, %v3794_v29, %v3796_v49  ;;  %v3790_v19 = vsel %vm3786_vm15, %v3770_v45, %v3773_v54  ;;  %v3792_v55 = vsel %vm3788_vm4, %v3776_v42, %v3791_v33  ;;  %v3800_v51 = vsel %vm3788_vm4, %v3782_v1, %v3799_v12 }
 0x3b4   : > { %v4250_v14 = vmin.u32 %v3511_v25, %v7497_v52  ;;  %v3632_v59 = vxor.u32 2147483648, %v3631_v8  ;;  %v3801_v63 = vsel %vm3787_vm7, %v3798_v18, %v3800_v51  ;;  %v3793_v24 = vsel %vm3787_vm7, %v3790_v19, %v3792_v55 }
 0x3b5   : > { %v7508_v3 = vmul.u32.u64.low %v3802_v35, %v3797_v7  ;;  %v7509_v22 = vmul.u32.u64.high %v3802_v35, %v3797_v7, %v7508_v3  ;;  %v7512_v40 = vmul.u32.u64.low %v3802_v35, %v3801_v63  ;;  %v7513_v28 = vmul.u32.u64.high %v3802_v35, %v3801_v63, %v7512_v40 }
 0x3b6   : > { %v3513_v48 = vclz %v4250_v14  ;;  %v3655_v21 = vshrl.u32 %v3654_v11, 23  ;;  %v3658_v58 = vand.u32 8388607, %v3651_v32  ;;  %vm7520_vm6 = vcmp.le.f32.partialorder %v3548_v26, 0.7853982 }
 0x3b7   : > { %vm3550_vm5 = vcmp.lt.s32.totalorder %v7236_v4, 0  ;;  %vm3447_vm8 = vcmp.lt.s32.totalorder %v7296_v38, 0  ;;  %v3812_v46 = vadd.s32 1, %v7509_v22  ;;  %v3531_v10 = vsub.s32 4, %v7487_v23 }
 0x3b8   : > { %v4251_v54 = vadd.s32 4294967294, %v3513_v48  ;;  %v3633_v61 = vsel %vm3550_vm5, %v3632_v59, %v3631_v8  ;;  %v4257_v0 = vadd.s32 4294967169, %v3655_v21  ;;  %v3501_v42 = vadd.s32 %v7442_v5, %v7450_v30  ;;  %v598_v8 = vpop.permute.xlu0 %597 }
 0x3b9   : > { %v3809_v26 = vmul.u32 %v3802_v35, %v3793_v24  ;;  %vm3811_vm9 = vc.u32 %v7513_v28, %v7508_v3  ;;  %v3659_v56 = vor.u32 8388608, %v3658_v58  ;;  %v7538_v44 = vsel %vm7520_vm6, %v7236_v4, %v3633_v61 }
 0x3ba   : > { %vm4252_vm3 = vcmp.lt.s32.totalorder %v4251_v54, 0  ;;  %v3813_v27 = vsel %vm3811_vm9, %v3812_v46, %v7509_v22  ;;  %v3661_v20 = vadd.s32 1, %v4257_v0  ;;  %vm7542_vm10 = vcmp.le.f32.partialorder %v3445_v41, 0.7853982 }
 0x3bb   : > { %v3516_v17 = vsel %vm4252_vm3, 0, %v4251_v54  ;;  %v3814_v1 = vadd.s32 %v3813_v27, %v3809_v26  ;;  %v7550_v35 = vsel %vm3447_vm8, %v3531_v10, %v7487_v23  ;;  %4528 = vsinq.f32 %v7538_v44 }
 0x3bc   : > { %v3517_v47 = vsub.s32 32, %v3516_v17  ;;  %v3521_v45 = vsub.s32 4294967266, %v3516_v17  ;;  %v3518_v30 = vshll.u32 %v7497_v52, %v3516_v17  ;;  %vm3662_vm11 = vcmp.gt.s32.totalorder %v3661_v20, 0 }
 0x3bd   : > { %v3815_v29 = vadd.s32 536870912, %v3814_v1  ;;  %v3663_v43 = vsel %vm3662_vm11, %v3661_v20, 0  ;;  %v7553_v49 = vshll.u32 %v3659_v56, 8  ;;  %v631_v41 = vmul.f32 %v4725_v37, %v598_v8 }
 0x3be   : > { %v3519_v15 = vshrl.u32 %v3501_v42, %v3517_v47  ;;  %v3522_v33 = vadd.s32 127, %v3521_v45  ;;  %v3665_v25 = vand.u32 31, %v3663_v43  ;;  %v3534_v23 = vsel %vm7542_vm10, 0, %v7550_v35  ;;  %v286_v42 = vpop.permute.xlu1 %285 }
 0x3bf   : > { %v7556_v52 = vshrl.u32 %v3815_v29, 30  ;;  %v3664_v12 = vshrl.u32 %v3663_v43, 5  ;;  %v7576_v56 = vadd.f32 %v631_v41, %v4729_v39  ;;  %vm326_vm15 = vcmp.eq.s32.totalorder %v4674_v6, %v286_v42 }
 0x3c0   : > { %v3520_v18 = vor.u32 %v3519_v15, %v3518_v30  ;;  %v3523_v7 = vshll.u32 %v3522_v33, 23  ;;  %v3666_v11 = vsub.s32 32, %v3665_v25  ;;  %v3668_v14 = vshll.u32 %v7827_v34, %v3665_v25 }
 0x3c1   : > { %v3671_v19 = vshll.u32 %v7818_v13, %v3665_v25  ;;  %v3817_v59 = vshll.u32 %v7556_v52, 30  ;;  %v3674_v37 = vshll.u32 %v7819_v57, %v3665_v25  ;;  %v3677_v40 = vshll.u32 %v7820_v60, %v3665_v25 }
 0x3c2   : > { %v3524_v55 = vor.u32 4788187, %v3523_v7  ;;  %v3527_v51 = vcvt.s32.f32 %v3520_v18  ;;  %v3669_v63 = vshrl.u32 %v7818_v13, %v3666_v11  ;;  %v3672_v22 = vshrl.u32 %v7819_v57, %v3666_v11 }
 0x3c3   : > { %v3675_v48 = vshrl.u32 %v7820_v60, %v3666_v11  ;;  %v7569_v21 = vsub.s32 %v3814_v1, %v3817_v59  ;;  %v3678_v58 = vshrl.u32 %v7821_v9, %v3666_v11  ;;  %v3680_v54 = vshll.u32 %v7821_v9, %v3665_v25 }
 0x3c4   : > { %v3525_v24 = vand.u32 2147483647, %v3524_v55  ;;  %v3670_v61 = vor.u32 %v3669_v63, %v3668_v14  ;;  %v3673_v46 = vor.u32 %v3672_v22, %v3671_v19  ;;  %v3681_v10 = vshrl.u32 %v7822_v16, %v3666_v11 }
 0x3c5   : > { %v3676_v0 = vor.u32 %v3675_v48, %v3674_v37  ;;  %v3820_v17 = vsub.s32 0, %v7569_v21  ;;  %v3679_v27 = vor.u32 %v3678_v58, %v3677_v40  ;;  %v3667_v20 = vshrl.u32 %v7827_v34, %v3666_v11  ;;  %v7582_v30 = vpop.eup %4528 }
 0x3c6   : > { %v3528_v26 = vmul.f32 %v3527_v51, %v3525_v24  ;;  %v3682_v47 = vor.u32 %v3681_v10, %v3680_v54  ;;  %vm3683_vm12 = vcmp.lt.s32.totalorder %v3664_v12, 1  ;;  %vm3686_vm13 = vcmp.lt.s32.totalorder %v3664_v12, 4 }
 0x3c7   : > { %v4262_v1 = vmin.u32 %v3820_v17, %v7569_v21  ;;  %vm3684_vm14 = vcmp.lt.s32.totalorder %v3664_v12, 2  ;;  %v3688_v8 = vsel %vm3686_vm13, %v3676_v0, 2102212464  ;;  %vm3685_vm1 = vcmp.lt.s32.totalorder %v3664_v12, 3 }
 0x3c8   : > { %v3529_v45 = vxor.u32 2147483648, %v3528_v26  ;;  %v3687_v15 = vsel %vm3683_vm12, %v3667_v20, %v3670_v61  ;;  %v3691_v33 = vsel %vm3683_vm12, %v3670_v61, %v3673_v46  ;;  %v3692_v39 = vsel %vm3686_vm13, %v3679_v27, 920167782 }
 0x3c9   : > { %v3822_v43 = vclz %v4262_v1  ;;  %v3693_v25 = vsel %vm3685_vm1, %v3676_v0, %v3692_v39  ;;  %v3695_v41 = vsel %vm3683_vm12, %v3673_v46, %v3676_v0  ;;  %v3689_v7 = vsel %vm3685_vm1, %v3673_v46, %v3688_v8 }
 0x3ca   : > { %v3530_v29 = vsel %vm3447_vm8, %v3529_v45, %v3528_v26  ;;  %v3694_v11 = vsel %vm3684_vm14, %v3691_v33, %v3693_v25  ;;  %v3696_v14 = vsel %vm3686_vm13, %v3682_v47, 1326507024  ;;  %v3857_v51 = vand.u32 2147483647, %v7576_v56 }
 0x3cb   : > { %v3533_v18 = vsel %vm7542_vm10, %v7296_v38, %v3530_v29  ;;  %v4263_v19 = vadd.s32 4294967294, %v3822_v43  ;;  %v3697_v55 = vsel %vm3685_vm1, %v3679_v27, %v3696_v14  ;;  %v3690_v22 = vsel %vm3684_vm14, %v3687_v15, %v3689_v7 }
 0x3cc   : > { %4530 = vcosq.f32 %v3533_v18  ;;  %v3698_v59 = vsel %vm3684_vm14, %v3695_v41, %v3697_v55  ;;  %v7595_v37 = vmul.u32.u64.low %v7553_v49, %v3694_v11  ;;  %v7596_v63 = vmul.u32.u64.high %v7553_v49, %v3694_v11, %v7595_v37 }
 0x3cd   : > { %4532 = vsinq.f32 %v3533_v18  ;;  %vm4264_vm4 = vcmp.lt.s32.totalorder %v4263_v19, 0  ;;  %v7600_v48 = vmul.u32.u64.low %v7553_v49, %v3698_v59  ;;  %v7601_v40 = vmul.u32.u64.high %v7553_v49, %v3698_v59, %v7600_v48 }
 0x3ce   : > { %4534 = vcosq.f32 %v7538_v44  ;;  %v3810_v24 = vadd.s32 %v7508_v3, %v7513_v28  ;;  %v3825_v58 = vsel %vm4264_vm4, 0, %v4263_v19  ;;  %v3860_v54 = vand.u32 2139095040, %v7576_v56 }
 0x3cf   : > { %v3826_v61 = vsub.s32 32, %v3825_v58  ;;  %v3830_v46 = vsub.s32 4294967266, %v3825_v58  ;;  %v3538_v12 = vand.u32 3, %v3534_v23  ;;  %v3634_v0 = vsub.s32 4, %v7416_v2 }
 0x3d0   : > { %v3706_v10 = vmul.u32 %v7553_v49, %v3690_v22  ;;  %v3709_v26 = vadd.s32 1, %v7596_v63  ;;  %v3861_v44 = vshrl.u32 %v3860_v54, 23  ;;  %v3864_v3 = vand.u32 8388607, %v3857_v51 }
 0x3d1   : > { %v3827_v28 = vshll.u32 %v7569_v21, %v3825_v58  ;;  %v3828_v17 = vshrl.u32 %v3810_v24, %v3826_v61  ;;  %v3831_v27 = vadd.s32 127, %v3830_v46  ;;  %vm3708_vm7 = vc.u32 %v7601_v40, %v7595_v37 }
 0x3d2   : > { %v3710_v5 = vsel %vm3708_vm7, %v3709_v26, %v7596_v63  ;;  %v4134_v35 = vsel %vm326_vm15, 1.0, %v7835_v31  ;;  %v4265_v23 = vadd.s32 4294967169, %v3861_v44  ;;  %v3635_v49 = vsel %vm3550_vm5, %v3634_v0, %v7416_v2 }
 0x3d3   : > { %v3829_v20 = vor.u32 %v3828_v17, %v3827_v28  ;;  %v3832_v47 = vshll.u32 %v3831_v27, 23  ;;  %v3711_v45 = vadd.s32 %v3710_v5, %v3706_v10  ;;  %vm3537_vm8 = vweird.f32 %v7296_v38 }
 0x3d4   : > { %vm3756_vm3 = vcmp.lt.s32.totalorder %v7324_v36, 0  ;;  %vm3539_vm9 = vcmp.lt.s32.totalorder %v3538_v12, 2  ;;  %vm3540_vm10 = vcmp.eq.s32.totalorder %v3538_v12, 0  ;;  %v3865_v21 = vor.u32 8388608, %v3864_v3 }
 0x3d5   : > { %v3867_v1 = vadd.s32 1, %v4265_v23  ;;  %vm7629_vm11 = vcmp.le.f32.partialorder %v3754_v62, 0.7853982  ;;  %v3833_v15 = vor.u32 4788187, %v3832_v47  ;;  %v3712_v2 = vadd.s32 536870912, %v3711_v45 }
 0x3d6   : > { %v4531_v8 = vpop.eup %4530  ;;  %vm3543_vm5 = vcmp.eq.s32.totalorder %v3538_v12, 2  ;;  %v3637_v33 = vsel %vm7520_vm6, 0, %v3635_v49  ;;  %v3836_v29 = vcvt.s32.f32 %v3829_v20  ;;  %v7636_v43 = vadd.s32 %v7595_v37, %v7601_v40 }
 0x3d7   : > { %v4533_v39 = vpop.eup %4532  ;;  %v3544_v25 = vxor.u32 2147483648, %v4531_v8  ;;  %vm3868_vm12 = vcmp.gt.s32.totalorder %v3867_v1, 0  ;;  %v3834_v41 = vand.u32 2147483647, %v3833_v15  ;;  %v7638_v18 = vshrl.u32 %v3712_v2, 30 }
 0x3d8   : > { %v3541_v62 = vxor.u32 2147483648, %v4533_v39  ;;  %v3869_v7 = vsel %vm3868_vm12, %v3867_v1, 0  ;;  %v7640_v11 = vpop.eup %4534  ;;  %v7642_v55 = vshll.u32 %v3865_v21, 8  ;;  %v7644_v50 = vand.u32 3, %v3637_v33 }
 0x3d9   : > { %v3545_v14 = vsel %vm3543_vm5, %v3544_v25, %v4533_v39  ;;  %v3871_v19 = vand.u32 31, %v3869_v7  ;;  %v3837_v59 = vmul.f32 %v3836_v29, %v3834_v41  ;;  %v3714_v63 = vshll.u32 %v7638_v18, 30  ;;  %v289_v41 = vpop.permute.xlu0 %288 }
 0x3da   : > { %v3542_v37 = vsel %vm3540_vm10, %v4531_v8, %v3541_v62  ;;  %v3644_v22 = vxor.u32 2147483648, %v7582_v30  ;;  %v3870_v40 = vshrl.u32 %v3869_v7, 5  ;;  %vm3643_vm6 = vcmp.eq.s32.totalorder %v7644_v50, 0 }
 0x3db   : > { %v3546_v48 = vsel %vm3539_vm9, %v3542_v37, %v3545_v14  ;;  %v3872_v24 = vsub.s32 32, %v3871_v19  ;;  %v3874_v58 = vshll.u32 %v7827_v34, %v3871_v19  ;;  %v3838_v54 = vxor.u32 2147483648, %v3837_v59 }
 0x3dc   : > { %v7651_v61 = vsub.s32 %v3711_v45, %v3714_v63  ;;  %v3547_v46 = vsel %vm3537_vm8, nan, %v3546_v48  ;;  %v3877_v0 = vshll.u32 %v7818_v13, %v3871_v19  ;;  %v3880_v44 = vshll.u32 %v7819_v57, %v3871_v19 }
 0x3dd   : > { %v3990_v10 = vsel %vm3960_vm0, %v4134_v35, %v3547_v46  ;;  %v3875_v26 = vshrl.u32 %v7818_v13, %v3872_v24  ;;  %v3878_v12 = vshrl.u32 %v7819_v57, %v3872_v24  ;;  %v3839_v3 = vsel %vm3756_vm3, %v3838_v54, %v3837_v59 }
 0x3de   : > { %v3717_v28 = vsub.s32 0, %v7651_v61  ;;  %4023 = vst.msk [vmem:[%s5024_s21 + $0xd8] sm:$0xff] %vm3995_vm2, %v3990_v10  ;;  %v3881_v38 = vshrl.u32 %v7820_v60, %v3872_v24  ;;  %v3883_v17 = vshll.u32 %v7820_v60, %v3871_v19  ;;  %v3842_v27 = vsel %vm7629_vm11, %v7324_v36, %v3839_v3 }
 0x3df   : > { %v3876_v13 = vor.u32 %v3875_v26, %v3874_v58  ;;  %v3879_v5 = vor.u32 %v3878_v12, %v3877_v0  ;;  %v3884_v35 = vshrl.u32 %v7821_v9, %v3872_v24  ;;  %v3647_v49 = vxor.u32 2147483648, %v7640_v11 }
 0x3e0   : > { %v4258_v57 = vmin.u32 %v3717_v28, %v7651_v61  ;;  %v3882_v23 = vor.u32 %v3881_v38, %v3880_v44  ;;  %v3873_v20 = vshrl.u32 %v7827_v34, %v3872_v24  ;;  %v3886_v60 = vshll.u32 %v7821_v9, %v3871_v19 }
 0x3e1   : > { %v3885_v47 = vor.u32 %v3884_v35, %v3883_v17  ;;  %v3887_v45 = vshrl.u32 %v7822_v16, %v3872_v24  ;;  %4536 = vcosq.f32 %v3842_v27  ;;  %vm3889_vm13 = vcmp.lt.s32.totalorder %v3870_v40, 1 }
 0x3e2   : > { %v3719_v21 = vclz %v4258_v57  ;;  %vm3892_vm14 = vcmp.lt.s32.totalorder %v3870_v40, 4  ;;  %4538 = vsinq.f32 %v3842_v27  ;;  %v3897_v15 = vsel %vm3889_vm13, %v3876_v13, %v3879_v5 }
 0x3e3   : > { %v3888_v1 = vor.u32 %v3887_v45, %v3886_v60  ;;  %v3894_v8 = vsel %vm3892_vm14, %v3882_v23, 2102212464  ;;  %vm3891_vm15 = vcmp.lt.s32.totalorder %v3870_v40, 3  ;;  %v3898_v33 = vsel %vm3892_vm14, %v3885_v47, 920167782  ;;  %v295_v60 = vpop.permute.xlu0 %294 }
 0x3e4   : > { %v4259_v2 = vadd.s32 4294967294, %v3719_v21  ;;  %v3901_v39 = vsel %vm3889_vm13, %v3879_v5, %v3882_v23  ;;  %vm3890_vm1 = vcmp.lt.s32.totalorder %v3870_v40, 2  ;;  %v3893_v29 = vsel %vm3889_vm13, %v3873_v20, %v3876_v13 }
 0x3e5   : > { %v3899_v34 = vsel %vm3891_vm15, %v3882_v23, %v3898_v33  ;;  %v3902_v25 = vsel %vm3892_vm14, %v3888_v1, 1326507024  ;;  %v3895_v9 = vsel %vm3891_vm15, %v3879_v5, %v3894_v8  ;;  %v3645_v48 = vsel %vm3643_vm6, %v7640_v11, %v3644_v22 }
 0x3e6   : > { %vm4260_vm4 = vcmp.lt.s32.totalorder %v4259_v2, 0  ;;  %v3900_v16 = vsel %vm3890_vm1, %v3897_v15, %v3899_v34  ;;  %v3903_v62 = vsel %vm3891_vm15, %v3885_v47, %v3902_v25  ;;  %vm327_vm7 = vcmp.eq.s32.totalorder %v4674_v6, %v289_v41 }
 0x3e7   : > { %v3722_v7 = vsel %vm4260_vm4, 0, %v4259_v2  ;;  %v3904_v14 = vsel %vm3890_vm1, %v3901_v39, %v3903_v62  ;;  %v7681_v19 = vmul.u32.u64.low %v7642_v55, %v3900_v16  ;;  %v7682_v59 = vmul.u32.u64.high %v7642_v55, %v3900_v16, %v7681_v19 }
 0x3e8   : > { %v3723_v63 = vsub.s32 32, %v3722_v7  ;;  %v3727_v37 = vsub.s32 4294967266, %v3722_v7  ;;  %v3896_v24 = vsel %vm3890_vm1, %v3893_v29, %v3895_v9  ;;  %vm3646_vm8 = vcmp.eq.s32.totalorder %v7644_v50, 2 }
 0x3e9   : > { %v7691_v58 = vmul.u32.u64.low %v7642_v55, %v3904_v14  ;;  %v7692_v54 = vmul.u32.u64.high %v7642_v55, %v3904_v14, %v7691_v58  ;;  %v3724_v46 = vshll.u32 %v7651_v61, %v3722_v7  ;;  %v3648_v26 = vsel %vm3646_vm8, %v3647_v49, %v7582_v30  ;;  %v292_v14 = vpop.permute.xlu1 %291 }
 0x3ea   : > { %v3725_v0 = vshrl.u32 %v7636_v43, %v3723_v63  ;;  %v3728_v10 = vadd.s32 127, %v3727_v37  ;;  %v3915_v12 = vadd.s32 1, %v7682_v59  ;;  %vm3642_vm9 = vcmp.lt.s32.totalorder %v7644_v50, 2 }
 0x3eb   : > { %v4537_v11 = vpop.eup %4536  ;;  %vm3640_vm10 = vweird.f32 %v7236_v4  ;;  %v3649_v44 = vsel %vm3642_vm9, %v3645_v48, %v3648_v26  ;;  %v3912_v28 = vmul.u32 %v7642_v55, %v3896_v24  ;;  %vm3914_vm5 = vc.u32 %v7692_v54, %v7681_v19 }
 0x3ec   : > { %v3726_v22 = vor.u32 %v3725_v0, %v3724_v46  ;;  %v3729_v40 = vshll.u32 %v3728_v10, 23  ;;  %v4539_v3 = vpop.eup %4538  ;;  %v3650_v43 = vsel %vm3640_vm10, nan, %v3649_v44  ;;  %v4135_v30 = vsel %vm327_vm7, 1.0, %v7835_v31 }
 0x3ed   : > { %v3916_v50 = vsel %vm3914_vm5, %v3915_v12, %v7682_v59  ;;  %v3991_v38 = vsel %vm3960_vm0, %v4135_v30, %v3650_v43  ;;  %v3840_v4 = vsub.s32 4, %v7556_v52  ;;  %v3850_v23 = vxor.u32 2147483648, %v4539_v3 }
 0x3ee   : > { %v3730_v61 = vor.u32 4788187, %v3729_v40  ;;  %v3917_v17 = vadd.s32 %v3916_v50, %v3912_v28  ;;  %4024 = vst.msk [vmem:[%s5024_s21 + $0xe0] sm:$0xff] %vm3995_vm2, %v3991_v38  ;;  %v3733_v27 = vcvt.s32.f32 %v3726_v22  ;;  %v3853_v47 = vxor.u32 2147483648, %v4537_v11 }
 0x3ef   : > { %v3841_v5 = vsel %vm3756_vm3, %v3840_v4, %v7556_v52  ;;  %vm3653_vm12 = vcmp.lt.s32.totalorder %v7458_v53, 0  ;;  %vm7723_vm6 = vcmp.le.f32.partialorder %v3651_v32, 0.7853982  ;;  %v3737_v42 = vsub.s32 4, %v7638_v18 }
 0x3f0   : > { %v3731_v55 = vand.u32 2147483647, %v3730_v61  ;;  %v3918_v13 = vadd.s32 536870912, %v3917_v17  ;;  %v3843_v57 = vsel %vm7629_vm11, 0, %v3841_v5  ;;  %vm329_vm13 = vcmp.eq.s32.totalorder %v4674_v6, %v295_v60  ;;  %v298_v5 = vpop.permute.xlu1 %297 }
 0x3f1   : > { %v3847_v20 = vand.u32 3, %v3843_v57  ;;  %vm3846_vm15 = vweird.f32 %v7324_v36  ;;  %v4137_v34 = vsel %vm329_vm13, 1.0, %v7835_v31  ;;  %v3738_v25 = vsel %vm3653_vm12, %v3737_v42, %v7638_v18 }
 0x3f2   : > { %v3734_v35 = vmul.f32 %v3733_v27, %v3731_v55  ;;  %v7718_v49 = vshrl.u32 %v3918_v13, 30  ;;  %v3740_v36 = vsel %vm7723_vm6, 0, %v3738_v25  ;;  %v3913_v18 = vadd.s32 %v7681_v19, %v7692_v54 }
 0x3f3   : > { %vm3849_vm3 = vcmp.eq.s32.totalorder %v3847_v20, 0  ;;  %vm3852_vm11 = vcmp.eq.s32.totalorder %v3847_v20, 2  ;;  %vm3848_vm14 = vcmp.lt.s32.totalorder %v3847_v20, 2  ;;  %v3744_v7 = vand.u32 3, %v3740_v36 }
 0x3f4   : > { %v3735_v45 = vxor.u32 2147483648, %v3734_v35  ;;  %v3920_v52 = vshll.u32 %v7718_v49, 30  ;;  %v3851_v8 = vsel %vm3849_vm3, %v4537_v11, %v3850_v23  ;;  %v3854_v2 = vsel %vm3852_vm11, %v3853_v47, %v4539_v3 }
 0x3f5   : > { %v3855_v33 = vsel %vm3848_vm14, %v3851_v8, %v3854_v2  ;;  %vm328_vm4 = vcmp.eq.s32.totalorder %v4674_v6, %v292_v14  ;;  %vm3746_vm7 = vcmp.eq.s32.totalorder %v3744_v7, 0  ;;  %vm3749_vm8 = vcmp.eq.s32.totalorder %v3744_v7, 2 }
 0x3f6   : > { %v3736_v1 = vsel %vm3653_vm12, %v3735_v45, %v3734_v35  ;;  %v3921_v15 = vsub.s32 %v3917_v17, %v3920_v52  ;;  %v3856_v29 = vsel %vm3846_vm15, nan, %v3855_v33  ;;  %vm3745_vm9 = vcmp.lt.s32.totalorder %v3744_v7, 2 }
 0x3f7   : > { %v3739_v32 = vsel %vm7723_vm6, %v7458_v53, %v3736_v1  ;;  %v3993_v41 = vsel %vm3960_vm0, %v4137_v34, %v3856_v29  ;;  %vm3743_vm10 = vweird.f32 %v7458_v53  ;;  %v4136_v54 = vsel %vm328_vm4, 1.0, %v7835_v31 }
 0x3f8   : > { %4540 = vcosq.f32 %v3739_v32  ;;  %v3923_v39 = vsub.s32 0, %v3921_v15  ;;  %4026 = vst.msk [vmem:[%s5024_s21 + $0xf0] sm:$0xff] %vm3995_vm2, %v3993_v41  ;;  %vm3859_vm5 = vcmp.lt.s32.totalorder %v7576_v56, 0  ;;  %vm3858_vm12 = vcmp.le.f32.partialorder %v3857_v51, 0.7853982 }
 0x3f9   : > { %4542 = vsinq.f32 %v3739_v32  ;;  %v3943_v38 = vsub.s32 4, %v7718_v49  ;;  %vm330_vm3 = vcmp.eq.s32.totalorder %v4674_v6, %v298_v5  ;;  %vm3949_vm14 = vweird.f32 %v7576_v56 }
 0x3fa   : > { %v4266_v9 = vmin.u32 %v3923_v39, %v3921_v15 }
 0x3fb   : > { %v3944_v4 = vsel %vm3859_vm5, %v3943_v38, %v7718_v49  ;;  %v4138_v49 = vsel %vm330_vm3, 1.0, %v7835_v31 }
 0x3fc   : > { %v3925_v16 = vclz %v4266_v9  ;;  %v3946_v55 = vsel %vm3858_vm12, 0, %v3944_v4 }
 0x3fd   : > { %v3950_v27 = vand.u32 3, %v3946_v55 }
 0x3fe   : > { %v4267_v62 = vadd.s32 4294967294, %v3925_v16 }
 0x3ff   : > { %vm3955_vm6 = vcmp.eq.s32.totalorder %v3950_v27, 2  ;;  %vm3952_vm11 = vcmp.eq.s32.totalorder %v3950_v27, 0  ;;  %vm3951_vm13 = vcmp.lt.s32.totalorder %v3950_v27, 2 }
 0x400   : > { %vm4268_vm1 = vcmp.lt.s32.totalorder %v4267_v62, 0 }
 0x401   : > { %v3928_v63 = vsel %vm4268_vm1, 0, %v4267_v62 }
 0x402   : > { %v4541_v59 = vpop.eup %4540  ;;  %v3929_v48 = vsub.s32 32, %v3928_v63  ;;  %v3933_v24 = vsub.s32 4294967266, %v3928_v63  ;;  %v3930_v0 = vshll.u32 %v3921_v15, %v3928_v63 }
 0x403   : > { %v4543_v37 = vpop.eup %4542  ;;  %v3750_v58 = vxor.u32 2147483648, %v4541_v59 }
 0x404   : > { %v3747_v46 = vxor.u32 2147483648, %v4543_v37  ;;  %v3931_v10 = vshrl.u32 %v3913_v18, %v3929_v48  ;;  %v3934_v26 = vadd.s32 127, %v3933_v24 }
 0x405   : > { %v3751_v12 = vsel %vm3749_vm8, %v3750_v58, %v4543_v37 }
 0x406   : > { %v3748_v11 = vsel %vm3746_vm7, %v4541_v59, %v3747_v46  ;;  %v3932_v22 = vor.u32 %v3931_v10, %v3930_v0  ;;  %v3935_v40 = vshll.u32 %v3934_v26, 23 }
 0x407   : > { %v3752_v19 = vsel %vm3745_vm9, %v3748_v11, %v3751_v12 }
 0x408   : > { %v3753_v44 = vsel %vm3743_vm10, nan, %v3752_v19  ;;  %v3936_v3 = vor.u32 4788187, %v3935_v40  ;;  %v3939_v30 = vcvt.s32.f32 %v3932_v22 }
 0x409   : > { %v3992_v28 = vsel %vm3960_vm0, %v4136_v54, %v3753_v44 }
 0x40a   : > { %4025 = vst.msk [vmem:[%s5024_s21 + $0xe8] sm:$0xff] %vm3995_vm2, %v3992_v28  ;;  %v3937_v43 = vand.u32 2147483647, %v3936_v3 }
 0x40c   : > { %v3940_v61 = vmul.f32 %v3939_v30, %v3937_v43 }
 0x40e   : > { %v3941_v50 = vxor.u32 2147483648, %v3940_v61 }
 0x410   : > { %v3942_v53 = vsel %vm3859_vm5, %v3941_v50, %v3940_v61 }
 0x411   : > { %v3945_v17 = vsel %vm3858_vm12, %v7576_v56, %v3942_v53 }
 0x412   : > { %4544 = vcosq.f32 %v3945_v17 }
 0x413   : > { %4546 = vsinq.f32 %v3945_v17 }
 0x41c   : > { %v4545_v13 = vpop.eup %4544 }
 0x41d   : > { %v4547_v35 = vpop.eup %4546  ;;  %v3956_v57 = vxor.u32 2147483648, %v4545_v13 }
 0x41e   : > { %v3953_v23 = vxor.u32 2147483648, %v4547_v35 }
 0x41f   : > { %v3957_v51 = vsel %vm3955_vm6, %v3956_v57, %v4547_v35 }
 0x420   : > { %v3954_v20 = vsel %vm3952_vm11, %v4545_v13, %v3953_v23 }
 0x421   : > { %v3958_v47 = vsel %vm3951_vm13, %v3954_v20, %v3957_v51 }
 0x422   : > { %v3959_v60 = vsel %vm3949_vm14, nan, %v3958_v47 }
 0x423   : > { %v3994_v45 = vsel %vm3960_vm0, %v4138_v49, %v3959_v60 }
 0x424   : > { %4027 = vst.msk [vmem:[%s5024_s21 + $0xf8] sm:$0xff] %vm3995_vm2, %v3994_v45 }
 0x425 PF: > { %s12_s9 = sadd.s32 1, %s4554_s9  }
 0x426   : > { %p9_p4 = scmp.ge.s32.totalorder %s12_s9, 6  }
 0x428   :  { %11 = sbr.rel (!%p9_p4) target bundleno = 1 (0x1), region = 61 }

</bundles_post_ra>
